<compile_context>
chip_gen: v7x
topology: tpu7x:2x2x1
jax: 0.10.0
libtpu: 0.0.40
codegen_flags: <defaults>
</compile_context>

<pallas_src>
import functools

import jax
import jax.numpy as jnp
from jax import lax
from jax.experimental import pallas as pl
from jax.experimental.pallas import tpu as pltpu

NBINS = 10
_ACC_IMG_STRIDE = 32          # rows reserved per image in the accumulator
_ACC_ROWS = 2 * _ACC_IMG_STRIDE


def _round_up(x, m):
    return (x + m - 1) // m * m


def _hsv_from_rgb(r, g, b):
    """Elementwise RGB->HSV matching the reference rgb_to_hsv (torch) exactly.

    Works on any shape.  Later masks (g, then b) overwrite earlier ones,
    matching torch's sequential masked assignments.
    """
    r = jnp.clip(r, 0.0, 1.0)
    g = jnp.clip(g, 0.0, 1.0)
    b = jnp.clip(b, 0.0, 1.0)
    maxc = jnp.maximum(r, jnp.maximum(g, b))
    minc = jnp.minimum(r, jnp.minimum(g, b))
    diff = maxc - minc
    nonzero_diff = diff != 0.0
    safe_diff = jnp.where(nonzero_diff, diff, 1.0)

    # (g - b) / diff is always in [-1, 1], so `% 6` == add 6 when negative
    # (bit-exact: x - 6*floor(x/6) with floor == -1 is computed as x + 6).
    x = (g - b) / safe_diff
    hue_r = jnp.where(x < 0.0, x + 6.0, x)
    hue_g = (b - r) / safe_diff + 2.0
    hue_b = (r - g) / safe_diff + 4.0

    mask_r = (maxc == r) & nonzero_diff
    mask_g = (maxc == g) & nonzero_diff
    mask_b = (maxc == b) & nonzero_diff

    hue = jnp.where(mask_r, hue_r, 0.0)
    hue = jnp.where(mask_g, hue_g, hue)   # g overrides r (torch assignment order)
    hue = jnp.where(mask_b, hue_b, hue)   # b overrides g
    hue = hue / 6.0

    safe_max = jnp.where(maxc != 0.0, maxc, 1.0)
    sat = jnp.where(maxc != 0.0, diff / safe_max, 0.0)
    val = maxc
    return hue, sat, val


def _color_hist_loss_kernel(real_ref, fake_ref, out_ref, acc_ref,
                            *, alpha, beta, gamma, nbins):
    # Grid = (batch, row_blocks); accumulator persists across the whole grid.
    is_first = jnp.logical_and(pl.program_id(0) == 0, pl.program_id(1) == 0)
    is_last = jnp.logical_and(pl.program_id(0) == pl.num_programs(0) - 1,
                              pl.program_id(1) == pl.num_programs(1) - 1)

    @pl.when(is_first)
    def _():
        acc_ref[...] = jnp.zeros_like(acc_ref)

    # Per-tile: RGB -> HSV on dense (tile_rows, 128) arrays, then accumulate
    # per-lane histogram counts (one row of acc_ref per (image, channel, bin)).
    for img, rgb_ref in enumerate((real_ref, fake_ref)):
        r = rgb_ref[0, 0, :, :]            # (tile_rows, 128)
        g = rgb_ref[0, 1, :, :]
        b = rgb_ref[0, 2, :, :]
        h, s, v = _hsv_from_rgb(r, g, b)
        base = img * _ACC_IMG_STRIDE
        for c, chan in enumerate((h, s, v)):        # 0=H, 1=S, 2=V
            # torch.histc(bins=nbins, min=0, max=1): idx = floor(v*nbins),
            # v == 1 falls into the last bin.
            idx = jnp.clip(jnp.floor(chan * nbins), 0.0, nbins - 1.0)
            for b_ in range(nbins):
                ind = (idx == float(b_)).astype(jnp.float32)   # (tile_rows,128)
                row = base + c * nbins + b_
                acc_ref[row:row + 1, :] += jnp.sum(ind, axis=0, keepdims=True)

    @pl.when(is_last)
    def _():
        acc = acc_ref[...]                                      # (64, 128)
        # Per-lane signed count difference (padding zeros cancel here), then
        # reduce over lanes BEFORE the abs (loss uses |total_real - total_fake|).
        d_lane = acc[0:_ACC_IMG_STRIDE, :] - acc[_ACC_IMG_STRIDE:, :]  # (32,128)
        d = jnp.abs(jnp.sum(d_lane, axis=1, keepdims=True))            # (32, 1)
        rowi = lax.broadcasted_iota(jnp.int32, (_ACC_IMG_STRIDE, 1), 0)
        wgt = jnp.where(rowi < nbins, alpha,
              jnp.where(rowi < 2 * nbins, beta,
              jnp.where(rowi < 3 * nbins, gamma, 0.0))).astype(jnp.float32)
        # loss = alpha*mean|dH| + beta*mean|dS| + gamma*mean|dV|
        out_ref[...] = jnp.sum(d * wgt, axis=0, keepdims=True) / nbins  # (1, 1)


def color_histogram_loss(x_real, x_fake, alpha=0.3, beta=0.4, gamma=0.4,
                         block_rows=128):
    """JAX/Pallas equivalent of ColorHistogramLoss.forward (NCHW inputs)."""
    n, c, hgt, wid = x_real.shape
    assert c == 3, "RGB input expected"
    assert x_fake.shape == x_real.shape
    hw = hgt * wid

    rows = pl.cdiv(hw, 128)                       # sublane rows / image / channel
    if rows <= block_rows:
        tr = _round_up(rows, 8)                   # single row-block per image
    else:
        tr = block_rows                           # multiple of 8 assumed (default 128)
    rows_pad = _round_up(rows, tr)
    hw_pad = rows_pad * 128

    def prep(x):
        x = x.astype(jnp.float32).reshape(n, 3, hw)
        if hw_pad != hw:
            # Identical zero padding for real & fake -> cancels in bin 0.
            x = jnp.pad(x, ((0, 0), (0, 0), (0, hw_pad - hw)))
        return x.reshape(n, 3, rows_pad, 128)     # free reshape (row-major)

    real = prep(x_real)
    fake = prep(x_fake)

    nblk = rows_pad // tr
    grid = (n, nblk)
    kernel = functools.partial(_color_hist_loss_kernel,
                               alpha=float(alpha), beta=float(beta),
                               gamma=float(gamma), nbins=NBINS)

    out = pl.pallas_call(
        kernel,
        out_shape=jax.ShapeDtypeStruct((1, 1), jnp.float32),
        grid_spec=pltpu.PrefetchScalarGridSpec(
            num_scalar_prefetch=0,
            grid=grid,
            in_specs=[
                pl.BlockSpec((1, 3, tr, 128), lambda bi, ji: (bi, 0, ji, 0)),
                pl.BlockSpec((1, 3, tr, 128), lambda bi, ji: (bi, 0, ji, 0)),
            ],
            out_specs=pl.BlockSpec((1, 1), lambda bi, ji: (0, 0)),
            scratch_shapes=[
                pltpu.VMEM((_ACC_ROWS, 128), jnp.float32),  # per-lane histograms
            ],
        ),
        compiler_params=pltpu.CompilerParams(
            dimension_semantics=("arbitrary", "arbitrary"),
            internal_scratch_in_bytes=4 * 1024 * 1024,      # headroom for spills
        ),
    )(real, fake)
    return out[0, 0]


def reference_color_histogram_loss(x_real, x_fake, alpha=0.3, beta=0.4,
                                   gamma=0.4):
    """Pure-JAX reference (same math as the PyTorch module)."""
    def hists(x):
        flat = jnp.transpose(x.astype(jnp.float32), (1, 0, 2, 3)).reshape(3, -1)
        hh, ss, vv = _hsv_from_rgb(flat[0:1], flat[1:2], flat[2:3])
        hsv = jnp.concatenate([hh, ss, vv], axis=0)                  # (3, P)
        idx = jnp.clip(jnp.floor(hsv * NBINS), 0, NBINS - 1).astype(jnp.int32)
        onehot = (idx[:, :, None] ==
                  jnp.arange(NBINS)[None, None, :]).astype(jnp.float32)
        return jnp.sum(onehot, axis=1)                               # (3, NBINS)

    hr = hists(x_real)
    hf = hists(x_fake)
    means = jnp.mean(jnp.abs(hr - hf), axis=1)                       # (3,)
    return alpha * means[0] + beta * means[1] + gamma * means[2]


if __name__ == "__main__":
    key = jax.random.PRNGKey(0)
    k1, k2 = jax.random.split(key)
    shape = (2, 3, 16, 16)   # batch=2, RGB, 16x16 spatial
    # Slightly out of [0,1] to exercise the clamp in rgb_to_hsv.
    x_real = jax.random.uniform(k1, shape, jnp.float32, minval=-0.1, maxval=1.1)
    x_fake = jax.random.uniform(k2, shape, jnp.float32, minval=-0.1, maxval=1.1)

    loss = color_histogram_loss(x_real, x_fake)
    jax.block_until_ready(loss)

    ref = reference_color_histogram_loss(x_real, x_fake)
    assert jnp.allclose(loss, ref, rtol=1e-5, atol=1e-4), (loss, ref)

    print("KERNEL_OK")
</pallas_src>

<mosaic_0001>
module attributes {stable_mosaic.version = 11 : i64} {
  func.func @_color_hist_loss_kernel(%arg0: i32, %arg1: i32, %arg2: memref<1x3x8x128xf32, #tpu.memory_space<vmem>>, %arg3: memref<1x3x8x128xf32, #tpu.memory_space<vmem>>, %arg4: memref<1x1xf32, #tpu.memory_space<vmem>>, %arg5: memref<64x128xf32, #tpu.memory_space<vmem>>) attributes {dimension_semantics = [#tpu.dimension_semantics<arbitrary>, #tpu.dimension_semantics<arbitrary>], iteration_bounds = array<i64: 2, 1>, scalar_prefetch = 0 : i64, scratch_operands = 1 : i64, tpu.core_type = #tpu.core_type<tc>, window_params = [{transform_indices = @transform_0, window_bounds = array<i64: 1, 3, 8, 128>}, {transform_indices = @transform_1, window_bounds = array<i64: 1, 3, 8, 128>}, {pipeline_mode = #tpu.pipeline_mode<synchronous>, transform_indices = @transform_2, window_bounds = array<i64: 1, 1>}]} {
    %c0_i32 = arith.constant 0 : i32
    %0 = arith.cmpi eq, %arg0, %c0_i32 : i32
    %c0_i32_0 = arith.constant 0 : i32
    %1 = arith.cmpi eq, %arg1, %c0_i32_0 : i32
    %2 = arith.andi %0, %1 : i1
    %c1_i32 = arith.constant 1 : i32
    %3 = arith.cmpi eq, %arg0, %c1_i32 : i32
    %c0_i32_1 = arith.constant 0 : i32
    %4 = arith.cmpi eq, %arg1, %c0_i32_1 : i32
    %5 = arith.andi %3, %4 : i1
    %6 = arith.extui %2 : i1 to i32
    %c0_i32_2 = arith.constant 0 : i32
    %7 = arith.cmpi ne, %6, %c0_i32_2 : i32
    scf.if %7 {
      %cst_381 = arith.constant 0.000000e+00 : f32
      %718 = vector.broadcast %cst_381 : f32 to vector<64x128xf32>
      %c0_382 = arith.constant 0 : index
      %c0_383 = arith.constant 0 : index
      %719 = vector.load %arg5[%c0_382, %c0_383] : memref<64x128xf32, #tpu.memory_space<vmem>>, vector<64x128xf32>
      tpu.vector_store %arg5[%c0_382, %c0_383], %718 {strides = array<i32>} : memref<64x128xf32, #tpu.memory_space<vmem>>, vector<64x128xf32>,
    } else {
    }
    %c0 = arith.constant 0 : index
    %c0_3 = arith.constant 0 : index
    %c0_4 = arith.constant 0 : index
    %c0_5 = arith.constant 0 : index
    %8 = vector.load %arg2[%c0, %c0_3, %c0_4, %c0_5] : memref<1x3x8x128xf32, #tpu.memory_space<vmem>>, vector<1x1x8x128xf32>
    %9 = vector.shape_cast %8 : vector<1x1x8x128xf32> to vector<8x128xf32>
    %c0_6 = arith.constant 0 : index
    %c1 = arith.constant 1 : index
    %c0_7 = arith.constant 0 : index
    %c0_8 = arith.constant 0 : index
    %10 = vector.load %arg2[%c0_6, %c1, %c0_7, %c0_8] : memref<1x3x8x128xf32, #tpu.memory_space<vmem>>, vector<1x1x8x128xf32>
    %11 = vector.shape_cast %10 : vector<1x1x8x128xf32> to vector<8x128xf32>
    %c0_9 = arith.constant 0 : index
    %c2 = arith.constant 2 : index
    %c0_10 = arith.constant 0 : index
    %c0_11 = arith.constant 0 : index
    %12 = vector.load %arg2[%c0_9, %c2, %c0_10, %c0_11] : memref<1x3x8x128xf32, #tpu.memory_space<vmem>>, vector<1x1x8x128xf32>
    %13 = vector.shape_cast %12 : vector<1x1x8x128xf32> to vector<8x128xf32>
    %cst = arith.constant 0.000000e+00 : f32
    %cst_12 = arith.constant 1.000000e+00 : f32
    %14 = vector.broadcast %cst : f32 to vector<8x128xf32>
    %15 = arith.maximumf %14, %9 : vector<8x128xf32>
    %16 = vector.broadcast %cst_12 : f32 to vector<8x128xf32>
    %17 = arith.minimumf %16, %15 : vector<8x128xf32>
    %cst_13 = arith.constant 0.000000e+00 : f32
    %cst_14 = arith.constant 1.000000e+00 : f32
    %18 = vector.broadcast %cst_13 : f32 to vector<8x128xf32>
    %19 = arith.maximumf %18, %11 : vector<8x128xf32>
    %20 = vector.broadcast %cst_14 : f32 to vector<8x128xf32>
    %21 = arith.minimumf %20, %19 : vector<8x128xf32>
    %cst_15 = arith.constant 0.000000e+00 : f32
    %cst_16 = arith.constant 1.000000e+00 : f32
    %22 = vector.broadcast %cst_15 : f32 to vector<8x128xf32>
    %23 = arith.maximumf %22, %13 : vector<8x128xf32>
    %24 = vector.broadcast %cst_16 : f32 to vector<8x128xf32>
    %25 = arith.minimumf %24, %23 : vector<8x128xf32>
    %26 = arith.maximumf %21, %25 : vector<8x128xf32>
    %27 = arith.maximumf %17, %26 : vector<8x128xf32>
    %28 = arith.minimumf %21, %25 : vector<8x128xf32>
    %29 = arith.minimumf %17, %28 : vector<8x128xf32>
    %30 = arith.subf %27, %29 : vector<8x128xf32>
    %cst_17 = arith.constant 0.000000e+00 : f32
    %31 = vector.broadcast %cst_17 : f32 to vector<8x128xf32>
    %32 = arith.cmpf one, %30, %31 : vector<8x128xf32>
    %cst_18 = arith.constant 1.000000e+00 : f32
    %33 = vector.broadcast %cst_18 : f32 to vector<8x128xf32>
    %34 = arith.select %32, %30, %33 : vector<8x128xi1>, vector<8x128xf32>
    %35 = arith.subf %21, %25 : vector<8x128xf32>
    %36 = arith.divf %35, %34 : vector<8x128xf32>
    %cst_19 = arith.constant 0.000000e+00 : f32
    %37 = vector.broadcast %cst_19 : f32 to vector<8x128xf32>
    %38 = arith.cmpf olt, %36, %37 : vector<8x128xf32>
    %cst_20 = arith.constant 6.000000e+00 : f32
    %39 = vector.broadcast %cst_20 : f32 to vector<8x128xf32>
    %40 = arith.addf %36, %39 : vector<8x128xf32>
    %41 = arith.select %38, %40, %36 : vector<8x128xi1>, vector<8x128xf32>
    %42 = arith.subf %25, %17 : vector<8x128xf32>
    %43 = arith.divf %42, %34 : vector<8x128xf32>
    %cst_21 = arith.constant 2.000000e+00 : f32
    %44 = vector.broadcast %cst_21 : f32 to vector<8x128xf32>
    %45 = arith.addf %43, %44 : vector<8x128xf32>
    %46 = arith.subf %17, %21 : vector<8x128xf32>
    %47 = arith.divf %46, %34 : vector<8x128xf32>
    %cst_22 = arith.constant 4.000000e+00 : f32
    %48 = vector.broadcast %cst_22 : f32 to vector<8x128xf32>
    %49 = arith.addf %47, %48 : vector<8x128xf32>
    %50 = arith.cmpf oeq, %27, %17 : vector<8x128xf32>
    %51 = arith.andi %50, %32 : vector<8x128xi1>
    %52 = arith.cmpf oeq, %27, %21 : vector<8x128xf32>
    %53 = arith.andi %52, %32 : vector<8x128xi1>
    %54 = arith.cmpf oeq, %27, %25 : vector<8x128xf32>
    %55 = arith.andi %54, %32 : vector<8x128xi1>
    %cst_23 = arith.constant 0.000000e+00 : f32
    %56 = vector.broadcast %cst_23 : f32 to vector<8x128xf32>
    %57 = arith.select %51, %41, %56 : vector<8x128xi1>, vector<8x128xf32>
    %58 = arith.select %53, %45, %57 : vector<8x128xi1>, vector<8x128xf32>
    %59 = arith.select %55, %49, %58 : vector<8x128xi1>, vector<8x128xf32>
    %cst_24 = arith.constant 6.000000e+00 : f32
    %60 = vector.broadcast %cst_24 : f32 to vector<8x128xf32>
    %61 = arith.divf %59, %60 : vector<8x128xf32>
    %cst_25 = arith.constant 0.000000e+00 : f32
    %62 = vector.broadcast %cst_25 : f32 to vector<8x128xf32>
    %63 = arith.cmpf one, %27, %62 : vector<8x128xf32>
    %cst_26 = arith.constant 1.000000e+00 : f32
    %64 = vector.broadcast %cst_26 : f32 to vector<8x128xf32>
    %65 = arith.select %63, %27, %64 : vector<8x128xi1>, vector<8x128xf32>
    %cst_27 = arith.constant 0.000000e+00 : f32
    %66 = vector.broadcast %cst_27 : f32 to vector<8x128xf32>
    %67 = arith.cmpf one, %27, %66 : vector<8x128xf32>
    %68 = arith.divf %30, %65 : vector<8x128xf32>
    %cst_28 = arith.constant 0.000000e+00 : f32
    %69 = vector.broadcast %cst_28 : f32 to vector<8x128xf32>
    %70 = arith.select %67, %68, %69 : vector<8x128xi1>, vector<8x128xf32>
    %cst_29 = arith.constant 1.000000e+01 : f32
    %71 = vector.broadcast %cst_29 : f32 to vector<8x128xf32>
    %72 = arith.mulf %61, %71 : vector<8x128xf32>
    %73 = math.floor %72 : vector<8x128xf32>
    %cst_30 = arith.constant 0.000000e+00 : f32
    %cst_31 = arith.constant 9.000000e+00 : f32
    %74 = vector.broadcast %cst_30 : f32 to vector<8x128xf32>
    %75 = arith.maximumf %74, %73 : vector<8x128xf32>
    %76 = vector.broadcast %cst_31 : f32 to vector<8x128xf32>
    %77 = arith.minimumf %76, %75 : vector<8x128xf32>
    %cst_32 = arith.constant 0.000000e+00 : f32
    %78 = vector.broadcast %cst_32 : f32 to vector<8x128xf32>
    %79 = arith.cmpf oeq, %77, %78 : vector<8x128xf32>
    %80 = arith.extui %79 : vector<8x128xi1> to vector<8x128xi32>
    %81 = arith.sitofp %80 : vector<8x128xi32> to vector<8x128xf32>
    %c0_33 = arith.constant 0 : index
    %c0_34 = arith.constant 0 : index
    %82 = vector.load %arg5[%c0_33, %c0_34] : memref<64x128xf32, #tpu.memory_space<vmem>>, vector<1x128xf32>
    %cst_35 = arith.constant dense<0.000000e+00> : vector<128xf32>
    %83 = vector.multi_reduction <add>, %81, %cst_35 [0] : vector<8x128xf32> to vector<128xf32>
    %84 = vector.shape_cast %83 : vector<128xf32> to vector<1x128xf32>
    %85 = arith.addf %82, %84 : vector<1x128xf32>
    %c0_36 = arith.constant 0 : index
    %c0_37 = arith.constant 0 : index
    %86 = vector.load %arg5[%c0_36, %c0_37] : memref<64x128xf32, #tpu.memory_space<vmem>>, vector<1x128xf32>
    tpu.vector_store %arg5[%c0_36, %c0_37], %85 {strides = array<i32>} : memref<64x128xf32, #tpu.memory_space<vmem>>, vector<1x128xf32>,
    %cst_38 = arith.constant 1.000000e+00 : f32
    %87 = vector.broadcast %cst_38 : f32 to vector<8x128xf32>
    %88 = arith.cmpf oeq, %77, %87 : vector<8x128xf32>
    %89 = arith.extui %88 : vector<8x128xi1> to vector<8x128xi32>
    %90 = arith.sitofp %89 : vector<8x128xi32> to vector<8x128xf32>
    %c1_39 = arith.constant 1 : index
    %c0_40 = arith.constant 0 : index
    %91 = vector.load %arg5[%c1_39, %c0_40] : memref<64x128xf32, #tpu.memory_space<vmem>>, vector<1x128xf32>
    %cst_41 = arith.constant dense<0.000000e+00> : vector<128xf32>
    %92 = vector.multi_reduction <add>, %90, %cst_41 [0] : vector<8x128xf32> to vector<128xf32>
    %93 = vector.shape_cast %92 : vector<128xf32> to vector<1x128xf32>
    %94 = arith.addf %91, %93 : vector<1x128xf32>
    %c1_42 = arith.constant 1 : index
    %c0_43 = arith.constant 0 : index
    %95 = vector.load %arg5[%c1_42, %c0_43] : memref<64x128xf32, #tpu.memory_space<vmem>>, vector<1x128xf32>
    tpu.vector_store %arg5[%c1_42, %c0_43], %94 {strides = array<i32>} : memref<64x128xf32, #tpu.memory_space<vmem>>, vector<1x128xf32>,
    %cst_44 = arith.constant 2.000000e+00 : f32
    %96 = vector.broadcast %cst_44 : f32 to vector<8x128xf32>
    %97 = arith.cmpf oeq, %77, %96 : vector<8x128xf32>
    %98 = arith.extui %97 : vector<8x128xi1> to vector<8x128xi32>
    %99 = arith.sitofp %98 : vector<8x128xi32> to vector<8x128xf32>
    %c2_45 = arith.constant 2 : index
    %c0_46 = arith.constant 0 : index
    %100 = vector.load %arg5[%c2_45, %c0_46] : memref<64x128xf32, #tpu.memory_space<vmem>>, vector<1x128xf32>
    %cst_47 = arith.constant dense<0.000000e+00> : vector<128xf32>
    %101 = vector.multi_reduction <add>, %99, %cst_47 [0] : vector<8x128xf32> to vector<128xf32>
    %102 = vector.shape_cast %101 : vector<128xf32> to vector<1x128xf32>
    %103 = arith.addf %100, %102 : vector<1x128xf32>
    %c2_48 = arith.constant 2 : index
    %c0_49 = arith.constant 0 : index
    %104 = vector.load %arg5[%c2_48, %c0_49] : memref<64x128xf32, #tpu.memory_space<vmem>>, vector<1x128xf32>
    tpu.vector_store %arg5[%c2_48, %c0_49], %103 {strides = array<i32>} : memref<64x128xf32, #tpu.memory_space<vmem>>, vector<1x128xf32>,
    %cst_50 = arith.constant 3.000000e+00 : f32
    %105 = vector.broadcast %cst_50 : f32 to vector<8x128xf32>
    %106 = arith.cmpf oeq, %77, %105 : vector<8x128xf32>
    %107 = arith.extui %106 : vector<8x128xi1> to vector<8x128xi32>
    %108 = arith.sitofp %107 : vector<8x128xi32> to vector<8x128xf32>
    %c3 = arith.constant 3 : index
    %c0_51 = arith.constant 0 : index
    %109 = vector.load %arg5[%c3, %c0_51] : memref<64x128xf32, #tpu.memory_space<vmem>>, vector<1x128xf32>
    %cst_52 = arith.constant dense<0.000000e+00> : vector<128xf32>
    %110 = vector.multi_reduction <add>, %108, %cst_52 [0] : vector<8x128xf32> to vector<128xf32>
    %111 = vector.shape_cast %110 : vector<128xf32> to vector<1x128xf32>
    %112 = arith.addf %109, %111 : vector<1x128xf32>
    %c3_53 = arith.constant 3 : index
    %c0_54 = arith.constant 0 : index
    %113 = vector.load %arg5[%c3_53, %c0_54] : memref<64x128xf32, #tpu.memory_space<vmem>>, vector<1x128xf32>
    tpu.vector_store %arg5[%c3_53, %c0_54], %112 {strides = array<i32>} : memref<64x128xf32, #tpu.memory_space<vmem>>, vector<1x128xf32>,
    %cst_55 = arith.constant 4.000000e+00 : f32
    %114 = vector.broadcast %cst_55 : f32 to vector<8x128xf32>
    %115 = arith.cmpf oeq, %77, %114 : vector<8x128xf32>
    %116 = arith.extui %115 : vector<8x128xi1> to vector<8x128xi32>
    %117 = arith.sitofp %116 : vector<8x128xi32> to vector<8x128xf32>
    %c4 = arith.constant 4 : index
    %c0_56 = arith.constant 0 : index
    %118 = vector.load %arg5[%c4, %c0_56] : memref<64x128xf32, #tpu.memory_space<vmem>>, vector<1x128xf32>
    %cst_57 = arith.constant dense<0.000000e+00> : vector<128xf32>
    %119 = vector.multi_reduction <add>, %117, %cst_57 [0] : vector<8x128xf32> to vector<128xf32>
    %120 = vector.shape_cast %119 : vector<128xf32> to vector<1x128xf32>
    %121 = arith.addf %118, %120 : vector<1x128xf32>
    %c4_58 = arith.constant 4 : index
    %c0_59 = arith.constant 0 : index
    %122 = vector.load %arg5[%c4_58, %c0_59] : memref<64x128xf32, #tpu.memory_space<vmem>>, vector<1x128xf32>
    tpu.vector_store %arg5[%c4_58, %c0_59], %121 {strides = array<i32>} : memref<64x128xf32, #tpu.memory_space<vmem>>, vector<1x128xf32>,
    %cst_60 = arith.constant 5.000000e+00 : f32
    %123 = vector.broadcast %cst_60 : f32 to vector<8x128xf32>
    %124 = arith.cmpf oeq, %77, %123 : vector<8x128xf32>
    %125 = arith.extui %124 : vector<8x128xi1> to vector<8x128xi32>
    %126 = arith.sitofp %125 : vector<8x128xi32> to vector<8x128xf32>
    %c5 = arith.constant 5 : index
    %c0_61 = arith.constant 0 : index
    %127 = vector.load %arg5[%c5, %c0_61] : memref<64x128xf32, #tpu.memory_space<vmem>>, vector<1x128xf32>
    %cst_62 = arith.constant dense<0.000000e+00> : vector<128xf32>
    %128 = vector.multi_reduction <add>, %126, %cst_62 [0] : vector<8x128xf32> to vector<128xf32>
    %129 = vector.shape_cast %128 : vector<128xf32> to vector<1x128xf32>
    %130 = arith.addf %127, %129 : vector<1x128xf32>
    %c5_63 = arith.constant 5 : index
    %c0_64 = arith.constant 0 : index
    %131 = vector.load %arg5[%c5_63, %c0_64] : memref<64x128xf32, #tpu.memory_space<vmem>>, vector<1x128xf32>
    tpu.vector_store %arg5[%c5_63, %c0_64], %130 {strides = array<i32>} : memref<64x128xf32, #tpu.memory_space<vmem>>, vector<1x128xf32>,
    %cst_65 = arith.constant 6.000000e+00 : f32
    %132 = vector.broadcast %cst_65 : f32 to vector<8x128xf32>
    %133 = arith.cmpf oeq, %77, %132 : vector<8x128xf32>
    %134 = arith.extui %133 : vector<8x128xi1> to vector<8x128xi32>
    %135 = arith.sitofp %134 : vector<8x128xi32> to vector<8x128xf32>
    %c6 = arith.constant 6 : index
    %c0_66 = arith.constant 0 : index
    %136 = vector.load %arg5[%c6, %c0_66] : memref<64x128xf32, #tpu.memory_space<vmem>>, vector<1x128xf32>
    %cst_67 = arith.constant dense<0.000000e+00> : vector<128xf32>
    %137 = vector.multi_reduction <add>, %135, %cst_67 [0] : vector<8x128xf32> to vector<128xf32>
    %138 = vector.shape_cast %137 : vector<128xf32> to vector<1x128xf32>
    %139 = arith.addf %136, %138 : vector<1x128xf32>
    %c6_68 = arith.constant 6 : index
    %c0_69 = arith.constant 0 : index
    %140 = vector.load %arg5[%c6_68, %c0_69] : memref<64x128xf32, #tpu.memory_space<vmem>>, vector<1x128xf32>
    tpu.vector_store %arg5[%c6_68, %c0_69], %139 {strides = array<i32>} : memref<64x128xf32, #tpu.memory_space<vmem>>, vector<1x128xf32>,
    %cst_70 = arith.constant 7.000000e+00 : f32
    %141 = vector.broadcast %cst_70 : f32 to vector<8x128xf32>
    %142 = arith.cmpf oeq, %77, %141 : vector<8x128xf32>
    %143 = arith.extui %142 : vector<8x128xi1> to vector<8x128xi32>
    %144 = arith.sitofp %143 : vector<8x128xi32> to vector<8x128xf32>
    %c7 = arith.constant 7 : index
    %c0_71 = arith.constant 0 : index
    %145 = vector.load %arg5[%c7, %c0_71] : memref<64x128xf32, #tpu.memory_space<vmem>>, vector<1x128xf32>
    %cst_72 = arith.constant dense<0.000000e+00> : vector<128xf32>
    %146 = vector.multi_reduction <add>, %144, %cst_72 [0] : vector<8x128xf32> to vector<128xf32>
    %147 = vector.shape_cast %146 : vector<128xf32> to vector<1x128xf32>
    %148 = arith.addf %145, %147 : vector<1x128xf32>
    %c7_73 = arith.constant 7 : index
    %c0_74 = arith.constant 0 : index
    %149 = vector.load %arg5[%c7_73, %c0_74] : memref<64x128xf32, #tpu.memory_space<vmem>>, vector<1x128xf32>
    tpu.vector_store %arg5[%c7_73, %c0_74], %148 {strides = array<i32>} : memref<64x128xf32, #tpu.memory_space<vmem>>, vector<1x128xf32>,
    %cst_75 = arith.constant 8.000000e+00 : f32
    %150 = vector.broadcast %cst_75 : f32 to vector<8x128xf32>
    %151 = arith.cmpf oeq, %77, %150 : vector<8x128xf32>
    %152 = arith.extui %151 : vector<8x128xi1> to vector<8x128xi32>
    %153 = arith.sitofp %152 : vector<8x128xi32> to vector<8x128xf32>
    %c8 = arith.constant 8 : index
    %c0_76 = arith.constant 0 : index
    %154 = vector.load %arg5[%c8, %c0_76] : memref<64x128xf32, #tpu.memory_space<vmem>>, vector<1x128xf32>
    %cst_77 = arith.constant dense<0.000000e+00> : vector<128xf32>
    %155 = vector.multi_reduction <add>, %153, %cst_77 [0] : vector<8x128xf32> to vector<128xf32>
    %156 = vector.shape_cast %155 : vector<128xf32> to vector<1x128xf32>
    %157 = arith.addf %154, %156 : vector<1x128xf32>
    %c8_78 = arith.constant 8 : index
    %c0_79 = arith.constant 0 : index
    %158 = vector.load %arg5[%c8_78, %c0_79] : memref<64x128xf32, #tpu.memory_space<vmem>>, vector<1x128xf32>
    tpu.vector_store %arg5[%c8_78, %c0_79], %157 {strides = array<i32>} : memref<64x128xf32, #tpu.memory_space<vmem>>, vector<1x128xf32>,
    %cst_80 = arith.constant 9.000000e+00 : f32
    %159 = vector.broadcast %cst_80 : f32 to vector<8x128xf32>
    %160 = arith.cmpf oeq, %77, %159 : vector<8x128xf32>
    %161 = arith.extui %160 : vector<8x128xi1> to vector<8x128xi32>
    %162 = arith.sitofp %161 : vector<8x128xi32> to vector<8x128xf32>
    %c9 = arith.constant 9 : index
    %c0_81 = arith.constant 0 : index
    %163 = vector.load %arg5[%c9, %c0_81] : memref<64x128xf32, #tpu.memory_space<vmem>>, vector<1x128xf32>
    %cst_82 = arith.constant dense<0.000000e+00> : vector<128xf32>
    %164 = vector.multi_reduction <add>, %162, %cst_82 [0] : vector<8x128xf32> to vector<128xf32>
    %165 = vector.shape_cast %164 : vector<128xf32> to vector<1x128xf32>
    %166 = arith.addf %163, %165 : vector<1x128xf32>
    %c9_83 = arith.constant 9 : index
    %c0_84 = arith.constant 0 : index
    %167 = vector.load %arg5[%c9_83, %c0_84] : memref<64x128xf32, #tpu.memory_space<vmem>>, vector<1x128xf32>
    tpu.vector_store %arg5[%c9_83, %c0_84], %166 {strides = array<i32>} : memref<64x128xf32, #tpu.memory_space<vmem>>, vector<1x128xf32>,
    %cst_85 = arith.constant 1.000000e+01 : f32
    %168 = vector.broadcast %cst_85 : f32 to vector<8x128xf32>
    %169 = arith.mulf %70, %168 : vector<8x128xf32>
    %170 = math.floor %169 : vector<8x128xf32>
    %cst_86 = arith.constant 0.000000e+00 : f32
    %cst_87 = arith.constant 9.000000e+00 : f32
    %171 = vector.broadcast %cst_86 : f32 to vector<8x128xf32>
    %172 = arith.maximumf %171, %170 : vector<8x128xf32>
    %173 = vector.broadcast %cst_87 : f32 to vector<8x128xf32>
    %174 = arith.minimumf %173, %172 : vector<8x128xf32>
    %cst_88 = arith.constant 0.000000e+00 : f32
    %175 = vector.broadcast %cst_88 : f32 to vector<8x128xf32>
    %176 = arith.cmpf oeq, %174, %175 : vector<8x128xf32>
    %177 = arith.extui %176 : vector<8x128xi1> to vector<8x128xi32>
    %178 = arith.sitofp %177 : vector<8x128xi32> to vector<8x128xf32>
    %c10 = arith.constant 10 : index
    %c0_89 = arith.constant 0 : index
    %179 = vector.load %arg5[%c10, %c0_89] : memref<64x128xf32, #tpu.memory_space<vmem>>, vector<1x128xf32>
    %cst_90 = arith.constant dense<0.000000e+00> : vector<128xf32>
    %180 = vector.multi_reduction <add>, %178, %cst_90 [0] : vector<8x128xf32> to vector<128xf32>
    %181 = vector.shape_cast %180 : vector<128xf32> to vector<1x128xf32>
    %182 = arith.addf %179, %181 : vector<1x128xf32>
    %c10_91 = arith.constant 10 : index
    %c0_92 = arith.constant 0 : index
    %183 = vector.load %arg5[%c10_91, %c0_92] : memref<64x128xf32, #tpu.memory_space<vmem>>, vector<1x128xf32>
    tpu.vector_store %arg5[%c10_91, %c0_92], %182 {strides = array<i32>} : memref<64x128xf32, #tpu.memory_space<vmem>>, vector<1x128xf32>,
    %cst_93 = arith.constant 1.000000e+00 : f32
    %184 = vector.broadcast %cst_93 : f32 to vector<8x128xf32>
    %185 = arith.cmpf oeq, %174, %184 : vector<8x128xf32>
    %186 = arith.extui %185 : vector<8x128xi1> to vector<8x128xi32>
    %187 = arith.sitofp %186 : vector<8x128xi32> to vector<8x128xf32>
    %c11 = arith.constant 11 : index
    %c0_94 = arith.constant 0 : index
    %188 = vector.load %arg5[%c11, %c0_94] : memref<64x128xf32, #tpu.memory_space<vmem>>, vector<1x128xf32>
    %cst_95 = arith.constant dense<0.000000e+00> : vector<128xf32>
    %189 = vector.multi_reduction <add>, %187, %cst_95 [0] : vector<8x128xf32> to vector<128xf32>
    %190 = vector.shape_cast %189 : vector<128xf32> to vector<1x128xf32>
    %191 = arith.addf %188, %190 : vector<1x128xf32>
    %c11_96 = arith.constant 11 : index
    %c0_97 = arith.constant 0 : index
    %192 = vector.load %arg5[%c11_96, %c0_97] : memref<64x128xf32, #tpu.memory_space<vmem>>, vector<1x128xf32>
    tpu.vector_store %arg5[%c11_96, %c0_97], %191 {strides = array<i32>} : memref<64x128xf32, #tpu.memory_space<vmem>>, vector<1x128xf32>,
    %cst_98 = arith.constant 2.000000e+00 : f32
    %193 = vector.broadcast %cst_98 : f32 to vector<8x128xf32>
    %194 = arith.cmpf oeq, %174, %193 : vector<8x128xf32>
    %195 = arith.extui %194 : vector<8x128xi1> to vector<8x128xi32>
    %196 = arith.sitofp %195 : vector<8x128xi32> to vector<8x128xf32>
    %c12 = arith.constant 12 : index
    %c0_99 = arith.constant 0 : index
    %197 = vector.load %arg5[%c12, %c0_99] : memref<64x128xf32, #tpu.memory_space<vmem>>, vector<1x128xf32>
    %cst_100 = arith.constant dense<0.000000e+00> : vector<128xf32>
    %198 = vector.multi_reduction <add>, %196, %cst_100 [0] : vector<8x128xf32> to vector<128xf32>
    %199 = vector.shape_cast %198 : vector<128xf32> to vector<1x128xf32>
    %200 = arith.addf %197, %199 : vector<1x128xf32>
    %c12_101 = arith.constant 12 : index
    %c0_102 = arith.constant 0 : index
    %201 = vector.load %arg5[%c12_101, %c0_102] : memref<64x128xf32, #tpu.memory_space<vmem>>, vector<1x128xf32>
    tpu.vector_store %arg5[%c12_101, %c0_102], %200 {strides = array<i32>} : memref<64x128xf32, #tpu.memory_space<vmem>>, vector<1x128xf32>,
    %cst_103 = arith.constant 3.000000e+00 : f32
    %202 = vector.broadcast %cst_103 : f32 to vector<8x128xf32>
    %203 = arith.cmpf oeq, %174, %202 : vector<8x128xf32>
    %204 = arith.extui %203 : vector<8x128xi1> to vector<8x128xi32>
    %205 = arith.sitofp %204 : vector<8x128xi32> to vector<8x128xf32>
    %c13 = arith.constant 13 : index
    %c0_104 = arith.constant 0 : index
    %206 = vector.load %arg5[%c13, %c0_104] : memref<64x128xf32, #tpu.memory_space<vmem>>, vector<1x128xf32>
    %cst_105 = arith.constant dense<0.000000e+00> : vector<128xf32>
    %207 = vector.multi_reduction <add>, %205, %cst_105 [0] : vector<8x128xf32> to vector<128xf32>
    %208 = vector.shape_cast %207 : vector<128xf32> to vector<1x128xf32>
    %209 = arith.addf %206, %208 : vector<1x128xf32>
    %c13_106 = arith.constant 13 : index
    %c0_107 = arith.constant 0 : index
    %210 = vector.load %arg5[%c13_106, %c0_107] : memref<64x128xf32, #tpu.memory_space<vmem>>, vector<1x128xf32>
    tpu.vector_store %arg5[%c13_106, %c0_107], %209 {strides = array<i32>} : memref<64x128xf32, #tpu.memory_space<vmem>>, vector<1x128xf32>,
    %cst_108 = arith.constant 4.000000e+00 : f32
    %211 = vector.broadcast %cst_108 : f32 to vector<8x128xf32>
    %212 = arith.cmpf oeq, %174, %211 : vector<8x128xf32>
    %213 = arith.extui %212 : vector<8x128xi1> to vector<8x128xi32>
    %214 = arith.sitofp %213 : vector<8x128xi32> to vector<8x128xf32>
    %c14 = arith.constant 14 : index
    %c0_109 = arith.constant 0 : index
    %215 = vector.load %arg5[%c14, %c0_109] : memref<64x128xf32, #tpu.memory_space<vmem>>, vector<1x128xf32>
    %cst_110 = arith.constant dense<0.000000e+00> : vector<128xf32>
    %216 = vector.multi_reduction <add>, %214, %cst_110 [0] : vector<8x128xf32> to vector<128xf32>
    %217 = vector.shape_cast %216 : vector<128xf32> to vector<1x128xf32>
    %218 = arith.addf %215, %217 : vector<1x128xf32>
    %c14_111 = arith.constant 14 : index
    %c0_112 = arith.constant 0 : index
    %219 = vector.load %arg5[%c14_111, %c0_112] : memref<64x128xf32, #tpu.memory_space<vmem>>, vector<1x128xf32>
    tpu.vector_store %arg5[%c14_111, %c0_112], %218 {strides = array<i32>} : memref<64x128xf32, #tpu.memory_space<vmem>>, vector<1x128xf32>,
    %cst_113 = arith.constant 5.000000e+00 : f32
    %220 = vector.broadcast %cst_113 : f32 to vector<8x128xf32>
    %221 = arith.cmpf oeq, %174, %220 : vector<8x128xf32>
    %222 = arith.extui %221 : vector<8x128xi1> to vector<8x128xi32>
    %223 = arith.sitofp %222 : vector<8x128xi32> to vector<8x128xf32>
    %c15 = arith.constant 15 : index
    %c0_114 = arith.constant 0 : index
    %224 = vector.load %arg5[%c15, %c0_114] : memref<64x128xf32, #tpu.memory_space<vmem>>, vector<1x128xf32>
    %cst_115 = arith.constant dense<0.000000e+00> : vector<128xf32>
    %225 = vector.multi_reduction <add>, %223, %cst_115 [0] : vector<8x128xf32> to vector<128xf32>
    %226 = vector.shape_cast %225 : vector<128xf32> to vector<1x128xf32>
    %227 = arith.addf %224, %226 : vector<1x128xf32>
    %c15_116 = arith.constant 15 : index
    %c0_117 = arith.constant 0 : index
    %228 = vector.load %arg5[%c15_116, %c0_117] : memref<64x128xf32, #tpu.memory_space<vmem>>, vector<1x128xf32>
    tpu.vector_store %arg5[%c15_116, %c0_117], %227 {strides = array<i32>} : memref<64x128xf32, #tpu.memory_space<vmem>>, vector<1x128xf32>,
    %cst_118 = arith.constant 6.000000e+00 : f32
    %229 = vector.broadcast %cst_118 : f32 to vector<8x128xf32>
    %230 = arith.cmpf oeq, %174, %229 : vector<8x128xf32>
    %231 = arith.extui %230 : vector<8x128xi1> to vector<8x128xi32>
    %232 = arith.sitofp %231 : vector<8x128xi32> to vector<8x128xf32>
    %c16 = arith.constant 16 : index
    %c0_119 = arith.constant 0 : index
    %233 = vector.load %arg5[%c16, %c0_119] : memref<64x128xf32, #tpu.memory_space<vmem>>, vector<1x128xf32>
    %cst_120 = arith.constant dense<0.000000e+00> : vector<128xf32>
    %234 = vector.multi_reduction <add>, %232, %cst_120 [0] : vector<8x128xf32> to vector<128xf32>
    %235 = vector.shape_cast %234 : vector<128xf32> to vector<1x128xf32>
    %236 = arith.addf %233, %235 : vector<1x128xf32>
    %c16_121 = arith.constant 16 : index
    %c0_122 = arith.constant 0 : index
    %237 = vector.load %arg5[%c16_121, %c0_122] : memref<64x128xf32, #tpu.memory_space<vmem>>, vector<1x128xf32>
    tpu.vector_store %arg5[%c16_121, %c0_122], %236 {strides = array<i32>} : memref<64x128xf32, #tpu.memory_space<vmem>>, vector<1x128xf32>,
    %cst_123 = arith.constant 7.000000e+00 : f32
    %238 = vector.broadcast %cst_123 : f32 to vector<8x128xf32>
    %239 = arith.cmpf oeq, %174, %238 : vector<8x128xf32>
    %240 = arith.extui %239 : vector<8x128xi1> to vector<8x128xi32>
    %241 = arith.sitofp %240 : vector<8x128xi32> to vector<8x128xf32>
    %c17 = arith.constant 17 : index
    %c0_124 = arith.constant 0 : index
    %242 = vector.load %arg5[%c17, %c0_124] : memref<64x128xf32, #tpu.memory_space<vmem>>, vector<1x128xf32>
    %cst_125 = arith.constant dense<0.000000e+00> : vector<128xf32>
    %243 = vector.multi_reduction <add>, %241, %cst_125 [0] : vector<8x128xf32> to vector<128xf32>
    %244 = vector.shape_cast %243 : vector<128xf32> to vector<1x128xf32>
    %245 = arith.addf %242, %244 : vector<1x128xf32>
    %c17_126 = arith.constant 17 : index
    %c0_127 = arith.constant 0 : index
    %246 = vector.load %arg5[%c17_126, %c0_127] : memref<64x128xf32, #tpu.memory_space<vmem>>, vector<1x128xf32>
    tpu.vector_store %arg5[%c17_126, %c0_127], %245 {strides = array<i32>} : memref<64x128xf32, #tpu.memory_space<vmem>>, vector<1x128xf32>,
    %cst_128 = arith.constant 8.000000e+00 : f32
    %247 = vector.broadcast %cst_128 : f32 to vector<8x128xf32>
    %248 = arith.cmpf oeq, %174, %247 : vector<8x128xf32>
    %249 = arith.extui %248 : vector<8x128xi1> to vector<8x128xi32>
    %250 = arith.sitofp %249 : vector<8x128xi32> to vector<8x128xf32>
    %c18 = arith.constant 18 : index
    %c0_129 = arith.constant 0 : index
    %251 = vector.load %arg5[%c18, %c0_129] : memref<64x128xf32, #tpu.memory_space<vmem>>, vector<1x128xf32>
    %cst_130 = arith.constant dense<0.000000e+00> : vector<128xf32>
    %252 = vector.multi_reduction <add>, %250, %cst_130 [0] : vector<8x128xf32> to vector<128xf32>
    %253 = vector.shape_cast %252 : vector<128xf32> to vector<1x128xf32>
    %254 = arith.addf %251, %253 : vector<1x128xf32>
    %c18_131 = arith.constant 18 : index
    %c0_132 = arith.constant 0 : index
    %255 = vector.load %arg5[%c18_131, %c0_132] : memref<64x128xf32, #tpu.memory_space<vmem>>, vector<1x128xf32>
    tpu.vector_store %arg5[%c18_131, %c0_132], %254 {strides = array<i32>} : memref<64x128xf32, #tpu.memory_space<vmem>>, vector<1x128xf32>,
    %cst_133 = arith.constant 9.000000e+00 : f32
    %256 = vector.broadcast %cst_133 : f32 to vector<8x128xf32>
    %257 = arith.cmpf oeq, %174, %256 : vector<8x128xf32>
    %258 = arith.extui %257 : vector<8x128xi1> to vector<8x128xi32>
    %259 = arith.sitofp %258 : vector<8x128xi32> to vector<8x128xf32>
    %c19 = arith.constant 19 : index
    %c0_134 = arith.constant 0 : index
    %260 = vector.load %arg5[%c19, %c0_134] : memref<64x128xf32, #tpu.memory_space<vmem>>, vector<1x128xf32>
    %cst_135 = arith.constant dense<0.000000e+00> : vector<128xf32>
    %261 = vector.multi_reduction <add>, %259, %cst_135 [0] : vector<8x128xf32> to vector<128xf32>
    %262 = vector.shape_cast %261 : vector<128xf32> to vector<1x128xf32>
    %263 = arith.addf %260, %262 : vector<1x128xf32>
    %c19_136 = arith.constant 19 : index
    %c0_137 = arith.constant 0 : index
    %264 = vector.load %arg5[%c19_136, %c0_137] : memref<64x128xf32, #tpu.memory_space<vmem>>, vector<1x128xf32>
    tpu.vector_store %arg5[%c19_136, %c0_137], %263 {strides = array<i32>} : memref<64x128xf32, #tpu.memory_space<vmem>>, vector<1x128xf32>,
    %cst_138 = arith.constant 1.000000e+01 : f32
    %265 = vector.broadcast %cst_138 : f32 to vector<8x128xf32>
    %266 = arith.mulf %27, %265 : vector<8x128xf32>
    %267 = math.floor %266 : vector<8x128xf32>
    %cst_139 = arith.constant 0.000000e+00 : f32
    %cst_140 = arith.constant 9.000000e+00 : f32
    %268 = vector.broadcast %cst_139 : f32 to vector<8x128xf32>
    %269 = arith.maximumf %268, %267 : vector<8x128xf32>
    %270 = vector.broadcast %cst_140 : f32 to vector<8x128xf32>
    %271 = arith.minimumf %270, %269 : vector<8x128xf32>
    %cst_141 = arith.constant 0.000000e+00 : f32
    %272 = vector.broadcast %cst_141 : f32 to vector<8x128xf32>
    %273 = arith.cmpf oeq, %271, %272 : vector<8x128xf32>
    %274 = arith.extui %273 : vector<8x128xi1> to vector<8x128xi32>
    %275 = arith.sitofp %274 : vector<8x128xi32> to vector<8x128xf32>
    %c20 = arith.constant 20 : index
    %c0_142 = arith.constant 0 : index
    %276 = vector.load %arg5[%c20, %c0_142] : memref<64x128xf32, #tpu.memory_space<vmem>>, vector<1x128xf32>
    %cst_143 = arith.constant dense<0.000000e+00> : vector<128xf32>
    %277 = vector.multi_reduction <add>, %275, %cst_143 [0] : vector<8x128xf32> to vector<128xf32>
    %278 = vector.shape_cast %277 : vector<128xf32> to vector<1x128xf32>
    %279 = arith.addf %276, %278 : vector<1x128xf32>
    %c20_144 = arith.constant 20 : index
    %c0_145 = arith.constant 0 : index
    %280 = vector.load %arg5[%c20_144, %c0_145] : memref<64x128xf32, #tpu.memory_space<vmem>>, vector<1x128xf32>
    tpu.vector_store %arg5[%c20_144, %c0_145], %279 {strides = array<i32>} : memref<64x128xf32, #tpu.memory_space<vmem>>, vector<1x128xf32>,
    %cst_146 = arith.constant 1.000000e+00 : f32
    %281 = vector.broadcast %cst_146 : f32 to vector<8x128xf32>
    %282 = arith.cmpf oeq, %271, %281 : vector<8x128xf32>
    %283 = arith.extui %282 : vector<8x128xi1> to vector<8x128xi32>
    %284 = arith.sitofp %283 : vector<8x128xi32> to vector<8x128xf32>
    %c21 = arith.constant 21 : index
    %c0_147 = arith.constant 0 : index
    %285 = vector.load %arg5[%c21, %c0_147] : memref<64x128xf32, #tpu.memory_space<vmem>>, vector<1x128xf32>
    %cst_148 = arith.constant dense<0.000000e+00> : vector<128xf32>
    %286 = vector.multi_reduction <add>, %284, %cst_148 [0] : vector<8x128xf32> to vector<128xf32>
    %287 = vector.shape_cast %286 : vector<128xf32> to vector<1x128xf32>
    %288 = arith.addf %285, %287 : vector<1x128xf32>
    %c21_149 = arith.constant 21 : index
    %c0_150 = arith.constant 0 : index
    %289 = vector.load %arg5[%c21_149, %c0_150] : memref<64x128xf32, #tpu.memory_space<vmem>>, vector<1x128xf32>
    tpu.vector_store %arg5[%c21_149, %c0_150], %288 {strides = array<i32>} : memref<64x128xf32, #tpu.memory_space<vmem>>, vector<1x128xf32>,
    %cst_151 = arith.constant 2.000000e+00 : f32
    %290 = vector.broadcast %cst_151 : f32 to vector<8x128xf32>
    %291 = arith.cmpf oeq, %271, %290 : vector<8x128xf32>
    %292 = arith.extui %291 : vector<8x128xi1> to vector<8x128xi32>
    %293 = arith.sitofp %292 : vector<8x128xi32> to vector<8x128xf32>
    %c22 = arith.constant 22 : index
    %c0_152 = arith.constant 0 : index
    %294 = vector.load %arg5[%c22, %c0_152] : memref<64x128xf32, #tpu.memory_space<vmem>>, vector<1x128xf32>
    %cst_153 = arith.constant dense<0.000000e+00> : vector<128xf32>
    %295 = vector.multi_reduction <add>, %293, %cst_153 [0] : vector<8x128xf32> to vector<128xf32>
    %296 = vector.shape_cast %295 : vector<128xf32> to vector<1x128xf32>
    %297 = arith.addf %294, %296 : vector<1x128xf32>
    %c22_154 = arith.constant 22 : index
    %c0_155 = arith.constant 0 : index
    %298 = vector.load %arg5[%c22_154, %c0_155] : memref<64x128xf32, #tpu.memory_space<vmem>>, vector<1x128xf32>
    tpu.vector_store %arg5[%c22_154, %c0_155], %297 {strides = array<i32>} : memref<64x128xf32, #tpu.memory_space<vmem>>, vector<1x128xf32>,
    %cst_156 = arith.constant 3.000000e+00 : f32
    %299 = vector.broadcast %cst_156 : f32 to vector<8x128xf32>
    %300 = arith.cmpf oeq, %271, %299 : vector<8x128xf32>
    %301 = arith.extui %300 : vector<8x128xi1> to vector<8x128xi32>
    %302 = arith.sitofp %301 : vector<8x128xi32> to vector<8x128xf32>
    %c23 = arith.constant 23 : index
    %c0_157 = arith.constant 0 : index
    %303 = vector.load %arg5[%c23, %c0_157] : memref<64x128xf32, #tpu.memory_space<vmem>>, vector<1x128xf32>
    %cst_158 = arith.constant dense<0.000000e+00> : vector<128xf32>
    %304 = vector.multi_reduction <add>, %302, %cst_158 [0] : vector<8x128xf32> to vector<128xf32>
    %305 = vector.shape_cast %304 : vector<128xf32> to vector<1x128xf32>
    %306 = arith.addf %303, %305 : vector<1x128xf32>
    %c23_159 = arith.constant 23 : index
    %c0_160 = arith.constant 0 : index
    %307 = vector.load %arg5[%c23_159, %c0_160] : memref<64x128xf32, #tpu.memory_space<vmem>>, vector<1x128xf32>
    tpu.vector_store %arg5[%c23_159, %c0_160], %306 {strides = array<i32>} : memref<64x128xf32, #tpu.memory_space<vmem>>, vector<1x128xf32>,
    %cst_161 = arith.constant 4.000000e+00 : f32
    %308 = vector.broadcast %cst_161 : f32 to vector<8x128xf32>
    %309 = arith.cmpf oeq, %271, %308 : vector<8x128xf32>
    %310 = arith.extui %309 : vector<8x128xi1> to vector<8x128xi32>
    %311 = arith.sitofp %310 : vector<8x128xi32> to vector<8x128xf32>
    %c24 = arith.constant 24 : index
    %c0_162 = arith.constant 0 : index
    %312 = vector.load %arg5[%c24, %c0_162] : memref<64x128xf32, #tpu.memory_space<vmem>>, vector<1x128xf32>
    %cst_163 = arith.constant dense<0.000000e+00> : vector<128xf32>
    %313 = vector.multi_reduction <add>, %311, %cst_163 [0] : vector<8x128xf32> to vector<128xf32>
    %314 = vector.shape_cast %313 : vector<128xf32> to vector<1x128xf32>
    %315 = arith.addf %312, %314 : vector<1x128xf32>
    %c24_164 = arith.constant 24 : index
    %c0_165 = arith.constant 0 : index
    %316 = vector.load %arg5[%c24_164, %c0_165] : memref<64x128xf32, #tpu.memory_space<vmem>>, vector<1x128xf32>
    tpu.vector_store %arg5[%c24_164, %c0_165], %315 {strides = array<i32>} : memref<64x128xf32, #tpu.memory_space<vmem>>, vector<1x128xf32>,
    %cst_166 = arith.constant 5.000000e+00 : f32
    %317 = vector.broadcast %cst_166 : f32 to vector<8x128xf32>
    %318 = arith.cmpf oeq, %271, %317 : vector<8x128xf32>
    %319 = arith.extui %318 : vector<8x128xi1> to vector<8x128xi32>
    %320 = arith.sitofp %319 : vector<8x128xi32> to vector<8x128xf32>
    %c25 = arith.constant 25 : index
    %c0_167 = arith.constant 0 : index
    %321 = vector.load %arg5[%c25, %c0_167] : memref<64x128xf32, #tpu.memory_space<vmem>>, vector<1x128xf32>
    %cst_168 = arith.constant dense<0.000000e+00> : vector<128xf32>
    %322 = vector.multi_reduction <add>, %320, %cst_168 [0] : vector<8x128xf32> to vector<128xf32>
    %323 = vector.shape_cast %322 : vector<128xf32> to vector<1x128xf32>
    %324 = arith.addf %321, %323 : vector<1x128xf32>
    %c25_169 = arith.constant 25 : index
    %c0_170 = arith.constant 0 : index
    %325 = vector.load %arg5[%c25_169, %c0_170] : memref<64x128xf32, #tpu.memory_space<vmem>>, vector<1x128xf32>
    tpu.vector_store %arg5[%c25_169, %c0_170], %324 {strides = array<i32>} : memref<64x128xf32, #tpu.memory_space<vmem>>, vector<1x128xf32>,
    %cst_171 = arith.constant 6.000000e+00 : f32
    %326 = vector.broadcast %cst_171 : f32 to vector<8x128xf32>
    %327 = arith.cmpf oeq, %271, %326 : vector<8x128xf32>
    %328 = arith.extui %327 : vector<8x128xi1> to vector<8x128xi32>
    %329 = arith.sitofp %328 : vector<8x128xi32> to vector<8x128xf32>
    %c26 = arith.constant 26 : index
    %c0_172 = arith.constant 0 : index
    %330 = vector.load %arg5[%c26, %c0_172] : memref<64x128xf32, #tpu.memory_space<vmem>>, vector<1x128xf32>
    %cst_173 = arith.constant dense<0.000000e+00> : vector<128xf32>
    %331 = vector.multi_reduction <add>, %329, %cst_173 [0] : vector<8x128xf32> to vector<128xf32>
    %332 = vector.shape_cast %331 : vector<128xf32> to vector<1x128xf32>
    %333 = arith.addf %330, %332 : vector<1x128xf32>
    %c26_174 = arith.constant 26 : index
    %c0_175 = arith.constant 0 : index
    %334 = vector.load %arg5[%c26_174, %c0_175] : memref<64x128xf32, #tpu.memory_space<vmem>>, vector<1x128xf32>
    tpu.vector_store %arg5[%c26_174, %c0_175], %333 {strides = array<i32>} : memref<64x128xf32, #tpu.memory_space<vmem>>, vector<1x128xf32>,
    %cst_176 = arith.constant 7.000000e+00 : f32
    %335 = vector.broadcast %cst_176 : f32 to vector<8x128xf32>
    %336 = arith.cmpf oeq, %271, %335 : vector<8x128xf32>
    %337 = arith.extui %336 : vector<8x128xi1> to vector<8x128xi32>
    %338 = arith.sitofp %337 : vector<8x128xi32> to vector<8x128xf32>
    %c27 = arith.constant 27 : index
    %c0_177 = arith.constant 0 : index
    %339 = vector.load %arg5[%c27, %c0_177] : memref<64x128xf32, #tpu.memory_space<vmem>>, vector<1x128xf32>
    %cst_178 = arith.constant dense<0.000000e+00> : vector<128xf32>
    %340 = vector.multi_reduction <add>, %338, %cst_178 [0] : vector<8x128xf32> to vector<128xf32>
    %341 = vector.shape_cast %340 : vector<128xf32> to vector<1x128xf32>
    %342 = arith.addf %339, %341 : vector<1x128xf32>
    %c27_179 = arith.constant 27 : index
    %c0_180 = arith.constant 0 : index
    %343 = vector.load %arg5[%c27_179, %c0_180] : memref<64x128xf32, #tpu.memory_space<vmem>>, vector<1x128xf32>
    tpu.vector_store %arg5[%c27_179, %c0_180], %342 {strides = array<i32>} : memref<64x128xf32, #tpu.memory_space<vmem>>, vector<1x128xf32>,
    %cst_181 = arith.constant 8.000000e+00 : f32
    %344 = vector.broadcast %cst_181 : f32 to vector<8x128xf32>
    %345 = arith.cmpf oeq, %271, %344 : vector<8x128xf32>
    %346 = arith.extui %345 : vector<8x128xi1> to vector<8x128xi32>
    %347 = arith.sitofp %346 : vector<8x128xi32> to vector<8x128xf32>
    %c28 = arith.constant 28 : index
    %c0_182 = arith.constant 0 : index
    %348 = vector.load %arg5[%c28, %c0_182] : memref<64x128xf32, #tpu.memory_space<vmem>>, vector<1x128xf32>
    %cst_183 = arith.constant dense<0.000000e+00> : vector<128xf32>
    %349 = vector.multi_reduction <add>, %347, %cst_183 [0] : vector<8x128xf32> to vector<128xf32>
    %350 = vector.shape_cast %349 : vector<128xf32> to vector<1x128xf32>
    %351 = arith.addf %348, %350 : vector<1x128xf32>
    %c28_184 = arith.constant 28 : index
    %c0_185 = arith.constant 0 : index
    %352 = vector.load %arg5[%c28_184, %c0_185] : memref<64x128xf32, #tpu.memory_space<vmem>>, vector<1x128xf32>
    tpu.vector_store %arg5[%c28_184, %c0_185], %351 {strides = array<i32>} : memref<64x128xf32, #tpu.memory_space<vmem>>, vector<1x128xf32>,
    %cst_186 = arith.constant 9.000000e+00 : f32
    %353 = vector.broadcast %cst_186 : f32 to vector<8x128xf32>
    %354 = arith.cmpf oeq, %271, %353 : vector<8x128xf32>
    %355 = arith.extui %354 : vector<8x128xi1> to vector<8x128xi32>
    %356 = arith.sitofp %355 : vector<8x128xi32> to vector<8x128xf32>
    %c29 = arith.constant 29 : index
    %c0_187 = arith.constant 0 : index
    %357 = vector.load %arg5[%c29, %c0_187] : memref<64x128xf32, #tpu.memory_space<vmem>>, vector<1x128xf32>
    %cst_188 = arith.constant dense<0.000000e+00> : vector<128xf32>
    %358 = vector.multi_reduction <add>, %356, %cst_188 [0] : vector<8x128xf32> to vector<128xf32>
    %359 = vector.shape_cast %358 : vector<128xf32> to vector<1x128xf32>
    %360 = arith.addf %357, %359 : vector<1x128xf32>
    %c29_189 = arith.constant 29 : index
    %c0_190 = arith.constant 0 : index
    %361 = vector.load %arg5[%c29_189, %c0_190] : memref<64x128xf32, #tpu.memory_space<vmem>>, vector<1x128xf32>
    tpu.vector_store %arg5[%c29_189, %c0_190], %360 {strides = array<i32>} : memref<64x128xf32, #tpu.memory_space<vmem>>, vector<1x128xf32>,
    %c0_191 = arith.constant 0 : index
    %c0_192 = arith.constant 0 : index
    %c0_193 = arith.constant 0 : index
    %c0_194 = arith.constant 0 : index
    %362 = vector.load %arg3[%c0_191, %c0_192, %c0_193, %c0_194] : memref<1x3x8x128xf32, #tpu.memory_space<vmem>>, vector<1x1x8x128xf32>
    %363 = vector.shape_cast %362 : vector<1x1x8x128xf32> to vector<8x128xf32>
    %c0_195 = arith.constant 0 : index
    %c1_196 = arith.constant 1 : index
    %c0_197 = arith.constant 0 : index
    %c0_198 = arith.constant 0 : index
    %364 = vector.load %arg3[%c0_195, %c1_196, %c0_197, %c0_198] : memref<1x3x8x128xf32, #tpu.memory_space<vmem>>, vector<1x1x8x128xf32>
    %365 = vector.shape_cast %364 : vector<1x1x8x128xf32> to vector<8x128xf32>
    %c0_199 = arith.constant 0 : index
    %c2_200 = arith.constant 2 : index
    %c0_201 = arith.constant 0 : index
    %c0_202 = arith.constant 0 : index
    %366 = vector.load %arg3[%c0_199, %c2_200, %c0_201, %c0_202] : memref<1x3x8x128xf32, #tpu.memory_space<vmem>>, vector<1x1x8x128xf32>
    %367 = vector.shape_cast %366 : vector<1x1x8x128xf32> to vector<8x128xf32>
    %cst_203 = arith.constant 0.000000e+00 : f32
    %cst_204 = arith.constant 1.000000e+00 : f32
    %368 = vector.broadcast %cst_203 : f32 to vector<8x128xf32>
    %369 = arith.maximumf %368, %363 : vector<8x128xf32>
    %370 = vector.broadcast %cst_204 : f32 to vector<8x128xf32>
    %371 = arith.minimumf %370, %369 : vector<8x128xf32>
    %cst_205 = arith.constant 0.000000e+00 : f32
    %cst_206 = arith.constant 1.000000e+00 : f32
    %372 = vector.broadcast %cst_205 : f32 to vector<8x128xf32>
    %373 = arith.maximumf %372, %365 : vector<8x128xf32>
    %374 = vector.broadcast %cst_206 : f32 to vector<8x128xf32>
    %375 = arith.minimumf %374, %373 : vector<8x128xf32>
    %cst_207 = arith.constant 0.000000e+00 : f32
    %cst_208 = arith.constant 1.000000e+00 : f32
    %376 = vector.broadcast %cst_207 : f32 to vector<8x128xf32>
    %377 = arith.maximumf %376, %367 : vector<8x128xf32>
    %378 = vector.broadcast %cst_208 : f32 to vector<8x128xf32>
    %379 = arith.minimumf %378, %377 : vector<8x128xf32>
    %380 = arith.maximumf %375, %379 : vector<8x128xf32>
    %381 = arith.maximumf %371, %380 : vector<8x128xf32>
    %382 = arith.minimumf %375, %379 : vector<8x128xf32>
    %383 = arith.minimumf %371, %382 : vector<8x128xf32>
    %384 = arith.subf %381, %383 : vector<8x128xf32>
    %cst_209 = arith.constant 0.000000e+00 : f32
    %385 = vector.broadcast %cst_209 : f32 to vector<8x128xf32>
    %386 = arith.cmpf one, %384, %385 : vector<8x128xf32>
    %cst_210 = arith.constant 1.000000e+00 : f32
    %387 = vector.broadcast %cst_210 : f32 to vector<8x128xf32>
    %388 = arith.select %386, %384, %387 : vector<8x128xi1>, vector<8x128xf32>
    %389 = arith.subf %375, %379 : vector<8x128xf32>
    %390 = arith.divf %389, %388 : vector<8x128xf32>
    %cst_211 = arith.constant 0.000000e+00 : f32
    %391 = vector.broadcast %cst_211 : f32 to vector<8x128xf32>
    %392 = arith.cmpf olt, %390, %391 : vector<8x128xf32>
    %cst_212 = arith.constant 6.000000e+00 : f32
    %393 = vector.broadcast %cst_212 : f32 to vector<8x128xf32>
    %394 = arith.addf %390, %393 : vector<8x128xf32>
    %395 = arith.select %392, %394, %390 : vector<8x128xi1>, vector<8x128xf32>
    %396 = arith.subf %379, %371 : vector<8x128xf32>
    %397 = arith.divf %396, %388 : vector<8x128xf32>
    %cst_213 = arith.constant 2.000000e+00 : f32
    %398 = vector.broadcast %cst_213 : f32 to vector<8x128xf32>
    %399 = arith.addf %397, %398 : vector<8x128xf32>
    %400 = arith.subf %371, %375 : vector<8x128xf32>
    %401 = arith.divf %400, %388 : vector<8x128xf32>
    %cst_214 = arith.constant 4.000000e+00 : f32
    %402 = vector.broadcast %cst_214 : f32 to vector<8x128xf32>
    %403 = arith.addf %401, %402 : vector<8x128xf32>
    %404 = arith.cmpf oeq, %381, %371 : vector<8x128xf32>
    %405 = arith.andi %404, %386 : vector<8x128xi1>
    %406 = arith.cmpf oeq, %381, %375 : vector<8x128xf32>
    %407 = arith.andi %406, %386 : vector<8x128xi1>
    %408 = arith.cmpf oeq, %381, %379 : vector<8x128xf32>
    %409 = arith.andi %408, %386 : vector<8x128xi1>
    %cst_215 = arith.constant 0.000000e+00 : f32
    %410 = vector.broadcast %cst_215 : f32 to vector<8x128xf32>
    %411 = arith.select %405, %395, %410 : vector<8x128xi1>, vector<8x128xf32>
    %412 = arith.select %407, %399, %411 : vector<8x128xi1>, vector<8x128xf32>
    %413 = arith.select %409, %403, %412 : vector<8x128xi1>, vector<8x128xf32>
    %cst_216 = arith.constant 6.000000e+00 : f32
    %414 = vector.broadcast %cst_216 : f32 to vector<8x128xf32>
    %415 = arith.divf %413, %414 : vector<8x128xf32>
    %cst_217 = arith.constant 0.000000e+00 : f32
    %416 = vector.broadcast %cst_217 : f32 to vector<8x128xf32>
    %417 = arith.cmpf one, %381, %416 : vector<8x128xf32>
    %cst_218 = arith.constant 1.000000e+00 : f32
    %418 = vector.broadcast %cst_218 : f32 to vector<8x128xf32>
    %419 = arith.select %417, %381, %418 : vector<8x128xi1>, vector<8x128xf32>
    %cst_219 = arith.constant 0.000000e+00 : f32
    %420 = vector.broadcast %cst_219 : f32 to vector<8x128xf32>
    %421 = arith.cmpf one, %381, %420 : vector<8x128xf32>
    %422 = arith.divf %384, %419 : vector<8x128xf32>
    %cst_220 = arith.constant 0.000000e+00 : f32
    %423 = vector.broadcast %cst_220 : f32 to vector<8x128xf32>
    %424 = arith.select %421, %422, %423 : vector<8x128xi1>, vector<8x128xf32>
    %cst_221 = arith.constant 1.000000e+01 : f32
    %425 = vector.broadcast %cst_221 : f32 to vector<8x128xf32>
    %426 = arith.mulf %415, %425 : vector<8x128xf32>
    %427 = math.floor %426 : vector<8x128xf32>
    %cst_222 = arith.constant 0.000000e+00 : f32
    %cst_223 = arith.constant 9.000000e+00 : f32
    %428 = vector.broadcast %cst_222 : f32 to vector<8x128xf32>
    %429 = arith.maximumf %428, %427 : vector<8x128xf32>
    %430 = vector.broadcast %cst_223 : f32 to vector<8x128xf32>
    %431 = arith.minimumf %430, %429 : vector<8x128xf32>
    %cst_224 = arith.constant 0.000000e+00 : f32
    %432 = vector.broadcast %cst_224 : f32 to vector<8x128xf32>
    %433 = arith.cmpf oeq, %431, %432 : vector<8x128xf32>
    %434 = arith.extui %433 : vector<8x128xi1> to vector<8x128xi32>
    %435 = arith.sitofp %434 : vector<8x128xi32> to vector<8x128xf32>
    %c32 = arith.constant 32 : index
    %c0_225 = arith.constant 0 : index
    %436 = vector.load %arg5[%c32, %c0_225] : memref<64x128xf32, #tpu.memory_space<vmem>>, vector<1x128xf32>
    %cst_226 = arith.constant dense<0.000000e+00> : vector<128xf32>
    %437 = vector.multi_reduction <add>, %435, %cst_226 [0] : vector<8x128xf32> to vector<128xf32>
    %438 = vector.shape_cast %437 : vector<128xf32> to vector<1x128xf32>
    %439 = arith.addf %436, %438 : vector<1x128xf32>
    %c32_227 = arith.constant 32 : index
    %c0_228 = arith.constant 0 : index
    %440 = vector.load %arg5[%c32_227, %c0_228] : memref<64x128xf32, #tpu.memory_space<vmem>>, vector<1x128xf32>
    tpu.vector_store %arg5[%c32_227, %c0_228], %439 {strides = array<i32>} : memref<64x128xf32, #tpu.memory_space<vmem>>, vector<1x128xf32>,
    %cst_229 = arith.constant 1.000000e+00 : f32
    %441 = vector.broadcast %cst_229 : f32 to vector<8x128xf32>
    %442 = arith.cmpf oeq, %431, %441 : vector<8x128xf32>
    %443 = arith.extui %442 : vector<8x128xi1> to vector<8x128xi32>
    %444 = arith.sitofp %443 : vector<8x128xi32> to vector<8x128xf32>
    %c33 = arith.constant 33 : index
    %c0_230 = arith.constant 0 : index
    %445 = vector.load %arg5[%c33, %c0_230] : memref<64x128xf32, #tpu.memory_space<vmem>>, vector<1x128xf32>
    %cst_231 = arith.constant dense<0.000000e+00> : vector<128xf32>
    %446 = vector.multi_reduction <add>, %444, %cst_231 [0] : vector<8x128xf32> to vector<128xf32>
    %447 = vector.shape_cast %446 : vector<128xf32> to vector<1x128xf32>
    %448 = arith.addf %445, %447 : vector<1x128xf32>
    %c33_232 = arith.constant 33 : index
    %c0_233 = arith.constant 0 : index
    %449 = vector.load %arg5[%c33_232, %c0_233] : memref<64x128xf32, #tpu.memory_space<vmem>>, vector<1x128xf32>
    tpu.vector_store %arg5[%c33_232, %c0_233], %448 {strides = array<i32>} : memref<64x128xf32, #tpu.memory_space<vmem>>, vector<1x128xf32>,
    %cst_234 = arith.constant 2.000000e+00 : f32
    %450 = vector.broadcast %cst_234 : f32 to vector<8x128xf32>
    %451 = arith.cmpf oeq, %431, %450 : vector<8x128xf32>
    %452 = arith.extui %451 : vector<8x128xi1> to vector<8x128xi32>
    %453 = arith.sitofp %452 : vector<8x128xi32> to vector<8x128xf32>
    %c34 = arith.constant 34 : index
    %c0_235 = arith.constant 0 : index
    %454 = vector.load %arg5[%c34, %c0_235] : memref<64x128xf32, #tpu.memory_space<vmem>>, vector<1x128xf32>
    %cst_236 = arith.constant dense<0.000000e+00> : vector<128xf32>
    %455 = vector.multi_reduction <add>, %453, %cst_236 [0] : vector<8x128xf32> to vector<128xf32>
    %456 = vector.shape_cast %455 : vector<128xf32> to vector<1x128xf32>
    %457 = arith.addf %454, %456 : vector<1x128xf32>
    %c34_237 = arith.constant 34 : index
    %c0_238 = arith.constant 0 : index
    %458 = vector.load %arg5[%c34_237, %c0_238] : memref<64x128xf32, #tpu.memory_space<vmem>>, vector<1x128xf32>
    tpu.vector_store %arg5[%c34_237, %c0_238], %457 {strides = array<i32>} : memref<64x128xf32, #tpu.memory_space<vmem>>, vector<1x128xf32>,
    %cst_239 = arith.constant 3.000000e+00 : f32
    %459 = vector.broadcast %cst_239 : f32 to vector<8x128xf32>
    %460 = arith.cmpf oeq, %431, %459 : vector<8x128xf32>
    %461 = arith.extui %460 : vector<8x128xi1> to vector<8x128xi32>
    %462 = arith.sitofp %461 : vector<8x128xi32> to vector<8x128xf32>
    %c35 = arith.constant 35 : index
    %c0_240 = arith.constant 0 : index
    %463 = vector.load %arg5[%c35, %c0_240] : memref<64x128xf32, #tpu.memory_space<vmem>>, vector<1x128xf32>
    %cst_241 = arith.constant dense<0.000000e+00> : vector<128xf32>
    %464 = vector.multi_reduction <add>, %462, %cst_241 [0] : vector<8x128xf32> to vector<128xf32>
    %465 = vector.shape_cast %464 : vector<128xf32> to vector<1x128xf32>
    %466 = arith.addf %463, %465 : vector<1x128xf32>
    %c35_242 = arith.constant 35 : index
    %c0_243 = arith.constant 0 : index
    %467 = vector.load %arg5[%c35_242, %c0_243] : memref<64x128xf32, #tpu.memory_space<vmem>>, vector<1x128xf32>
    tpu.vector_store %arg5[%c35_242, %c0_243], %466 {strides = array<i32>} : memref<64x128xf32, #tpu.memory_space<vmem>>, vector<1x128xf32>,
    %cst_244 = arith.constant 4.000000e+00 : f32
    %468 = vector.broadcast %cst_244 : f32 to vector<8x128xf32>
    %469 = arith.cmpf oeq, %431, %468 : vector<8x128xf32>
    %470 = arith.extui %469 : vector<8x128xi1> to vector<8x128xi32>
    %471 = arith.sitofp %470 : vector<8x128xi32> to vector<8x128xf32>
    %c36 = arith.constant 36 : index
    %c0_245 = arith.constant 0 : index
    %472 = vector.load %arg5[%c36, %c0_245] : memref<64x128xf32, #tpu.memory_space<vmem>>, vector<1x128xf32>
    %cst_246 = arith.constant dense<0.000000e+00> : vector<128xf32>
    %473 = vector.multi_reduction <add>, %471, %cst_246 [0] : vector<8x128xf32> to vector<128xf32>
    %474 = vector.shape_cast %473 : vector<128xf32> to vector<1x128xf32>
    %475 = arith.addf %472, %474 : vector<1x128xf32>
    %c36_247 = arith.constant 36 : index
    %c0_248 = arith.constant 0 : index
    %476 = vector.load %arg5[%c36_247, %c0_248] : memref<64x128xf32, #tpu.memory_space<vmem>>, vector<1x128xf32>
    tpu.vector_store %arg5[%c36_247, %c0_248], %475 {strides = array<i32>} : memref<64x128xf32, #tpu.memory_space<vmem>>, vector<1x128xf32>,
    %cst_249 = arith.constant 5.000000e+00 : f32
    %477 = vector.broadcast %cst_249 : f32 to vector<8x128xf32>
    %478 = arith.cmpf oeq, %431, %477 : vector<8x128xf32>
    %479 = arith.extui %478 : vector<8x128xi1> to vector<8x128xi32>
    %480 = arith.sitofp %479 : vector<8x128xi32> to vector<8x128xf32>
    %c37 = arith.constant 37 : index
    %c0_250 = arith.constant 0 : index
    %481 = vector.load %arg5[%c37, %c0_250] : memref<64x128xf32, #tpu.memory_space<vmem>>, vector<1x128xf32>
    %cst_251 = arith.constant dense<0.000000e+00> : vector<128xf32>
    %482 = vector.multi_reduction <add>, %480, %cst_251 [0] : vector<8x128xf32> to vector<128xf32>
    %483 = vector.shape_cast %482 : vector<128xf32> to vector<1x128xf32>
    %484 = arith.addf %481, %483 : vector<1x128xf32>
    %c37_252 = arith.constant 37 : index
    %c0_253 = arith.constant 0 : index
    %485 = vector.load %arg5[%c37_252, %c0_253] : memref<64x128xf32, #tpu.memory_space<vmem>>, vector<1x128xf32>
    tpu.vector_store %arg5[%c37_252, %c0_253], %484 {strides = array<i32>} : memref<64x128xf32, #tpu.memory_space<vmem>>, vector<1x128xf32>,
    %cst_254 = arith.constant 6.000000e+00 : f32
    %486 = vector.broadcast %cst_254 : f32 to vector<8x128xf32>
    %487 = arith.cmpf oeq, %431, %486 : vector<8x128xf32>
    %488 = arith.extui %487 : vector<8x128xi1> to vector<8x128xi32>
    %489 = arith.sitofp %488 : vector<8x128xi32> to vector<8x128xf32>
    %c38 = arith.constant 38 : index
    %c0_255 = arith.constant 0 : index
    %490 = vector.load %arg5[%c38, %c0_255] : memref<64x128xf32, #tpu.memory_space<vmem>>, vector<1x128xf32>
    %cst_256 = arith.constant dense<0.000000e+00> : vector<128xf32>
    %491 = vector.multi_reduction <add>, %489, %cst_256 [0] : vector<8x128xf32> to vector<128xf32>
    %492 = vector.shape_cast %491 : vector<128xf32> to vector<1x128xf32>
    %493 = arith.addf %490, %492 : vector<1x128xf32>
    %c38_257 = arith.constant 38 : index
    %c0_258 = arith.constant 0 : index
    %494 = vector.load %arg5[%c38_257, %c0_258] : memref<64x128xf32, #tpu.memory_space<vmem>>, vector<1x128xf32>
    tpu.vector_store %arg5[%c38_257, %c0_258], %493 {strides = array<i32>} : memref<64x128xf32, #tpu.memory_space<vmem>>, vector<1x128xf32>,
    %cst_259 = arith.constant 7.000000e+00 : f32
    %495 = vector.broadcast %cst_259 : f32 to vector<8x128xf32>
    %496 = arith.cmpf oeq, %431, %495 : vector<8x128xf32>
    %497 = arith.extui %496 : vector<8x128xi1> to vector<8x128xi32>
    %498 = arith.sitofp %497 : vector<8x128xi32> to vector<8x128xf32>
    %c39 = arith.constant 39 : index
    %c0_260 = arith.constant 0 : index
    %499 = vector.load %arg5[%c39, %c0_260] : memref<64x128xf32, #tpu.memory_space<vmem>>, vector<1x128xf32>
    %cst_261 = arith.constant dense<0.000000e+00> : vector<128xf32>
    %500 = vector.multi_reduction <add>, %498, %cst_261 [0] : vector<8x128xf32> to vector<128xf32>
    %501 = vector.shape_cast %500 : vector<128xf32> to vector<1x128xf32>
    %502 = arith.addf %499, %501 : vector<1x128xf32>
    %c39_262 = arith.constant 39 : index
    %c0_263 = arith.constant 0 : index
    %503 = vector.load %arg5[%c39_262, %c0_263] : memref<64x128xf32, #tpu.memory_space<vmem>>, vector<1x128xf32>
    tpu.vector_store %arg5[%c39_262, %c0_263], %502 {strides = array<i32>} : memref<64x128xf32, #tpu.memory_space<vmem>>, vector<1x128xf32>,
    %cst_264 = arith.constant 8.000000e+00 : f32
    %504 = vector.broadcast %cst_264 : f32 to vector<8x128xf32>
    %505 = arith.cmpf oeq, %431, %504 : vector<8x128xf32>
    %506 = arith.extui %505 : vector<8x128xi1> to vector<8x128xi32>
    %507 = arith.sitofp %506 : vector<8x128xi32> to vector<8x128xf32>
    %c40 = arith.constant 40 : index
    %c0_265 = arith.constant 0 : index
    %508 = vector.load %arg5[%c40, %c0_265] : memref<64x128xf32, #tpu.memory_space<vmem>>, vector<1x128xf32>
    %cst_266 = arith.constant dense<0.000000e+00> : vector<128xf32>
    %509 = vector.multi_reduction <add>, %507, %cst_266 [0] : vector<8x128xf32> to vector<128xf32>
    %510 = vector.shape_cast %509 : vector<128xf32> to vector<1x128xf32>
    %511 = arith.addf %508, %510 : vector<1x128xf32>
    %c40_267 = arith.constant 40 : index
    %c0_268 = arith.constant 0 : index
    %512 = vector.load %arg5[%c40_267, %c0_268] : memref<64x128xf32, #tpu.memory_space<vmem>>, vector<1x128xf32>
    tpu.vector_store %arg5[%c40_267, %c0_268], %511 {strides = array<i32>} : memref<64x128xf32, #tpu.memory_space<vmem>>, vector<1x128xf32>,
    %cst_269 = arith.constant 9.000000e+00 : f32
    %513 = vector.broadcast %cst_269 : f32 to vector<8x128xf32>
    %514 = arith.cmpf oeq, %431, %513 : vector<8x128xf32>
    %515 = arith.extui %514 : vector<8x128xi1> to vector<8x128xi32>
    %516 = arith.sitofp %515 : vector<8x128xi32> to vector<8x128xf32>
    %c41 = arith.constant 41 : index
    %c0_270 = arith.constant 0 : index
    %517 = vector.load %arg5[%c41, %c0_270] : memref<64x128xf32, #tpu.memory_space<vmem>>, vector<1x128xf32>
    %cst_271 = arith.constant dense<0.000000e+00> : vector<128xf32>
    %518 = vector.multi_reduction <add>, %516, %cst_271 [0] : vector<8x128xf32> to vector<128xf32>
    %519 = vector.shape_cast %518 : vector<128xf32> to vector<1x128xf32>
    %520 = arith.addf %517, %519 : vector<1x128xf32>
    %c41_272 = arith.constant 41 : index
    %c0_273 = arith.constant 0 : index
    %521 = vector.load %arg5[%c41_272, %c0_273] : memref<64x128xf32, #tpu.memory_space<vmem>>, vector<1x128xf32>
    tpu.vector_store %arg5[%c41_272, %c0_273], %520 {strides = array<i32>} : memref<64x128xf32, #tpu.memory_space<vmem>>, vector<1x128xf32>,
    %cst_274 = arith.constant 1.000000e+01 : f32
    %522 = vector.broadcast %cst_274 : f32 to vector<8x128xf32>
    %523 = arith.mulf %424, %522 : vector<8x128xf32>
    %524 = math.floor %523 : vector<8x128xf32>
    %cst_275 = arith.constant 0.000000e+00 : f32
    %cst_276 = arith.constant 9.000000e+00 : f32
    %525 = vector.broadcast %cst_275 : f32 to vector<8x128xf32>
    %526 = arith.maximumf %525, %524 : vector<8x128xf32>
    %527 = vector.broadcast %cst_276 : f32 to vector<8x128xf32>
    %528 = arith.minimumf %527, %526 : vector<8x128xf32>
    %cst_277 = arith.constant 0.000000e+00 : f32
    %529 = vector.broadcast %cst_277 : f32 to vector<8x128xf32>
    %530 = arith.cmpf oeq, %528, %529 : vector<8x128xf32>
    %531 = arith.extui %530 : vector<8x128xi1> to vector<8x128xi32>
    %532 = arith.sitofp %531 : vector<8x128xi32> to vector<8x128xf32>
    %c42 = arith.constant 42 : index
    %c0_278 = arith.constant 0 : index
    %533 = vector.load %arg5[%c42, %c0_278] : memref<64x128xf32, #tpu.memory_space<vmem>>, vector<1x128xf32>
    %cst_279 = arith.constant dense<0.000000e+00> : vector<128xf32>
    %534 = vector.multi_reduction <add>, %532, %cst_279 [0] : vector<8x128xf32> to vector<128xf32>
    %535 = vector.shape_cast %534 : vector<128xf32> to vector<1x128xf32>
    %536 = arith.addf %533, %535 : vector<1x128xf32>
    %c42_280 = arith.constant 42 : index
    %c0_281 = arith.constant 0 : index
    %537 = vector.load %arg5[%c42_280, %c0_281] : memref<64x128xf32, #tpu.memory_space<vmem>>, vector<1x128xf32>
    tpu.vector_store %arg5[%c42_280, %c0_281], %536 {strides = array<i32>} : memref<64x128xf32, #tpu.memory_space<vmem>>, vector<1x128xf32>,
    %cst_282 = arith.constant 1.000000e+00 : f32
    %538 = vector.broadcast %cst_282 : f32 to vector<8x128xf32>
    %539 = arith.cmpf oeq, %528, %538 : vector<8x128xf32>
    %540 = arith.extui %539 : vector<8x128xi1> to vector<8x128xi32>
    %541 = arith.sitofp %540 : vector<8x128xi32> to vector<8x128xf32>
    %c43 = arith.constant 43 : index
    %c0_283 = arith.constant 0 : index
    %542 = vector.load %arg5[%c43, %c0_283] : memref<64x128xf32, #tpu.memory_space<vmem>>, vector<1x128xf32>
    %cst_284 = arith.constant dense<0.000000e+00> : vector<128xf32>
    %543 = vector.multi_reduction <add>, %541, %cst_284 [0] : vector<8x128xf32> to vector<128xf32>
    %544 = vector.shape_cast %543 : vector<128xf32> to vector<1x128xf32>
    %545 = arith.addf %542, %544 : vector<1x128xf32>
    %c43_285 = arith.constant 43 : index
    %c0_286 = arith.constant 0 : index
    %546 = vector.load %arg5[%c43_285, %c0_286] : memref<64x128xf32, #tpu.memory_space<vmem>>, vector<1x128xf32>
    tpu.vector_store %arg5[%c43_285, %c0_286], %545 {strides = array<i32>} : memref<64x128xf32, #tpu.memory_space<vmem>>, vector<1x128xf32>,
    %cst_287 = arith.constant 2.000000e+00 : f32
    %547 = vector.broadcast %cst_287 : f32 to vector<8x128xf32>
    %548 = arith.cmpf oeq, %528, %547 : vector<8x128xf32>
    %549 = arith.extui %548 : vector<8x128xi1> to vector<8x128xi32>
    %550 = arith.sitofp %549 : vector<8x128xi32> to vector<8x128xf32>
    %c44 = arith.constant 44 : index
    %c0_288 = arith.constant 0 : index
    %551 = vector.load %arg5[%c44, %c0_288] : memref<64x128xf32, #tpu.memory_space<vmem>>, vector<1x128xf32>
    %cst_289 = arith.constant dense<0.000000e+00> : vector<128xf32>
    %552 = vector.multi_reduction <add>, %550, %cst_289 [0] : vector<8x128xf32> to vector<128xf32>
    %553 = vector.shape_cast %552 : vector<128xf32> to vector<1x128xf32>
    %554 = arith.addf %551, %553 : vector<1x128xf32>
    %c44_290 = arith.constant 44 : index
    %c0_291 = arith.constant 0 : index
    %555 = vector.load %arg5[%c44_290, %c0_291] : memref<64x128xf32, #tpu.memory_space<vmem>>, vector<1x128xf32>
    tpu.vector_store %arg5[%c44_290, %c0_291], %554 {strides = array<i32>} : memref<64x128xf32, #tpu.memory_space<vmem>>, vector<1x128xf32>,
    %cst_292 = arith.constant 3.000000e+00 : f32
    %556 = vector.broadcast %cst_292 : f32 to vector<8x128xf32>
    %557 = arith.cmpf oeq, %528, %556 : vector<8x128xf32>
    %558 = arith.extui %557 : vector<8x128xi1> to vector<8x128xi32>
    %559 = arith.sitofp %558 : vector<8x128xi32> to vector<8x128xf32>
    %c45 = arith.constant 45 : index
    %c0_293 = arith.constant 0 : index
    %560 = vector.load %arg5[%c45, %c0_293] : memref<64x128xf32, #tpu.memory_space<vmem>>, vector<1x128xf32>
    %cst_294 = arith.constant dense<0.000000e+00> : vector<128xf32>
    %561 = vector.multi_reduction <add>, %559, %cst_294 [0] : vector<8x128xf32> to vector<128xf32>
    %562 = vector.shape_cast %561 : vector<128xf32> to vector<1x128xf32>
    %563 = arith.addf %560, %562 : vector<1x128xf32>
    %c45_295 = arith.constant 45 : index
    %c0_296 = arith.constant 0 : index
    %564 = vector.load %arg5[%c45_295, %c0_296] : memref<64x128xf32, #tpu.memory_space<vmem>>, vector<1x128xf32>
    tpu.vector_store %arg5[%c45_295, %c0_296], %563 {strides = array<i32>} : memref<64x128xf32, #tpu.memory_space<vmem>>, vector<1x128xf32>,
    %cst_297 = arith.constant 4.000000e+00 : f32
    %565 = vector.broadcast %cst_297 : f32 to vector<8x128xf32>
    %566 = arith.cmpf oeq, %528, %565 : vector<8x128xf32>
    %567 = arith.extui %566 : vector<8x128xi1> to vector<8x128xi32>
    %568 = arith.sitofp %567 : vector<8x128xi32> to vector<8x128xf32>
    %c46 = arith.constant 46 : index
    %c0_298 = arith.constant 0 : index
    %569 = vector.load %arg5[%c46, %c0_298] : memref<64x128xf32, #tpu.memory_space<vmem>>, vector<1x128xf32>
    %cst_299 = arith.constant dense<0.000000e+00> : vector<128xf32>
    %570 = vector.multi_reduction <add>, %568, %cst_299 [0] : vector<8x128xf32> to vector<128xf32>
    %571 = vector.shape_cast %570 : vector<128xf32> to vector<1x128xf32>
    %572 = arith.addf %569, %571 : vector<1x128xf32>
    %c46_300 = arith.constant 46 : index
    %c0_301 = arith.constant 0 : index
    %573 = vector.load %arg5[%c46_300, %c0_301] : memref<64x128xf32, #tpu.memory_space<vmem>>, vector<1x128xf32>
    tpu.vector_store %arg5[%c46_300, %c0_301], %572 {strides = array<i32>} : memref<64x128xf32, #tpu.memory_space<vmem>>, vector<1x128xf32>,
    %cst_302 = arith.constant 5.000000e+00 : f32
    %574 = vector.broadcast %cst_302 : f32 to vector<8x128xf32>
    %575 = arith.cmpf oeq, %528, %574 : vector<8x128xf32>
    %576 = arith.extui %575 : vector<8x128xi1> to vector<8x128xi32>
    %577 = arith.sitofp %576 : vector<8x128xi32> to vector<8x128xf32>
    %c47 = arith.constant 47 : index
    %c0_303 = arith.constant 0 : index
    %578 = vector.load %arg5[%c47, %c0_303] : memref<64x128xf32, #tpu.memory_space<vmem>>, vector<1x128xf32>
    %cst_304 = arith.constant dense<0.000000e+00> : vector<128xf32>
    %579 = vector.multi_reduction <add>, %577, %cst_304 [0] : vector<8x128xf32> to vector<128xf32>
    %580 = vector.shape_cast %579 : vector<128xf32> to vector<1x128xf32>
    %581 = arith.addf %578, %580 : vector<1x128xf32>
    %c47_305 = arith.constant 47 : index
    %c0_306 = arith.constant 0 : index
    %582 = vector.load %arg5[%c47_305, %c0_306] : memref<64x128xf32, #tpu.memory_space<vmem>>, vector<1x128xf32>
    tpu.vector_store %arg5[%c47_305, %c0_306], %581 {strides = array<i32>} : memref<64x128xf32, #tpu.memory_space<vmem>>, vector<1x128xf32>,
    %cst_307 = arith.constant 6.000000e+00 : f32
    %583 = vector.broadcast %cst_307 : f32 to vector<8x128xf32>
    %584 = arith.cmpf oeq, %528, %583 : vector<8x128xf32>
    %585 = arith.extui %584 : vector<8x128xi1> to vector<8x128xi32>
    %586 = arith.sitofp %585 : vector<8x128xi32> to vector<8x128xf32>
    %c48 = arith.constant 48 : index
    %c0_308 = arith.constant 0 : index
    %587 = vector.load %arg5[%c48, %c0_308] : memref<64x128xf32, #tpu.memory_space<vmem>>, vector<1x128xf32>
    %cst_309 = arith.constant dense<0.000000e+00> : vector<128xf32>
    %588 = vector.multi_reduction <add>, %586, %cst_309 [0] : vector<8x128xf32> to vector<128xf32>
    %589 = vector.shape_cast %588 : vector<128xf32> to vector<1x128xf32>
    %590 = arith.addf %587, %589 : vector<1x128xf32>
    %c48_310 = arith.constant 48 : index
    %c0_311 = arith.constant 0 : index
    %591 = vector.load %arg5[%c48_310, %c0_311] : memref<64x128xf32, #tpu.memory_space<vmem>>, vector<1x128xf32>
    tpu.vector_store %arg5[%c48_310, %c0_311], %590 {strides = array<i32>} : memref<64x128xf32, #tpu.memory_space<vmem>>, vector<1x128xf32>,
    %cst_312 = arith.constant 7.000000e+00 : f32
    %592 = vector.broadcast %cst_312 : f32 to vector<8x128xf32>
    %593 = arith.cmpf oeq, %528, %592 : vector<8x128xf32>
    %594 = arith.extui %593 : vector<8x128xi1> to vector<8x128xi32>
    %595 = arith.sitofp %594 : vector<8x128xi32> to vector<8x128xf32>
    %c49 = arith.constant 49 : index
    %c0_313 = arith.constant 0 : index
    %596 = vector.load %arg5[%c49, %c0_313] : memref<64x128xf32, #tpu.memory_space<vmem>>, vector<1x128xf32>
    %cst_314 = arith.constant dense<0.000000e+00> : vector<128xf32>
    %597 = vector.multi_reduction <add>, %595, %cst_314 [0] : vector<8x128xf32> to vector<128xf32>
    %598 = vector.shape_cast %597 : vector<128xf32> to vector<1x128xf32>
    %599 = arith.addf %596, %598 : vector<1x128xf32>
    %c49_315 = arith.constant 49 : index
    %c0_316 = arith.constant 0 : index
    %600 = vector.load %arg5[%c49_315, %c0_316] : memref<64x128xf32, #tpu.memory_space<vmem>>, vector<1x128xf32>
    tpu.vector_store %arg5[%c49_315, %c0_316], %599 {strides = array<i32>} : memref<64x128xf32, #tpu.memory_space<vmem>>, vector<1x128xf32>,
    %cst_317 = arith.constant 8.000000e+00 : f32
    %601 = vector.broadcast %cst_317 : f32 to vector<8x128xf32>
    %602 = arith.cmpf oeq, %528, %601 : vector<8x128xf32>
    %603 = arith.extui %602 : vector<8x128xi1> to vector<8x128xi32>
    %604 = arith.sitofp %603 : vector<8x128xi32> to vector<8x128xf32>
    %c50 = arith.constant 50 : index
    %c0_318 = arith.constant 0 : index
    %605 = vector.load %arg5[%c50, %c0_318] : memref<64x128xf32, #tpu.memory_space<vmem>>, vector<1x128xf32>
    %cst_319 = arith.constant dense<0.000000e+00> : vector<128xf32>
    %606 = vector.multi_reduction <add>, %604, %cst_319 [0] : vector<8x128xf32> to vector<128xf32>
    %607 = vector.shape_cast %606 : vector<128xf32> to vector<1x128xf32>
    %608 = arith.addf %605, %607 : vector<1x128xf32>
    %c50_320 = arith.constant 50 : index
    %c0_321 = arith.constant 0 : index
    %609 = vector.load %arg5[%c50_320, %c0_321] : memref<64x128xf32, #tpu.memory_space<vmem>>, vector<1x128xf32>
    tpu.vector_store %arg5[%c50_320, %c0_321], %608 {strides = array<i32>} : memref<64x128xf32, #tpu.memory_space<vmem>>, vector<1x128xf32>,
    %cst_322 = arith.constant 9.000000e+00 : f32
    %610 = vector.broadcast %cst_322 : f32 to vector<8x128xf32>
    %611 = arith.cmpf oeq, %528, %610 : vector<8x128xf32>
    %612 = arith.extui %611 : vector<8x128xi1> to vector<8x128xi32>
    %613 = arith.sitofp %612 : vector<8x128xi32> to vector<8x128xf32>
    %c51 = arith.constant 51 : index
    %c0_323 = arith.constant 0 : index
    %614 = vector.load %arg5[%c51, %c0_323] : memref<64x128xf32, #tpu.memory_space<vmem>>, vector<1x128xf32>
    %cst_324 = arith.constant dense<0.000000e+00> : vector<128xf32>
    %615 = vector.multi_reduction <add>, %613, %cst_324 [0] : vector<8x128xf32> to vector<128xf32>
    %616 = vector.shape_cast %615 : vector<128xf32> to vector<1x128xf32>
    %617 = arith.addf %614, %616 : vector<1x128xf32>
    %c51_325 = arith.constant 51 : index
    %c0_326 = arith.constant 0 : index
    %618 = vector.load %arg5[%c51_325, %c0_326] : memref<64x128xf32, #tpu.memory_space<vmem>>, vector<1x128xf32>
    tpu.vector_store %arg5[%c51_325, %c0_326], %617 {strides = array<i32>} : memref<64x128xf32, #tpu.memory_space<vmem>>, vector<1x128xf32>,
    %cst_327 = arith.constant 1.000000e+01 : f32
    %619 = vector.broadcast %cst_327 : f32 to vector<8x128xf32>
    %620 = arith.mulf %381, %619 : vector<8x128xf32>
    %621 = math.floor %620 : vector<8x128xf32>
    %cst_328 = arith.constant 0.000000e+00 : f32
    %cst_329 = arith.constant 9.000000e+00 : f32
    %622 = vector.broadcast %cst_328 : f32 to vector<8x128xf32>
    %623 = arith.maximumf %622, %621 : vector<8x128xf32>
    %624 = vector.broadcast %cst_329 : f32 to vector<8x128xf32>
    %625 = arith.minimumf %624, %623 : vector<8x128xf32>
    %cst_330 = arith.constant 0.000000e+00 : f32
    %626 = vector.broadcast %cst_330 : f32 to vector<8x128xf32>
    %627 = arith.cmpf oeq, %625, %626 : vector<8x128xf32>
    %628 = arith.extui %627 : vector<8x128xi1> to vector<8x128xi32>
    %629 = arith.sitofp %628 : vector<8x128xi32> to vector<8x128xf32>
    %c52 = arith.constant 52 : index
    %c0_331 = arith.constant 0 : index
    %630 = vector.load %arg5[%c52, %c0_331] : memref<64x128xf32, #tpu.memory_space<vmem>>, vector<1x128xf32>
    %cst_332 = arith.constant dense<0.000000e+00> : vector<128xf32>
    %631 = vector.multi_reduction <add>, %629, %cst_332 [0] : vector<8x128xf32> to vector<128xf32>
    %632 = vector.shape_cast %631 : vector<128xf32> to vector<1x128xf32>
    %633 = arith.addf %630, %632 : vector<1x128xf32>
    %c52_333 = arith.constant 52 : index
    %c0_334 = arith.constant 0 : index
    %634 = vector.load %arg5[%c52_333, %c0_334] : memref<64x128xf32, #tpu.memory_space<vmem>>, vector<1x128xf32>
    tpu.vector_store %arg5[%c52_333, %c0_334], %633 {strides = array<i32>} : memref<64x128xf32, #tpu.memory_space<vmem>>, vector<1x128xf32>,
    %cst_335 = arith.constant 1.000000e+00 : f32
    %635 = vector.broadcast %cst_335 : f32 to vector<8x128xf32>
    %636 = arith.cmpf oeq, %625, %635 : vector<8x128xf32>
    %637 = arith.extui %636 : vector<8x128xi1> to vector<8x128xi32>
    %638 = arith.sitofp %637 : vector<8x128xi32> to vector<8x128xf32>
    %c53 = arith.constant 53 : index
    %c0_336 = arith.constant 0 : index
    %639 = vector.load %arg5[%c53, %c0_336] : memref<64x128xf32, #tpu.memory_space<vmem>>, vector<1x128xf32>
    %cst_337 = arith.constant dense<0.000000e+00> : vector<128xf32>
    %640 = vector.multi_reduction <add>, %638, %cst_337 [0] : vector<8x128xf32> to vector<128xf32>
    %641 = vector.shape_cast %640 : vector<128xf32> to vector<1x128xf32>
    %642 = arith.addf %639, %641 : vector<1x128xf32>
    %c53_338 = arith.constant 53 : index
    %c0_339 = arith.constant 0 : index
    %643 = vector.load %arg5[%c53_338, %c0_339] : memref<64x128xf32, #tpu.memory_space<vmem>>, vector<1x128xf32>
    tpu.vector_store %arg5[%c53_338, %c0_339], %642 {strides = array<i32>} : memref<64x128xf32, #tpu.memory_space<vmem>>, vector<1x128xf32>,
    %cst_340 = arith.constant 2.000000e+00 : f32
    %644 = vector.broadcast %cst_340 : f32 to vector<8x128xf32>
    %645 = arith.cmpf oeq, %625, %644 : vector<8x128xf32>
    %646 = arith.extui %645 : vector<8x128xi1> to vector<8x128xi32>
    %647 = arith.sitofp %646 : vector<8x128xi32> to vector<8x128xf32>
    %c54 = arith.constant 54 : index
    %c0_341 = arith.constant 0 : index
    %648 = vector.load %arg5[%c54, %c0_341] : memref<64x128xf32, #tpu.memory_space<vmem>>, vector<1x128xf32>
    %cst_342 = arith.constant dense<0.000000e+00> : vector<128xf32>
    %649 = vector.multi_reduction <add>, %647, %cst_342 [0] : vector<8x128xf32> to vector<128xf32>
    %650 = vector.shape_cast %649 : vector<128xf32> to vector<1x128xf32>
    %651 = arith.addf %648, %650 : vector<1x128xf32>
    %c54_343 = arith.constant 54 : index
    %c0_344 = arith.constant 0 : index
    %652 = vector.load %arg5[%c54_343, %c0_344] : memref<64x128xf32, #tpu.memory_space<vmem>>, vector<1x128xf32>
    tpu.vector_store %arg5[%c54_343, %c0_344], %651 {strides = array<i32>} : memref<64x128xf32, #tpu.memory_space<vmem>>, vector<1x128xf32>,
    %cst_345 = arith.constant 3.000000e+00 : f32
    %653 = vector.broadcast %cst_345 : f32 to vector<8x128xf32>
    %654 = arith.cmpf oeq, %625, %653 : vector<8x128xf32>
    %655 = arith.extui %654 : vector<8x128xi1> to vector<8x128xi32>
    %656 = arith.sitofp %655 : vector<8x128xi32> to vector<8x128xf32>
    %c55 = arith.constant 55 : index
    %c0_346 = arith.constant 0 : index
    %657 = vector.load %arg5[%c55, %c0_346] : memref<64x128xf32, #tpu.memory_space<vmem>>, vector<1x128xf32>
    %cst_347 = arith.constant dense<0.000000e+00> : vector<128xf32>
    %658 = vector.multi_reduction <add>, %656, %cst_347 [0] : vector<8x128xf32> to vector<128xf32>
    %659 = vector.shape_cast %658 : vector<128xf32> to vector<1x128xf32>
    %660 = arith.addf %657, %659 : vector<1x128xf32>
    %c55_348 = arith.constant 55 : index
    %c0_349 = arith.constant 0 : index
    %661 = vector.load %arg5[%c55_348, %c0_349] : memref<64x128xf32, #tpu.memory_space<vmem>>, vector<1x128xf32>
    tpu.vector_store %arg5[%c55_348, %c0_349], %660 {strides = array<i32>} : memref<64x128xf32, #tpu.memory_space<vmem>>, vector<1x128xf32>,
    %cst_350 = arith.constant 4.000000e+00 : f32
    %662 = vector.broadcast %cst_350 : f32 to vector<8x128xf32>
    %663 = arith.cmpf oeq, %625, %662 : vector<8x128xf32>
    %664 = arith.extui %663 : vector<8x128xi1> to vector<8x128xi32>
    %665 = arith.sitofp %664 : vector<8x128xi32> to vector<8x128xf32>
    %c56 = arith.constant 56 : index
    %c0_351 = arith.constant 0 : index
    %666 = vector.load %arg5[%c56, %c0_351] : memref<64x128xf32, #tpu.memory_space<vmem>>, vector<1x128xf32>
    %cst_352 = arith.constant dense<0.000000e+00> : vector<128xf32>
    %667 = vector.multi_reduction <add>, %665, %cst_352 [0] : vector<8x128xf32> to vector<128xf32>
    %668 = vector.shape_cast %667 : vector<128xf32> to vector<1x128xf32>
    %669 = arith.addf %666, %668 : vector<1x128xf32>
    %c56_353 = arith.constant 56 : index
    %c0_354 = arith.constant 0 : index
    %670 = vector.load %arg5[%c56_353, %c0_354] : memref<64x128xf32, #tpu.memory_space<vmem>>, vector<1x128xf32>
    tpu.vector_store %arg5[%c56_353, %c0_354], %669 {strides = array<i32>} : memref<64x128xf32, #tpu.memory_space<vmem>>, vector<1x128xf32>,
    %cst_355 = arith.constant 5.000000e+00 : f32
    %671 = vector.broadcast %cst_355 : f32 to vector<8x128xf32>
    %672 = arith.cmpf oeq, %625, %671 : vector<8x128xf32>
    %673 = arith.extui %672 : vector<8x128xi1> to vector<8x128xi32>
    %674 = arith.sitofp %673 : vector<8x128xi32> to vector<8x128xf32>
    %c57 = arith.constant 57 : index
    %c0_356 = arith.constant 0 : index
    %675 = vector.load %arg5[%c57, %c0_356] : memref<64x128xf32, #tpu.memory_space<vmem>>, vector<1x128xf32>
    %cst_357 = arith.constant dense<0.000000e+00> : vector<128xf32>
    %676 = vector.multi_reduction <add>, %674, %cst_357 [0] : vector<8x128xf32> to vector<128xf32>
    %677 = vector.shape_cast %676 : vector<128xf32> to vector<1x128xf32>
    %678 = arith.addf %675, %677 : vector<1x128xf32>
    %c57_358 = arith.constant 57 : index
    %c0_359 = arith.constant 0 : index
    %679 = vector.load %arg5[%c57_358, %c0_359] : memref<64x128xf32, #tpu.memory_space<vmem>>, vector<1x128xf32>
    tpu.vector_store %arg5[%c57_358, %c0_359], %678 {strides = array<i32>} : memref<64x128xf32, #tpu.memory_space<vmem>>, vector<1x128xf32>,
    %cst_360 = arith.constant 6.000000e+00 : f32
    %680 = vector.broadcast %cst_360 : f32 to vector<8x128xf32>
    %681 = arith.cmpf oeq, %625, %680 : vector<8x128xf32>
    %682 = arith.extui %681 : vector<8x128xi1> to vector<8x128xi32>
    %683 = arith.sitofp %682 : vector<8x128xi32> to vector<8x128xf32>
    %c58 = arith.constant 58 : index
    %c0_361 = arith.constant 0 : index
    %684 = vector.load %arg5[%c58, %c0_361] : memref<64x128xf32, #tpu.memory_space<vmem>>, vector<1x128xf32>
    %cst_362 = arith.constant dense<0.000000e+00> : vector<128xf32>
    %685 = vector.multi_reduction <add>, %683, %cst_362 [0] : vector<8x128xf32> to vector<128xf32>
    %686 = vector.shape_cast %685 : vector<128xf32> to vector<1x128xf32>
    %687 = arith.addf %684, %686 : vector<1x128xf32>
    %c58_363 = arith.constant 58 : index
    %c0_364 = arith.constant 0 : index
    %688 = vector.load %arg5[%c58_363, %c0_364] : memref<64x128xf32, #tpu.memory_space<vmem>>, vector<1x128xf32>
    tpu.vector_store %arg5[%c58_363, %c0_364], %687 {strides = array<i32>} : memref<64x128xf32, #tpu.memory_space<vmem>>, vector<1x128xf32>,
    %cst_365 = arith.constant 7.000000e+00 : f32
    %689 = vector.broadcast %cst_365 : f32 to vector<8x128xf32>
    %690 = arith.cmpf oeq, %625, %689 : vector<8x128xf32>
    %691 = arith.extui %690 : vector<8x128xi1> to vector<8x128xi32>
    %692 = arith.sitofp %691 : vector<8x128xi32> to vector<8x128xf32>
    %c59 = arith.constant 59 : index
    %c0_366 = arith.constant 0 : index
    %693 = vector.load %arg5[%c59, %c0_366] : memref<64x128xf32, #tpu.memory_space<vmem>>, vector<1x128xf32>
    %cst_367 = arith.constant dense<0.000000e+00> : vector<128xf32>
    %694 = vector.multi_reduction <add>, %692, %cst_367 [0] : vector<8x128xf32> to vector<128xf32>
    %695 = vector.shape_cast %694 : vector<128xf32> to vector<1x128xf32>
    %696 = arith.addf %693, %695 : vector<1x128xf32>
    %c59_368 = arith.constant 59 : index
    %c0_369 = arith.constant 0 : index
    %697 = vector.load %arg5[%c59_368, %c0_369] : memref<64x128xf32, #tpu.memory_space<vmem>>, vector<1x128xf32>
    tpu.vector_store %arg5[%c59_368, %c0_369], %696 {strides = array<i32>} : memref<64x128xf32, #tpu.memory_space<vmem>>, vector<1x128xf32>,
    %cst_370 = arith.constant 8.000000e+00 : f32
    %698 = vector.broadcast %cst_370 : f32 to vector<8x128xf32>
    %699 = arith.cmpf oeq, %625, %698 : vector<8x128xf32>
    %700 = arith.extui %699 : vector<8x128xi1> to vector<8x128xi32>
    %701 = arith.sitofp %700 : vector<8x128xi32> to vector<8x128xf32>
    %c60 = arith.constant 60 : index
    %c0_371 = arith.constant 0 : index
    %702 = vector.load %arg5[%c60, %c0_371] : memref<64x128xf32, #tpu.memory_space<vmem>>, vector<1x128xf32>
    %cst_372 = arith.constant dense<0.000000e+00> : vector<128xf32>
    %703 = vector.multi_reduction <add>, %701, %cst_372 [0] : vector<8x128xf32> to vector<128xf32>
    %704 = vector.shape_cast %703 : vector<128xf32> to vector<1x128xf32>
    %705 = arith.addf %702, %704 : vector<1x128xf32>
    %c60_373 = arith.constant 60 : index
    %c0_374 = arith.constant 0 : index
    %706 = vector.load %arg5[%c60_373, %c0_374] : memref<64x128xf32, #tpu.memory_space<vmem>>, vector<1x128xf32>
    tpu.vector_store %arg5[%c60_373, %c0_374], %705 {strides = array<i32>} : memref<64x128xf32, #tpu.memory_space<vmem>>, vector<1x128xf32>,
    %cst_375 = arith.constant 9.000000e+00 : f32
    %707 = vector.broadcast %cst_375 : f32 to vector<8x128xf32>
    %708 = arith.cmpf oeq, %625, %707 : vector<8x128xf32>
    %709 = arith.extui %708 : vector<8x128xi1> to vector<8x128xi32>
    %710 = arith.sitofp %709 : vector<8x128xi32> to vector<8x128xf32>
    %c61 = arith.constant 61 : index
    %c0_376 = arith.constant 0 : index
    %711 = vector.load %arg5[%c61, %c0_376] : memref<64x128xf32, #tpu.memory_space<vmem>>, vector<1x128xf32>
    %cst_377 = arith.constant dense<0.000000e+00> : vector<128xf32>
    %712 = vector.multi_reduction <add>, %710, %cst_377 [0] : vector<8x128xf32> to vector<128xf32>
    %713 = vector.shape_cast %712 : vector<128xf32> to vector<1x128xf32>
    %714 = arith.addf %711, %713 : vector<1x128xf32>
    %c61_378 = arith.constant 61 : index
    %c0_379 = arith.constant 0 : index
    %715 = vector.load %arg5[%c61_378, %c0_379] : memref<64x128xf32, #tpu.memory_space<vmem>>, vector<1x128xf32>
    tpu.vector_store %arg5[%c61_378, %c0_379], %714 {strides = array<i32>} : memref<64x128xf32, #tpu.memory_space<vmem>>, vector<1x128xf32>,
    %716 = arith.extui %5 : i1 to i32
    %c0_i32_380 = arith.constant 0 : i32
    %717 = arith.cmpi ne, %716, %c0_i32_380 : i32
    scf.if %717 {
      %c0_381 = arith.constant 0 : index
      %c0_382 = arith.constant 0 : index
      %718 = vector.load %arg5[%c0_381, %c0_382] : memref<64x128xf32, #tpu.memory_space<vmem>>, vector<64x128xf32>
      %719 = vector.extract_strided_slice %718 {offsets = [0, 0], sizes = [32, 128], strides = [1, 1]} : vector<64x128xf32> to vector<32x128xf32>
      %720 = vector.extract_strided_slice %718 {offsets = [32, 0], sizes = [32, 128], strides = [1, 1]} : vector<64x128xf32> to vector<32x128xf32>
      %721 = arith.subf %719, %720 : vector<32x128xf32>
      %cst_383 = arith.constant dense<0.000000e+00> : vector<32xf32>
      %722 = vector.multi_reduction <add>, %721, %cst_383 [1] : vector<32x128xf32> to vector<32xf32>
      %723 = vector.shape_cast %722 : vector<32xf32> to vector<32x1xf32>
      %724 = math.absf %723 : vector<32x1xf32>
      %725 = tpu.iota {dimensions = array<i32: 0>} : vector<32x1xi32>
      %c10_i32 = arith.constant 10 : i32
      %726 = vector.broadcast %c10_i32 : i32 to vector<32x1xi32>
      %727 = arith.cmpi slt, %725, %726 : vector<32x1xi32>
      %c20_i32 = arith.constant 20 : i32
      %728 = vector.broadcast %c20_i32 : i32 to vector<32x1xi32>
      %729 = arith.cmpi slt, %725, %728 : vector<32x1xi32>
      %c30_i32 = arith.constant 30 : i32
      %730 = vector.broadcast %c30_i32 : i32 to vector<32x1xi32>
      %731 = arith.cmpi slt, %725, %730 : vector<32x1xi32>
      %cst_384 = arith.constant 4.000000e-01 : f32
      %cst_385 = arith.constant 0.000000e+00 : f32
      %732 = vector.broadcast %cst_384 : f32 to vector<32x1xf32>
      %733 = vector.broadcast %cst_385 : f32 to vector<32x1xf32>
      %734 = arith.select %731, %732, %733 : vector<32x1xi1>, vector<32x1xf32>
      %cst_386 = arith.constant 4.000000e-01 : f32
      %735 = vector.broadcast %cst_386 : f32 to vector<32x1xf32>
      %736 = arith.select %729, %735, %734 : vector<32x1xi1>, vector<32x1xf32>
      %cst_387 = arith.constant 3.000000e-01 : f32
      %737 = vector.broadcast %cst_387 : f32 to vector<32x1xf32>
      %738 = arith.select %727, %737, %736 : vector<32x1xi1>, vector<32x1xf32>
      %739 = arith.mulf %724, %738 : vector<32x1xf32>
      %cst_388 = arith.constant dense<0.000000e+00> : vector<1xf32>
      %740 = vector.multi_reduction <add>, %739, %cst_388 [0] : vector<32x1xf32> to vector<1xf32>
      %741 = vector.shape_cast %740 : vector<1xf32> to vector<1x1xf32>
      %cst_389 = arith.constant 1.000000e+01 : f32
      %742 = vector.broadcast %cst_389 : f32 to vector<1x1xf32>
      %743 = arith.divf %741, %742 : vector<1x1xf32>
      %c0_390 = arith.constant 0 : index
      %c0_391 = arith.constant 0 : index
      %744 = vector.load %arg4[%c0_390, %c0_391] : memref<1x1xf32, #tpu.memory_space<vmem>>, vector<1x1xf32>
      tpu.vector_store %arg4[%c0_390, %c0_391], %743 {strides = array<i32>} : memref<1x1xf32, #tpu.memory_space<vmem>>, vector<1x1xf32>,
    } else {
    }
    return
  }
  func.func @transform_0(%arg0: i32, %arg1: i32) -> (i32, i32, i32, i32) {
    %c0_i32 = arith.constant 0 : i32
    %c0_i32_0 = arith.constant 0 : i32
    %c0_i32_1 = arith.constant 0 : i32
    return %arg0, %c0_i32, %arg1, %c0_i32_0 : i32, i32, i32, i32
  }
  func.func @transform_1(%arg0: i32, %arg1: i32) -> (i32, i32, i32, i32) {
    %c0_i32 = arith.constant 0 : i32
    %c0_i32_0 = arith.constant 0 : i32
    %c0_i32_1 = arith.constant 0 : i32
    return %arg0, %c0_i32, %arg1, %c0_i32_0 : i32, i32, i32, i32
  }
  func.func @transform_2(%arg0: i32, %arg1: i32) -> (i32, i32) {
    %c0_i32 = arith.constant 0 : i32
    %c0_i32_0 = arith.constant 0 : i32
    %c0_i32_1 = arith.constant 0 : i32
    return %c0_i32, %c0_i32_0 : i32, i32
  }
}

</mosaic_0001>

<bundles_post_ra>
// kernel: tpu_custom_call.1
= control target key start
LH: loop header
LB: loop body
LE: loop exit
PB: predicated region body
PF: predicated region fallthrough
CT: control target
= control target key end

     0   :  { %7 = vsyncpa [#allocation4], 0  ;;  %s2150_s0 = inlined_call_operand.hbm [shape: f32[2,3,8,128], index: 0, kind: input, shape index: {}]   ;;  %s2151_s1 = inlined_call_operand.hbm [shape: f32[2,3,8,128], index: 1, kind: input, shape index: {}]   ;;  %s2152_s2 = inlined_call_operand.hbm [shape: f32[1,1], index: 2, kind: output, shape index: {}]  }
   0x1   :  { %9 = vsyncpa [#allocation4 + $0x1], 0 }
   0x2   :  { %10 = vsyncpa [#allocation7], 0 }
   0x3   :  { %12 = vsyncpa [#allocation7 + $0x1], 0 }
   0x4   :  { %13 = vsyncpa [#allocation5], 0  ;;  %s1559_s9 = smov 0   ;;  %s1561_s10 = smov 0  }
   0x5   :  { %s1563_s11 = smov 0   ;;  %s1565_s12 = smov 0  }
   0x6   :  { %s1567_s13 = smov 0   ;;  %s1569_s14 = smov 0  }
   0x7 LB: > { %s1225_s15 = sadd.s32 4294967295, %s1533_s14   ;;  %s31_s16 = sadd.s32 1, %s1529_s13  ;;  %s1533_s14 = sphi %s1569_s14, %s19_s14   ;;  %s1529_s13 = sphi %s1567_s13, %s2171_s13   ;;  %s1525_s12 = sphi %s1565_s12, %s2170_s12   ;;  %s1521_s11 = sphi %s1563_s11, %s2169_s11   ;;  %s1517_s10 = sphi %s1561_s10, %s2168_s10   ;;  %s1513_s9 = sphi %s1559_s9, %s2167_s9  }
   0x8   : > { %p33_p0 = scmp.ge.s32.totalorder %s31_s16, 2  ;;  %s40_s17 = sadd.s32 1, %s1521_s11 }
   0x9   : > { %p47_p1 = scmp.ne.s32.totalorder %s1521_s11, %s1517_s10  ;;  %p48_p2 = scmp.eq.s32.totalorder %s1533_s14, 0 }
   0xa   : > { %s2173_s16 = smov (%p33_p0, %s31_s16), 0  ;;  %p53_p4 = scmp.ne.s32.totalorder %s1517_s10, %s1513_s9 }
   0xb   : > { %p49_p3 = por %p48_p2, %p47_p1  ;;  %s35_s18 = ssub.s32 %s1529_s13, %s2173_s16 }
   0xc   : > { %p54_p5 = scmp.eq.s32.totalorder %s1225_s15, 0  ;;  %p38_p6 = scmp.eq.s32.totalorder %s35_s18, 0 }
   0xd   : > { %p1323_p8 = scmp.lt.s32.totalorder %s1533_s14, 2  ;;  %s1609_s21 = sand.u32 1, %s1521_s11  }
   0xe   : > { %p1600_p7 = por %p54_p5, %p53_p4  ;;  %s1304_s22 = smul.u32 384, %s1529_s13 }
   0xf   : > { %s1606_s20 = scalar_select %p38_p6, %s1521_s11, %s40_s17  }
  0x10   : > { %s2154_s19 = scalar_select %p1600_p7, 1, 0 }
  0x11   : > { %s1303_s23 = smul.u32 24, %s1609_s21  ;;  %s1618_s26 = scalar_lea.hbm %s2150_s0, %s1304_s22 }
  0x12   : > { %p1620_p9 = pnand %p1323_p8, %p49_p3  ;;  %s127_s30 = scalar_lea.sflag [#allocation4], %s1609_s21 }
  0x13   : > { %s130_s28 = scalar_lea.vmem [#allocation3], %s1303_s23  ;;  %s1389_s3 = scalar_lea.hbm %s1618_s26, 384 }
  0x14   : > { %s138_s29 = sshll.u32 %s130_s28, 4  ;;  %p1390_p10 = scmp.ne.s32.totalorder %s1618_s26, %s1389_s3  ;;  %s1626_s29 = int_to_ptr.vmem [resolvable:$true] %s138_s29 }
  0x15   : > { %p1391_p11 = pneg %p1620_p9  ;;  %s1394_s6 = scalar_lea.hbm %s2150_s0, 768 }
  0x16   : > { %p1395_p0 = scmp.lt.u32.totalorder %s1618_s26, %s2150_s0  ;;  %p1396_p1 = scmp.lt.u32.totalorder %s1394_s6, %s1389_s3 }
  0x17   : > { %p1392_p12 = pnand %p1391_p11, %p1390_p10  ;;  %p1398_p3 = scmp.lt.u32.totalorder %s1389_s3, %s1618_s26 }
  0x18   : > { %p1397_p2 = por %p1396_p1, %p1395_p0 }
  0x19   : > { %p1393_p13 = pneg %p1392_p12 }
  0x1a   : > { %p1399_p4 = por %p1398_p3, %p1397_p2 }
  0x1c   : > { %p1400_p5 = pnand %p1399_p4, %p1393_p13 }
  0x1e   : > { %1403 = shalt.err (!%p1400_p5)
}
  0x1f   : > { %s1404_s9 = scalar_lea.vmem %s1626_s29, 384  ;;  %s1535_s17 = smov [#allocation3]  }
  0x20   : > { %p1405_p6 = scmp.ne.s32.totalorder %s1626_s29, %s1404_s9  ;;  %s1409_s18 = sshll.u32 %s1535_s17, 4  ;;  %s1410_s18 = int_to_ptr.vmem [resolvable:$false] %s1409_s18 }
  0x21   : > { %s1411_s24 = scalar_lea.vmem %s1410_s18, 768  ;;  %p1412_p12 = scmp.lt.s32.totalorder %s1626_s29, %s1410_s18 }
  0x22   : > { %p1407_p8 = pnand %p1405_p6, %p1391_p11  ;;  %p1413_p0 = scmp.lt.s32.totalorder %s1411_s24, %s1404_s9 }
  0x24   : > { %p1408_p10 = pneg %p1407_p8  ;;  %p1414_p1 = por %p1413_p0, %p1412_p12 }
  0x26   : > { %p1415_p2 = pnand %p1414_p1, %p1408_p10 }
  0x28   : > { %1418 = shalt.err (!%p1415_p2)
}
  0x29   : > { %s1536_s25 = smov 128   ;;  %s1537_s28 = smov 8  }
  0x2a   : > { %1319 = dma.hbm_to_vmem [thread:$0]  (!%p1620_p9), %s1618_s26, 384, %s1626_s29, %s127_s30, %s1536_s25, %s1536_s25, %s1537_s28  }
  0x2b   : > { %p1230_p13 = scmp.ge.s32.totalorder %s1533_s14, 1  ;;  %p168_p3 = scmp.lt.s32.totalorder %s1533_s14, 3 }
  0x2c   : > { %s1670_s6 = scalar_lea.hbm %s2151_s1, %s1304_s22  ;;  %s152_s7 = scalar_lea.vmem [#allocation6], %s1303_s23 }
  0x2d   : > { %p1661_p4 = pnand %p1230_p13, %p168_p3  ;;  %s160_s8 = sshll.u32 %s152_s7, 4  ;;  %s1674_s8 = int_to_ptr.vmem [resolvable:$true] %s160_s8 }
  0x2e   : > { %s149_s26 = scalar_lea.sflag [#allocation7], %s1609_s21  ;;  %s1419_s29 = scalar_lea.hbm %s1670_s6, 384 }
  0x2f   : > { %p1420_p5 = scmp.ne.s32.totalorder %s1670_s6, %s1419_s29  ;;  %s1424_s22 = scalar_lea.hbm %s2151_s1, 768 }
  0x30   : > { %p1425_p10 = scmp.lt.u32.totalorder %s1670_s6, %s2151_s1  ;;  %p1426_p12 = scmp.lt.u32.totalorder %s1424_s22, %s1419_s29 }
  0x31   : > { %p1422_p6 = pnand %p1420_p5, %p1391_p11  ;;  %p1428_p1 = scmp.lt.u32.totalorder %s1419_s29, %s1670_s6 }
  0x32   : > { %p1427_p0 = por %p1426_p12, %p1425_p10 }
  0x33   : > { %p1423_p8 = pneg %p1422_p6 }
  0x34   : > { %p1429_p2 = por %p1428_p1, %p1427_p0 }
  0x36   : > { %p1430_p13 = pnand %p1429_p2, %p1423_p8 }
  0x38   : > { %1433 = shalt.err (!%p1430_p13)
}
  0x39   : > { %s1434_s23 = scalar_lea.vmem %s1674_s8, 384  ;;  %s1538_s24 = smov [#allocation6]  }
  0x3a   : > { %p1435_p3 = scmp.ne.s32.totalorder %s1674_s8, %s1434_s23  ;;  %s1439_s4 = sshll.u32 %s1538_s24, 4  ;;  %s1440_s4 = int_to_ptr.vmem [resolvable:$false] %s1439_s4 }
  0x3b   : > { %s1441_s5 = scalar_lea.vmem %s1440_s4, 768  ;;  %p1442_p7 = scmp.lt.s32.totalorder %s1674_s8, %s1440_s4 }
  0x3c   : > { %p1437_p5 = pnand %p1435_p3, %p1391_p11  ;;  %p1443_p10 = scmp.lt.s32.totalorder %s1441_s5, %s1434_s23 }
  0x3e   : > { %p1438_p6 = pneg %p1437_p5  ;;  %p1444_p12 = por %p1443_p10, %p1442_p7 }
  0x40   : > { %p1445_p0 = pnand %p1444_p12, %p1438_p6 }
  0x42   : > { %1448 = shalt.err (!%p1445_p0)
}
  0x43   : > { %1322 = dma.hbm_to_vmem [thread:$0]  (!%p1620_p9), %s1670_s6, 384, %s1674_s8, %s149_s26, %s1536_s25, %s1536_s25, %s1537_s28  }
  0x44   : > { %172 = sbr.rel (%p1661_p4) target bundleno = 465 (0x1d1), region = 28  ;;  %s174_s7 = sand.u32 (!%p1661_p4), 1, %s1517_s10  }
  0x45   : > { %s1307_s29 = smul.u32 (!%p1661_p4), 24, %s174_s7  ;;  %s175_s30 = scalar_lea.sflag (!%p1661_p4), [#allocation4], %s174_s7 }
  0x46   : > { %p2157_p7 = scmp.ne.s32.totalorder (!%p1661_p4), %s2154_s19, 0 }
  0x47   : > { %s178_s9 = scalar_lea.vmem (!%p1661_p4), [#allocation3], %s1307_s29 }
  0x4b   : > { %1500 = dma.done.wait (%p2157_p7), %s175_s30, 384  }
  0x4c   : > { %1502 = vsyncadd (%p2157_p7), %s175_s30, 4294966912  ;;  %s184_s27 = scalar_lea.sflag [#allocation7], %s174_s7  ;;  %s1712_s21 = scalar_lea.vmem [#allocation6], %s1307_s29 }
  0x4d   : > { %1504 = dma.done.wait (%p2157_p7), %s184_s27, 384  }
  0x4e   : > { %1506 = vsyncadd (%p2157_p7), %s184_s27, 4294966912  ;;  %p208_p9 = scmp.eq.s32.totalorder %s1525_s12, 0  ;;  %p212_p11 = scmp.eq.s32.totalorder %s1525_s12, 1 }
  0x4f   : > { %v1539_v0 = vmov (%p208_p9), 0.0  }
  0x50   : > { %216 = sbr.rel (!%p208_p9) target bundleno = 87 (0x57), region = 40  ;;  %217 = vst [vmem:[#allocation2] sm:$0xff] (%p208_p9), %v1539_v0  ;;  %218 = vst [vmem:[#allocation2 + $0x8] sm:$0xff] (%p208_p9), %v1539_v0 }
  0x51   : > { %219 = vst [vmem:[#allocation2 + $0x10] sm:$0xff] (%p208_p9), %v1539_v0  ;;  %220 = vst [vmem:[#allocation2 + $0x18] sm:$0xff] (%p208_p9), %v1539_v0 }
  0x52   : > { %221 = vst [vmem:[#allocation2 + $0x20] sm:$0xff] (%p208_p9), %v1539_v0  ;;  %222 = vst [vmem:[#allocation2 + $0x28] sm:$0xff] (%p208_p9), %v1539_v0 }
  0x53   : > { %223 = vst [vmem:[#allocation2 + $0x30] sm:$0xff] (%p208_p9), %v1539_v0  ;;  %224 = vst [vmem:[#allocation2 + $0x38] sm:$0xff] (%p208_p9), %v1539_v0 }
  0x57 PF: > { %v225_v1 = vld [vmem:[%s178_s9] sm:$0xff]  ;;  %v1233_v2 = vld [vmem:[%s178_s9 + $0x8] sm:$0xff]  ;;  %v1234_v3 = vld [vmem:[%s178_s9 + $0x10] sm:$0xff]  ;;  %v1540_v32 = vmov 0.0  }
  0x58   : > { %v230_v4 = vmax.f32 %v225_v1, 0.0  ;;  %v232_v5 = vmax.f32 %v1233_v2, 0.0  ;;  %v234_v6 = vmax.f32 %v1234_v3, 0.0  ;;  %v643_v16 = vld [vmem:[%s1712_s21] sm:$0xff]  ;;  %v1265_v17 = vld [vmem:[%s1712_s21 + $0x8] sm:$0xff]  ;;  %v1266_v24 = vld [vmem:[%s1712_s21 + $0x10] sm:$0xff] }
  0x59   : > { %v648_v21 = vmax.f32 %v643_v16, 0.0  ;;  %v650_v22 = vmax.f32 %v1265_v17, 0.0  ;;  %v652_v31 = vmax.f32 %v1266_v24, 0.0  ;;  %v526_v17 = vld [vmem:[#allocation2 + $0x14] sm:$0x1] }
  0x5a   : > { %v1720_v7 = vmin.f32 %v230_v4, 1.0  ;;  %v1722_v8 = vmin.f32 %v232_v5, 1.0  ;;  %v1724_v9 = vmin.f32 %v234_v6, 1.0  ;;  %v562_v24 = vld [vmem:[#allocation2 + $0x17] sm:$0x1] }
  0x5b   : > { %v1763_v29 = vmin.f32 %v648_v21, 1.0  ;;  %v1765_v30 = vmin.f32 %v650_v22, 1.0  ;;  %v1778_v41 = vmin.f32 %v652_v31, 1.0 }
  0x5c   : > { %v236_v10 = vmax.f32 %v1722_v8, %v1724_v9  ;;  %v238_v11 = vmin.f32 %v1722_v8, %v1724_v9  ;;  %v243_v25 = vsub.f32 %v1722_v8, %v1724_v9  ;;  %v249_v26 = vsub.f32 %v1724_v9, %v1720_v7 }
  0x5d   : > { %v252_v27 = vsub.f32 %v1720_v7, %v1722_v8 }
  0x5e   : > { %v1731_v12 = vmax.f32 %v1720_v7, %v236_v10  ;;  %v239_v13 = vmin.f32 %v1720_v7, %v238_v11 }
  0x60   : > { %v1735_v14 = vsub.f32 %v1731_v12, %v239_v13  ;;  %vm266_vm0 = vcmp.ne.f32.partialorder %v1731_v12, 0.0  ;;  %v519_v15 = vmul.f32 10.0, %v1731_v12  ;;  %vm255_vm2 = vcmp.eq.f32.partialorder %v1731_v12, %v1720_v7 }
  0x61   : > { %v267_v18 = vsel %vm266_vm0, %v1731_v12, 1.0  ;;  %vm257_vm3 = vcmp.eq.f32.partialorder %v1731_v12, %v1722_v8  ;;  %vm259_vm4 = vcmp.eq.f32.partialorder %v1731_v12, %v1724_v9 }
  0x62   : > { %vm241_vm1 = vcmp.ne.f32.partialorder %v1735_v14, 0.0  ;;  %1381 = vrcp.f32 %v267_v18  ;;  %v520_v20 = vfloor.f32 %v519_v15  ;;  %v538_v18 = vld [vmem:[#allocation2 + $0x15] sm:$0x1] }
  0x63   : > { %v242_v19 = vsel %vm241_vm1, %v1735_v14, 1.0  ;;  %vm1793_vm13 = vmand %vm255_vm2, %vm241_vm1 }
  0x64   : > { %1383 = vrcp.f32 %v242_v19  ;;  %v521_v23 = vmax.f32 %v520_v20, 0.0  ;;  %vm258_vm14 = vmand %vm257_vm3, %vm241_vm1 }
  0x65   : > { %vm1807_vm15 = vmand %vm259_vm4, %vm241_vm1 }
  0x66   : > { %v1759_v28 = vmin.f32 %v521_v23, 9.0  ;;  %v550_v23 = vld [vmem:[#allocation2 + $0x16] sm:$0x1] }
  0x68   : > { %vm523_vm5 = vcmp.eq.f32.partialorder %v1759_v28, 0.0  ;;  %vm535_vm6 = vcmp.eq.f32.partialorder %v1759_v28, 1.0  ;;  %vm547_vm7 = vcmp.eq.f32.partialorder %v1759_v28, 2.0  ;;  %vm559_vm8 = vcmp.eq.f32.partialorder %v1759_v28, 3.0 }
  0x69   : > { %v1255_v33 = vsel %vm523_vm5, 1.0, %v1540_v32  ;;  %v1256_v34 = vsel %vm535_vm6, 1.0, %v1540_v32  ;;  %v1257_v35 = vsel %vm547_vm7, 1.0, %v1540_v32  ;;  %v1258_v36 = vsel %vm559_vm8, 1.0, %v1540_v32 }
  0x6a   : > { %v527_v37 = vrot.slane %v1255_v33, 4  ;;  %v539_v38 = vrot.slane %v1256_v34, 4  ;;  %v551_v39 = vrot.slane %v1257_v35, 4  ;;  %v563_v40 = vrot.slane %v1258_v36, 4 }
  0x6b   : > { %vm571_vm9 = vcmp.eq.f32.partialorder %v1759_v28, 4.0  ;;  %vm583_vm10 = vcmp.eq.f32.partialorder %v1759_v28, 5.0  ;;  %vm595_vm11 = vcmp.eq.f32.partialorder %v1759_v28, 6.0 }
  0x6c   : > { %v1382_v42 = vpop.eup %1381  ;;  %v528_v43 = vadd.f32 %v1255_v33, %v527_v37  ;;  %v540_v44 = vadd.f32 %v1256_v34, %v539_v38  ;;  %v552_v45 = vadd.f32 %v1257_v35, %v551_v39  ;;  %v564_v46 = vadd.f32 %v1258_v36, %v563_v40 }
  0x6d   : > { %v269_v48 = vmul.f32 %v1382_v42, %v1735_v14  ;;  %v1259_v49 = vsel %vm571_vm9, 1.0, %v1540_v32  ;;  %v1260_v50 = vsel %vm583_vm10, 1.0, %v1540_v32  ;;  %v1784_v51 = vsel %vm595_vm11, 1.0, %v1540_v32 }
  0x6e   : > { %v1384_v47 = vpop.eup %1383  ;;  %v529_v55 = vrot.slane %v528_v43, 2  ;;  %v541_v57 = vrot.slane %v540_v44, 2  ;;  %v553_v58 = vrot.slane %v552_v45, 2  ;;  %v565_v59 = vrot.slane %v564_v46, 2 }
  0x6f   : > { %v245_v52 = vmul.f32 %v1384_v47, %v243_v25  ;;  %v250_v53 = vmul.f32 %v1384_v47, %v249_v26  ;;  %v253_v54 = vmul.f32 %v1384_v47, %v252_v27  ;;  %v270_v56 = vsel %vm266_vm0, %v269_v48, 0.0 }
  0x70   : > { %v395_v0 = vmul.f32 10.0, %v270_v56  ;;  %v530_v1 = vadd.f32 %v529_v55, %v528_v43  ;;  %v542_v2 = vadd.f32 %v541_v57, %v540_v44  ;;  %v554_v3 = vadd.f32 %v553_v58, %v552_v45 }
  0x71   : > { %vm246_vm12 = vcmp.lt.f32.partialorder %v245_v52, 0.0  ;;  %v247_v60 = vadd.f32 6.0, %v245_v52  ;;  %v251_v61 = vadd.f32 2.0, %v250_v53  ;;  %v254_v62 = vadd.f32 4.0, %v253_v54 }
  0x72   : > { %v566_v6 = vadd.f32 %v565_v59, %v564_v46  ;;  %v575_v7 = vrot.slane %v1259_v49, 4  ;;  %v587_v10 = vrot.slane %v1260_v50, 4  ;;  %v396_v11 = vfloor.f32 %v395_v0 }
  0x73   : > { %v248_v4 = vsel %vm246_vm12, %v247_v60, %v245_v52  ;;  %v531_v13 = vrot.slane %v530_v1, 1  ;;  %v543_v15 = vrot.slane %v542_v2, 1  ;;  %v555_v14 = vrot.slane %v554_v3, 1 }
  0x74   : > { %v261_v8 = vsel %vm1793_vm13, %v248_v4, 0.0  ;;  %v567_v19 = vrot.slane %v566_v6, 1  ;;  %v576_v20 = vadd.f32 %v1259_v49, %v575_v7  ;;  %v397_v12 = vmax.f32 %v396_v11, 0.0 }
  0x75   : > { %v262_v16 = vsel %vm258_vm14, %v251_v61, %v261_v8  ;;  %v532_v21 = vadd.f32 %v531_v13, %v530_v1  ;;  %v544_v22 = vadd.f32 %v543_v15, %v542_v2  ;;  %v556_v26 = vadd.f32 %v555_v14, %v554_v3 }
  0x76   : > { %v263_v9 = vsel %vm1807_vm15, %v254_v62, %v262_v16  ;;  %v568_v27 = vadd.f32 %v567_v19, %v566_v6  ;;  %v577_v31 = vrot.slane %v576_v20, 2  ;;  %v1815_v33 = vmin.f32 %v397_v12, 9.0 }
  0x77   : > { %v265_v25 = vmul.f32 0.16666667, %v263_v9  ;;  %v533_v34 = vadd.f32 %v532_v21, %v526_v17  ;;  %v545_v35 = vadd.f32 %v544_v22, %v538_v18  ;;  %v1817_v36 = vadd.f32 %v1260_v50, %v587_v10 }
  0x78   : > { %v557_v38 = vadd.f32 %v556_v26, %v550_v23  ;;  %v569_v39 = vadd.f32 %v568_v27, %v562_v24  ;;  %v1819_v40 = vadd.f32 %v577_v31, %v576_v20  ;;  %vm399_vm0 = vcmp.eq.f32.partialorder %v1815_v33, 0.0 }
  0x79   : > { %v271_v37 = vmul.f32 10.0, %v265_v25  ;;  %vm411_vm1 = vcmp.eq.f32.partialorder %v1815_v33, 1.0  ;;  %vm423_vm2 = vcmp.eq.f32.partialorder %v1815_v33, 2.0  ;;  %vm435_vm3 = vcmp.eq.f32.partialorder %v1815_v33, 3.0  ;;  %534 = vst [vmem:[#allocation2 + $0x14] sm:$0x1] %v533_v34 }
  0x7a   : > { %546 = vst [vmem:[#allocation2 + $0x15] sm:$0x1] %v545_v35  ;;  %v1245_v43 = vsel %vm399_vm0, 1.0, %v1540_v32  ;;  %v1246_v44 = vsel %vm411_vm1, 1.0, %v1540_v32  ;;  %v1247_v45 = vsel %vm423_vm2, 1.0, %v1540_v32  ;;  %v1248_v49 = vsel %vm435_vm3, 1.0, %v1540_v32 }
  0x7b   : > { %v272_v42 = vfloor.f32 %v271_v37  ;;  %558 = vst [vmem:[#allocation2 + $0x16] sm:$0x1] %v557_v38  ;;  %570 = vst [vmem:[#allocation2 + $0x17] sm:$0x1] %v569_v39  ;;  %v403_v46 = vrot.slane %v1245_v43, 4  ;;  %v415_v47 = vrot.slane %v1246_v44, 4 }
  0x7c   : > { %v427_v48 = vrot.slane %v1247_v45, 4  ;;  %v439_v52 = vrot.slane %v1248_v49, 4  ;;  %vm447_vm4 = vcmp.eq.f32.partialorder %v1815_v33, 4.0  ;;  %vm459_vm5 = vcmp.eq.f32.partialorder %v1815_v33, 5.0  ;;  %v278_v34 = vld [vmem:[#allocation2] sm:$0x1] }
  0x7d   : > { %v273_v50 = vmax.f32 %v272_v42, 0.0  ;;  %v1831_v53 = vadd.f32 %v1245_v43, %v403_v46  ;;  %v1833_v54 = vadd.f32 %v1246_v44, %v415_v47  ;;  %v1838_v56 = vsel %vm447_vm4, 1.0, %v1540_v32  ;;  %v290_v35 = vld [vmem:[#allocation2 + $0x1] sm:$0x1] }
  0x7e   : > { %v1835_v55 = vadd.f32 %v1247_v45, %v427_v48  ;;  %v1842_v58 = vadd.f32 %v1248_v49, %v439_v52  ;;  %v451_v59 = vrot.slane %v1838_v56, 4  ;;  %v1846_v60 = vsel %vm459_vm5, 1.0, %v1540_v32  ;;  %v302_v45 = vld [vmem:[#allocation2 + $0x2] sm:$0x1]  ;;  %v314_v48 = vld [vmem:[#allocation2 + $0x3] sm:$0x1] }
  0x7f   : > { %v1840_v57 = vmin.f32 %v273_v50, 9.0  ;;  %v405_v61 = vrot.slane %v1831_v53, 2  ;;  %v417_v62 = vrot.slane %v1833_v54, 2  ;;  %v463_v0 = vrot.slane %v1846_v60, 4 }
  0x80   : > { %v429_v63 = vrot.slane %v1835_v55, 2  ;;  %vm471_vm0 = vcmp.eq.f32.partialorder %v1815_v33, 6.0  ;;  %vm483_vm1 = vcmp.eq.f32.partialorder %v1815_v33, 7.0  ;;  %vm607_vm2 = vcmp.eq.f32.partialorder %v1759_v28, 7.0 }
  0x81   : > { %vm275_vm6 = vcmp.eq.f32.partialorder %v1840_v57, 0.0  ;;  %vm287_vm7 = vcmp.eq.f32.partialorder %v1840_v57, 1.0  ;;  %vm299_vm8 = vcmp.eq.f32.partialorder %v1840_v57, 2.0  ;;  %vm311_vm9 = vcmp.eq.f32.partialorder %v1840_v57, 3.0 }
  0x82   : > { %v1235_v1 = vsel %vm275_vm6, 1.0, %v1540_v32  ;;  %v1236_v2 = vsel %vm287_vm7, 1.0, %v1540_v32  ;;  %v1237_v3 = vsel %vm299_vm8, 1.0, %v1540_v32  ;;  %v1238_v4 = vsel %vm311_vm9, 1.0, %v1540_v32 }
  0x83   : > { %v279_v5 = vrot.slane %v1235_v1, 4  ;;  %v291_v6 = vrot.slane %v1236_v2, 4  ;;  %v303_v7 = vrot.slane %v1237_v3, 4  ;;  %v315_v10 = vrot.slane %v1238_v4, 4 }
  0x84   : > { %vm323_vm10 = vcmp.eq.f32.partialorder %v1840_v57, 4.0  ;;  %vm335_vm11 = vcmp.eq.f32.partialorder %v1840_v57, 5.0  ;;  %vm347_vm12 = vcmp.eq.f32.partialorder %v1840_v57, 6.0  ;;  %vm359_vm13 = vcmp.eq.f32.partialorder %v1840_v57, 7.0 }
  0x85   : > { %v280_v8 = vadd.f32 %v1235_v1, %v279_v5  ;;  %v292_v11 = vadd.f32 %v1236_v2, %v291_v6  ;;  %v304_v13 = vadd.f32 %v1237_v3, %v303_v7  ;;  %v316_v15 = vadd.f32 %v1238_v4, %v315_v10 }
  0x86   : > { %v1239_v16 = vsel %vm323_vm10, 1.0, %v1540_v32  ;;  %v1240_v17 = vsel %vm335_vm11, 1.0, %v1540_v32  ;;  %v1241_v18 = vsel %vm347_vm12, 1.0, %v1540_v32  ;;  %v1242_v14 = vsel %vm359_vm13, 1.0, %v1540_v32 }
  0x87   : > { %v281_v19 = vrot.slane %v280_v8, 2  ;;  %v293_v20 = vrot.slane %v292_v11, 2  ;;  %v305_v9 = vrot.slane %v304_v13, 2  ;;  %v317_v12 = vrot.slane %v316_v15, 2 }
  0x88   : > { %v327_v21 = vrot.slane %v1239_v16, 4  ;;  %v339_v22 = vrot.slane %v1240_v17, 4  ;;  %v351_v23 = vrot.slane %v1241_v18, 4  ;;  %v363_v24 = vrot.slane %v1242_v14, 4 }
  0x89   : > { %v282_v25 = vadd.f32 %v281_v19, %v280_v8  ;;  %v294_v26 = vadd.f32 %v293_v20, %v292_v11  ;;  %v306_v27 = vadd.f32 %v305_v9, %v304_v13  ;;  %v318_v31 = vadd.f32 %v317_v12, %v316_v15  ;;  %v350_v12 = vld [vmem:[#allocation2 + $0x6] sm:$0x1] }
  0x8a   : > { %v328_v37 = vadd.f32 %v1239_v16, %v327_v21  ;;  %v340_v38 = vadd.f32 %v1240_v17, %v339_v22  ;;  %v352_v39 = vadd.f32 %v1241_v18, %v351_v23  ;;  %v364_v42 = vadd.f32 %v1242_v14, %v363_v24  ;;  %v326_v17 = vld [vmem:[#allocation2 + $0x4] sm:$0x1]  ;;  %v338_v14 = vld [vmem:[#allocation2 + $0x5] sm:$0x1]  ;;  %v362_v21 = vld [vmem:[#allocation2 + $0x7] sm:$0x1] }
  0x8b   : > { %v283_v43 = vrot.slane %v282_v25, 1  ;;  %v295_v44 = vrot.slane %v294_v26, 1  ;;  %v307_v46 = vrot.slane %v306_v27, 1  ;;  %v319_v47 = vrot.slane %v318_v31, 1 }
  0x8c   : > { %v329_v49 = vrot.slane %v328_v37, 2  ;;  %v341_v50 = vrot.slane %v340_v38, 2  ;;  %v353_v52 = vrot.slane %v352_v39, 2  ;;  %v365_v1 = vrot.slane %v364_v42, 2 }
  0x8d   : > { %v284_v2 = vadd.f32 %v283_v43, %v282_v25  ;;  %v296_v3 = vadd.f32 %v295_v44, %v294_v26  ;;  %v308_v4 = vadd.f32 %v307_v46, %v306_v27  ;;  %v320_v5 = vadd.f32 %v319_v47, %v318_v31  ;;  %v402_v43 = vld [vmem:[#allocation2 + $0xa] sm:$0x1] }
  0x8e   : > { %v330_v6 = vadd.f32 %v329_v49, %v328_v37  ;;  %v342_v7 = vadd.f32 %v341_v50, %v340_v38  ;;  %v354_v10 = vadd.f32 %v353_v52, %v352_v39  ;;  %v366_v8 = vadd.f32 %v365_v1, %v364_v42 }
  0x8f   : > { %v285_v11 = vadd.f32 %v284_v2, %v278_v34  ;;  %v297_v13 = vadd.f32 %v296_v3, %v290_v35  ;;  %v309_v15 = vadd.f32 %v308_v4, %v302_v45  ;;  %v321_v16 = vadd.f32 %v320_v5, %v314_v48 }
  0x90   : > { %v331_v18 = vrot.slane %v330_v6, 1  ;;  %v343_v19 = vrot.slane %v342_v7, 1  ;;  %v355_v20 = vrot.slane %v354_v10, 1  ;;  %v367_v9 = vrot.slane %v366_v8, 1 }
  0x91   : > { %286 = vst [vmem:[#allocation2] sm:$0x1] %v285_v11  ;;  %298 = vst [vmem:[#allocation2 + $0x1] sm:$0x1] %v297_v13  ;;  %vm371_vm14 = vcmp.eq.f32.partialorder %v1840_v57, 8.0  ;;  %vm383_vm15 = vcmp.eq.f32.partialorder %v1840_v57, 9.0  ;;  %v406_v22 = vadd.f32 %v405_v61, %v1831_v53  ;;  %v418_v23 = vadd.f32 %v417_v62, %v1833_v54 }
  0x92   : > { %310 = vst [vmem:[#allocation2 + $0x2] sm:$0x1] %v309_v15  ;;  %322 = vst [vmem:[#allocation2 + $0x3] sm:$0x1] %v321_v16  ;;  %v332_v24 = vadd.f32 %v331_v18, %v330_v6  ;;  %v344_v25 = vadd.f32 %v343_v19, %v342_v7  ;;  %v356_v26 = vadd.f32 %v355_v20, %v354_v10  ;;  %v1243_v31 = vsel %vm371_vm14, 1.0, %v1540_v32 }
  0x93   : > { %v368_v27 = vadd.f32 %v367_v9, %v366_v8  ;;  %v1244_v34 = vsel %vm383_vm15, 1.0, %v1540_v32  ;;  %v407_v35 = vrot.slane %v406_v22, 1  ;;  %v419_v37 = vrot.slane %v418_v23, 1  ;;  %v414_v53 = vld [vmem:[#allocation2 + $0xb] sm:$0x1] }
  0x94   : > { %v333_v38 = vadd.f32 %v332_v24, %v326_v17  ;;  %v345_v57 = vadd.f32 %v344_v25, %v338_v14  ;;  %v357_v39 = vadd.f32 %v356_v26, %v350_v12  ;;  %v375_v61 = vrot.slane %v1243_v31, 4  ;;  %v426_v6 = vld [vmem:[#allocation2 + $0xc] sm:$0x1]  ;;  %v450_v16 = vld [vmem:[#allocation2 + $0xe] sm:$0x1] }
  0x95   : > { %v369_v42 = vadd.f32 %v368_v27, %v362_v21  ;;  %v387_v44 = vrot.slane %v1244_v34, 4  ;;  %v408_v45 = vadd.f32 %v407_v35, %v406_v22  ;;  %v420_v54 = vadd.f32 %v419_v37, %v418_v23  ;;  %v462_v20 = vld [vmem:[#allocation2 + $0xf] sm:$0x1]  ;;  %v374_v21 = vld [vmem:[#allocation2 + $0x8] sm:$0x1] }
  0x96   : > { %334 = vst [vmem:[#allocation2 + $0x4] sm:$0x1] %v333_v38  ;;  %346 = vst [vmem:[#allocation2 + $0x5] sm:$0x1] %v345_v57  ;;  %v430_v62 = vadd.f32 %v429_v63, %v1835_v55  ;;  %v441_v46 = vrot.slane %v1842_v58, 2  ;;  %v452_v47 = vadd.f32 %v1838_v56, %v451_v59  ;;  %v464_v48 = vadd.f32 %v1846_v60, %v463_v0 }
  0x97   : > { %358 = vst [vmem:[#allocation2 + $0x6] sm:$0x1] %v357_v39  ;;  %370 = vst [vmem:[#allocation2 + $0x7] sm:$0x1] %v369_v42  ;;  %v376_v49 = vadd.f32 %v1243_v31, %v375_v61  ;;  %v388_v50 = vadd.f32 %v1244_v34, %v387_v44  ;;  %v409_v52 = vadd.f32 %v408_v45, %v402_v43  ;;  %v1251_v8 = vsel %vm471_vm0, 1.0, %v1540_v32 }
  0x98   : > { %v421_v1 = vadd.f32 %v420_v54, %v414_v53  ;;  %v431_v2 = vrot.slane %v430_v62, 1  ;;  %v442_v3 = vadd.f32 %v441_v46, %v1842_v58  ;;  %v453_v4 = vrot.slane %v452_v47, 2  ;;  %v438_v58 = vld [vmem:[#allocation2 + $0xd] sm:$0x1]  ;;  %v386_v22 = vld [vmem:[#allocation2 + $0x9] sm:$0x1] }
  0x99   : > { %v465_v5 = vrot.slane %v464_v48, 2  ;;  %v377_v55 = vrot.slane %v376_v49, 2  ;;  %v389_v63 = vrot.slane %v388_v50, 2  ;;  %410 = vst [vmem:[#allocation2 + $0xa] sm:$0x1] %v409_v52  ;;  %v1252_v11 = vsel %vm483_vm1, 1.0, %v1540_v32 }
  0x9a   : > { %422 = vst [vmem:[#allocation2 + $0xb] sm:$0x1] %v421_v1  ;;  %v432_v56 = vadd.f32 %v431_v2, %v430_v62  ;;  %v443_v59 = vrot.slane %v442_v3, 1  ;;  %v454_v60 = vadd.f32 %v453_v4, %v452_v47  ;;  %v475_v9 = vrot.slane %v1251_v8, 4  ;;  %v574_v47 = vld [vmem:[#allocation2 + $0x18] sm:$0x1] }
  0x9b   : > { %v466_v0 = vadd.f32 %v465_v5, %v464_v48  ;;  %v378_v7 = vadd.f32 %v377_v55, %v376_v49  ;;  %v390_v10 = vadd.f32 %v389_v63, %v388_v50  ;;  %v487_v12 = vrot.slane %v1252_v11, 4  ;;  %v474_v1 = vld [vmem:[#allocation2 + $0x10] sm:$0x1]  ;;  %v486_v55 = vld [vmem:[#allocation2 + $0x11] sm:$0x1] }
  0x9c   : > { %v433_v13 = vadd.f32 %v432_v56, %v426_v6  ;;  %v444_v15 = vadd.f32 %v443_v59, %v442_v3  ;;  %v455_v17 = vrot.slane %v454_v60, 1  ;;  %vm495_vm3 = vcmp.eq.f32.partialorder %v1815_v33, 8.0 }
  0x9d   : > { %v467_v18 = vrot.slane %v466_v0, 1  ;;  %v379_v14 = vrot.slane %v378_v7, 1  ;;  %v391_v19 = vrot.slane %v390_v10, 1  ;;  %v476_v31 = vadd.f32 %v1251_v8, %v475_v9 }
  0x9e   : > { %434 = vst [vmem:[#allocation2 + $0xc] sm:$0x1] %v433_v13  ;;  %v445_v23 = vadd.f32 %v444_v15, %v438_v58  ;;  %v456_v24 = vadd.f32 %v455_v17, %v454_v60  ;;  %v488_v34 = vadd.f32 %v1252_v11, %v487_v12  ;;  %v1253_v38 = vsel %vm495_vm3, 1.0, %v1540_v32 }
  0x9f   : > { %v468_v25 = vadd.f32 %v467_v18, %v466_v0  ;;  %v380_v26 = vadd.f32 %v379_v14, %v378_v7  ;;  %v392_v27 = vadd.f32 %v391_v19, %v390_v10  ;;  %vm507_vm4 = vcmp.eq.f32.partialorder %v1815_v33, 9.0  ;;  %v586_v7 = vld [vmem:[#allocation2 + $0x19] sm:$0x1]  ;;  %v498_v19 = vld [vmem:[#allocation2 + $0x12] sm:$0x1] }
  0xa0   : > { %446 = vst [vmem:[#allocation2 + $0xd] sm:$0x1] %v445_v23  ;;  %v457_v35 = vadd.f32 %v456_v24, %v450_v16  ;;  %v477_v42 = vrot.slane %v476_v31, 2  ;;  %v489_v43 = vrot.slane %v488_v34, 2  ;;  %v499_v53 = vrot.slane %v1253_v38, 4 }
  0xa1   : > { %v469_v37 = vadd.f32 %v468_v25, %v462_v20  ;;  %v381_v57 = vadd.f32 %v380_v26, %v374_v21  ;;  %v393_v39 = vadd.f32 %v392_v27, %v386_v22  ;;  %v1254_v61 = vsel %vm507_vm4, 1.0, %v1540_v32  ;;  %v510_v22 = vld [vmem:[#allocation2 + $0x13] sm:$0x1]  ;;  %v598_v23 = vld [vmem:[#allocation2 + $0x1a] sm:$0x1] }
  0xa2   : > { %458 = vst [vmem:[#allocation2 + $0xe] sm:$0x1] %v457_v35  ;;  %v579_v44 = vrot.slane %v1819_v40, 1  ;;  %v589_v45 = vrot.slane %v1817_v36, 2  ;;  %v478_v54 = vadd.f32 %v477_v42, %v476_v31  ;;  %v490_v62 = vadd.f32 %v489_v43, %v488_v34  ;;  %v610_v43 = vld [vmem:[#allocation2 + $0x1b] sm:$0x1] }
  0xa3   : > { %470 = vst [vmem:[#allocation2 + $0xf] sm:$0x1] %v469_v37  ;;  %382 = vst [vmem:[#allocation2 + $0x8] sm:$0x1] %v381_v57  ;;  %v511_v46 = vrot.slane %v1254_v61, 4  ;;  %v599_v33 = vrot.slane %v1784_v51, 4  ;;  %v500_v48 = vadd.f32 %v1253_v38, %v499_v53  ;;  %v654_v26 = vmax.f32 %v1765_v30, %v1778_v41 }
  0xa4   : > { %394 = vst [vmem:[#allocation2 + $0x9] sm:$0x1] %v393_v39  ;;  %v580_v49 = vadd.f32 %v579_v44, %v1819_v40  ;;  %v590_v50 = vadd.f32 %v589_v45, %v1817_v36  ;;  %v1262_v52 = vsel %vm607_vm2, 1.0, %v1540_v32  ;;  %v479_v2 = vrot.slane %v478_v54, 1 }
  0xa5   : > { %v491_v3 = vrot.slane %v490_v62, 1  ;;  %v512_v4 = vadd.f32 %v1254_v61, %v511_v46  ;;  %v600_v5 = vadd.f32 %v1784_v51, %v599_v33  ;;  %v501_v63 = vrot.slane %v500_v48, 2 }
  0xa6   : > { %v581_v6 = vadd.f32 %v580_v49, %v574_v47  ;;  %v591_v56 = vrot.slane %v590_v50, 1  ;;  %v611_v59 = vrot.slane %v1262_v52, 4  ;;  %v480_v60 = vadd.f32 %v479_v2, %v478_v54 }
  0xa7   : > { %v492_v0 = vadd.f32 %v491_v3, %v490_v62  ;;  %v513_v40 = vrot.slane %v512_v4, 2  ;;  %v601_v36 = vrot.slane %v600_v5, 2  ;;  %v502_v10 = vadd.f32 %v501_v63, %v500_v48 }
  0xa8   : > { %582 = vst [vmem:[#allocation2 + $0x18] sm:$0x1] %v581_v6  ;;  %v592_v58 = vadd.f32 %v591_v56, %v590_v50  ;;  %v612_v8 = vadd.f32 %v1262_v52, %v611_v59  ;;  %vm619_vm5 = vcmp.eq.f32.partialorder %v1759_v28, 8.0  ;;  %v481_v11 = vadd.f32 %v480_v60, %v474_v1  ;;  %v622_v52 = vld [vmem:[#allocation2 + $0x1c] sm:$0x1] }
  0xa9   : > { %v493_v13 = vadd.f32 %v492_v0, %v486_v55  ;;  %v514_v15 = vadd.f32 %v513_v40, %v512_v4  ;;  %v602_v51 = vadd.f32 %v601_v36, %v600_v5  ;;  %v503_v16 = vrot.slane %v502_v10, 1  ;;  %v634_v5 = vld [vmem:[#allocation2 + $0x1d] sm:$0x1] }
  0xaa   : > { %v593_v17 = vadd.f32 %v592_v58, %v586_v7  ;;  %v613_v18 = vrot.slane %v612_v8, 2  ;;  %v1263_v14 = vsel %vm619_vm5, 1.0, %v1540_v32  ;;  %482 = vst [vmem:[#allocation2 + $0x10] sm:$0x1] %v481_v11  ;;  %vm631_vm6 = vcmp.eq.f32.partialorder %v1759_v28, 9.0 }
  0xab   : > { %494 = vst [vmem:[#allocation2 + $0x11] sm:$0x1] %v493_v13  ;;  %v515_v20 = vrot.slane %v514_v15, 1  ;;  %v603_v9 = vrot.slane %v602_v51, 1  ;;  %v623_v12 = vrot.slane %v1263_v14, 4  ;;  %v504_v21 = vadd.f32 %v503_v16, %v502_v10 }
  0xac   : > { %594 = vst [vmem:[#allocation2 + $0x19] sm:$0x1] %v593_v17  ;;  %v614_v24 = vadd.f32 %v613_v18, %v612_v8  ;;  %v1264_v25 = vsel %vm631_vm6, 1.0, %v1540_v32  ;;  %v1914_v57 = vmax.f32 %v1763_v29, %v654_v26  ;;  %v656_v28 = vmin.f32 %v1765_v30, %v1778_v41 }
  0xad   : > { %v516_v27 = vadd.f32 %v515_v20, %v514_v15  ;;  %v604_v31 = vadd.f32 %v603_v9, %v602_v51  ;;  %v624_v34 = vadd.f32 %v1263_v14, %v623_v12  ;;  %v635_v35 = vrot.slane %v1264_v25, 4 }
  0xae   : > { %v505_v37 = vadd.f32 %v504_v21, %v498_v19  ;;  %v615_v38 = vrot.slane %v614_v24, 1  ;;  %v657_v45 = vmin.f32 %v1763_v29, %v656_v28  ;;  %vm683_vm7 = vcmp.ne.f32.partialorder %v1914_v57, 0.0 }
  0xaf   : > { %v517_v39 = vadd.f32 %v516_v27, %v510_v22  ;;  %v605_v42 = vadd.f32 %v604_v31, %v598_v23  ;;  %v625_v53 = vrot.slane %v624_v34, 2  ;;  %v636_v61 = vadd.f32 %v1264_v25, %v635_v35 }
  0xb0   : > { %506 = vst [vmem:[#allocation2 + $0x12] sm:$0x1] %v505_v37  ;;  %v616_v44 = vadd.f32 %v615_v38, %v614_v24  ;;  %v1920_v47 = vsub.f32 %v1914_v57, %v657_v45  ;;  %v684_v49 = vsel %vm683_vm7, %v1914_v57, 1.0  ;;  %v936_v50 = vmul.f32 10.0, %v1914_v57 }
  0xb1   : > { %518 = vst [vmem:[#allocation2 + $0x13] sm:$0x1] %v517_v39  ;;  %606 = vst [vmem:[#allocation2 + $0x1a] sm:$0x1] %v605_v42  ;;  %v626_v54 = vadd.f32 %v625_v53, %v624_v34  ;;  %v637_v62 = vrot.slane %v636_v61, 2  ;;  %1385 = vrcp.f32 %v684_v49  ;;  %v661_v60 = vsub.f32 %v1765_v30, %v1778_v41 }
  0xb2   : > { %v617_v46 = vadd.f32 %v616_v44, %v610_v43  ;;  %vm659_vm8 = vcmp.ne.f32.partialorder %v1920_v47, 0.0  ;;  %v937_v4 = vfloor.f32 %v936_v50  ;;  %v667_v0 = vsub.f32 %v1778_v41, %v1763_v29 }
  0xb3   : > { %v627_v33 = vrot.slane %v626_v54, 1  ;;  %v638_v48 = vadd.f32 %v637_v62, %v636_v61  ;;  %v660_v3 = vsel %vm659_vm8, %v1920_v47, 1.0  ;;  %v670_v40 = vsub.f32 %v1763_v29, %v1765_v30 }
  0xb4   : > { %618 = vst [vmem:[#allocation2 + $0x1b] sm:$0x1] %v617_v46  ;;  %1387 = vrcp.f32 %v660_v3  ;;  %v938_v6 = vmax.f32 %v937_v4, 0.0  ;;  %vm673_vm9 = vcmp.eq.f32.partialorder %v1914_v57, %v1763_v29  ;;  %vm675_vm14 = vcmp.eq.f32.partialorder %v1914_v57, %v1765_v30 }
  0xb5   : > { %v628_v1 = vadd.f32 %v627_v33, %v626_v54  ;;  %v639_v2 = vrot.slane %v638_v48, 1  ;;  %vm677_vm15 = vcmp.eq.f32.partialorder %v1914_v57, %v1778_v41  ;;  %vm1968_vm4 = vmand %vm673_vm9, %vm659_vm8 }
  0xb6   : > { %v1931_v59 = vmin.f32 %v938_v6, 9.0  ;;  %vm676_vm5 = vmand %vm675_vm14, %vm659_vm8 }
  0xb7   : > { %v629_v55 = vadd.f32 %v628_v1, %v622_v52  ;;  %v640_v63 = vadd.f32 %v639_v2, %v638_v48  ;;  %vm1982_vm6 = vmand %vm677_vm15, %vm659_vm8 }
  0xb8   : > { %vm940_vm10 = vcmp.eq.f32.partialorder %v1931_v59, 0.0  ;;  %vm952_vm11 = vcmp.eq.f32.partialorder %v1931_v59, 1.0  ;;  %vm964_vm12 = vcmp.eq.f32.partialorder %v1931_v59, 2.0  ;;  %vm976_vm13 = vcmp.eq.f32.partialorder %v1931_v59, 3.0 }
  0xb9   : > { %630 = vst [vmem:[#allocation2 + $0x1c] sm:$0x1] %v629_v55  ;;  %v641_v56 = vadd.f32 %v640_v63, %v634_v5  ;;  %v1287_v7 = vsel %vm940_vm10, 1.0, %v1540_v32  ;;  %v1288_v36 = vsel %vm952_vm11, 1.0, %v1540_v32  ;;  %v1289_v10 = vsel %vm964_vm12, 1.0, %v1540_v32 }
  0xba   : > { %v1290_v58 = vsel %vm976_vm13, 1.0, %v1540_v32  ;;  %v944_v8 = vrot.slane %v1287_v7, 4  ;;  %v956_v11 = vrot.slane %v1288_v36, 4  ;;  %v968_v13 = vrot.slane %v1289_v10, 4 }
  0xbb   : > { %642 = vst [vmem:[#allocation2 + $0x1d] sm:$0x1] %v641_v56  ;;  %v980_v15 = vrot.slane %v1290_v58, 4  ;;  %v1386_v51 = vpop.eup %1385  ;;  %vm988_vm0 = vcmp.eq.f32.partialorder %v1931_v59, 4.0  ;;  %vm1000_vm1 = vcmp.eq.f32.partialorder %v1931_v59, 5.0  ;;  %vm1012_vm2 = vcmp.eq.f32.partialorder %v1931_v59, 6.0 }
  0xbc   : > { %v686_v16 = vmul.f32 %v1386_v51, %v1920_v47  ;;  %v945_v17 = vadd.f32 %v1287_v7, %v944_v8  ;;  %v957_v18 = vadd.f32 %v1288_v36, %v956_v11  ;;  %v969_v14 = vadd.f32 %v1289_v10, %v968_v13 }
  0xbd   : > { %v981_v20 = vadd.f32 %v1290_v58, %v980_v15  ;;  %v1291_v9 = vsel %vm988_vm0, 1.0, %v1540_v32  ;;  %v1958_v12 = vsel %vm1000_vm1, 1.0, %v1540_v32  ;;  %v1989_v30 = vsel %vm1012_vm2, 1.0, %v1540_v32 }
  0xbe   : > { %v1388_v19 = vpop.eup %1387  ;;  %v687_v24 = vsel %vm683_vm7, %v686_v16, 0.0  ;;  %v946_v26 = vrot.slane %v945_v17, 2  ;;  %v958_v27 = vrot.slane %v957_v18, 2  ;;  %v970_v31 = vrot.slane %v969_v14, 2 }
  0xbf   : > { %v663_v21 = vmul.f32 %v1388_v19, %v661_v60  ;;  %v668_v22 = vmul.f32 %v1388_v19, %v667_v0  ;;  %v671_v23 = vmul.f32 %v1388_v19, %v670_v40  ;;  %v812_v25 = vmul.f32 10.0, %v687_v24 }
  0xc0   : > { %v947_v39 = vadd.f32 %v946_v26, %v945_v17  ;;  %v959_v42 = vadd.f32 %v958_v27, %v957_v18  ;;  %v971_v43 = vadd.f32 %v970_v31, %v969_v14  ;;  %v982_v61 = vrot.slane %v981_v20, 2 }
  0xc1   : > { %vm664_vm3 = vcmp.lt.f32.partialorder %v663_v21, 0.0  ;;  %v665_v34 = vadd.f32 6.0, %v663_v21  ;;  %v669_v35 = vadd.f32 2.0, %v668_v22  ;;  %v672_v37 = vadd.f32 4.0, %v671_v23 }
  0xc2   : > { %v813_v28 = vfloor.f32 %v812_v25  ;;  %v992_v44 = vrot.slane %v1291_v9, 4  ;;  %v948_v62 = vrot.slane %v947_v39, 1  ;;  %v960_v46 = vrot.slane %v959_v42, 1 }
  0xc3   : > { %v666_v53 = vsel %vm664_vm3, %v665_v34, %v663_v21  ;;  %v972_v33 = vrot.slane %v971_v43, 1  ;;  %v1993_v41 = vadd.f32 %v982_v61, %v981_v20  ;;  %v1004_v57 = vrot.slane %v1958_v12, 4 }
  0xc4   : > { %v679_v45 = vsel %vm1968_vm4, %v666_v53, 0.0  ;;  %v814_v54 = vmax.f32 %v813_v28, 0.0  ;;  %v2000_v50 = vadd.f32 %v948_v62, %v947_v39  ;;  %v2002_v52 = vadd.f32 %v1291_v9, %v992_v44 }
  0xc5   : > { %v680_v47 = vsel %vm676_vm5, %v669_v35, %v679_v45  ;;  %v2004_v2 = vadd.f32 %v960_v46, %v959_v42  ;;  %v2006_v3 = vadd.f32 %v972_v33, %v971_v43  ;;  %v984_v4 = vrot.slane %v1993_v41, 1 }
  0xc6   : > { %v681_v48 = vsel %vm1982_vm6, %v672_v37, %v680_v47  ;;  %v1998_v49 = vmin.f32 %v814_v54, 9.0  ;;  %v994_v22 = vrot.slane %v2002_v52, 2 }
  0xc7   : > { %v682_v1 = vmul.f32 0.16666667, %v681_v48 }
  0xc8   : > { %vm816_vm7 = vcmp.eq.f32.partialorder %v1998_v49, 0.0  ;;  %vm828_vm8 = vcmp.eq.f32.partialorder %v1998_v49, 1.0  ;;  %vm840_vm9 = vcmp.eq.f32.partialorder %v1998_v49, 2.0  ;;  %vm852_vm10 = vcmp.eq.f32.partialorder %v1998_v49, 3.0 }
  0xc9   : > { %v688_v5 = vmul.f32 10.0, %v682_v1  ;;  %v1277_v55 = vsel %vm816_vm7, 1.0, %v1540_v32  ;;  %v1278_v63 = vsel %vm828_vm8, 1.0, %v1540_v32  ;;  %v1279_v6 = vsel %vm840_vm9, 1.0, %v1540_v32 }
  0xca   : > { %v820_v56 = vrot.slane %v1277_v55, 4  ;;  %v832_v60 = vrot.slane %v1278_v63, 4  ;;  %v844_v0 = vrot.slane %v1279_v6, 4  ;;  %v1280_v40 = vsel %vm852_vm10, 1.0, %v1540_v32 }
  0xcb   : > { %v689_v7 = vfloor.f32 %v688_v5  ;;  %v856_v36 = vrot.slane %v1280_v40, 4  ;;  %vm864_vm11 = vcmp.eq.f32.partialorder %v1998_v49, 4.0  ;;  %vm876_vm12 = vcmp.eq.f32.partialorder %v1998_v49, 5.0 }
  0xcc   : > { %v821_v10 = vadd.f32 %v1277_v55, %v820_v56  ;;  %v833_v58 = vadd.f32 %v1278_v63, %v832_v60  ;;  %v845_v8 = vadd.f32 %v1279_v6, %v844_v0  ;;  %v1281_v11 = vsel %vm864_vm11, 1.0, %v1540_v32  ;;  %v695_v0 = vld [vmem:[#allocation2 + $0x20] sm:$0x1] }
  0xcd   : > { %v690_v13 = vmax.f32 %v689_v7, 0.0  ;;  %v2020_v15 = vadd.f32 %v1280_v40, %v856_v36  ;;  %v868_v51 = vrot.slane %v1281_v11, 4  ;;  %v1282_v16 = vsel %vm876_vm12, 1.0, %v1540_v32  ;;  %v707_v40 = vld [vmem:[#allocation2 + $0x21] sm:$0x1] }
  0xce   : > { %v822_v17 = vrot.slane %v821_v10, 2  ;;  %v834_v18 = vrot.slane %v833_v58, 2  ;;  %v846_v14 = vrot.slane %v845_v8, 2  ;;  %v880_v19 = vrot.slane %v1282_v16, 4 }
  0xcf   : > { %v2023_v20 = vmin.f32 %v690_v13, 9.0  ;;  %v858_v9 = vrot.slane %v2020_v15, 2  ;;  %v2026_v21 = vadd.f32 %v1281_v11, %v868_v51  ;;  %v719_v13 = vld [vmem:[#allocation2 + $0x22] sm:$0x1]  ;;  %vm888_vm5 = vcmp.eq.f32.partialorder %v1998_v49, 6.0 }
  0xd0   : > { %v2029_v23 = vadd.f32 %v822_v17, %v821_v10  ;;  %v2031_v24 = vadd.f32 %v834_v18, %v833_v58  ;;  %v2033_v25 = vadd.f32 %v846_v14, %v845_v8  ;;  %v2035_v26 = vadd.f32 %v1282_v16, %v880_v19  ;;  %v731_v17 = vld [vmem:[#allocation2 + $0x23] sm:$0x1] }
  0xd1   : > { %vm692_vm13 = vcmp.eq.f32.partialorder %v2023_v20, 0.0  ;;  %vm704_vm14 = vcmp.eq.f32.partialorder %v2023_v20, 1.0  ;;  %vm716_vm15 = vcmp.eq.f32.partialorder %v2023_v20, 2.0  ;;  %vm728_vm0 = vcmp.eq.f32.partialorder %v2023_v20, 3.0 }
  0xd2   : > { %v1267_v27 = vsel %vm692_vm13, 1.0, %v1540_v32  ;;  %v1268_v31 = vsel %vm704_vm14, 1.0, %v1540_v32  ;;  %v1269_v34 = vsel %vm716_vm15, 1.0, %v1540_v32  ;;  %v1270_v35 = vsel %vm728_vm0, 1.0, %v1540_v32 }
  0xd3   : > { %v696_v37 = vrot.slane %v1267_v27, 4  ;;  %v708_v38 = vrot.slane %v1268_v31, 4  ;;  %v720_v28 = vrot.slane %v1269_v34, 4  ;;  %v732_v39 = vrot.slane %v1270_v35, 4 }
  0xd4   : > { %vm740_vm1 = vcmp.eq.f32.partialorder %v2023_v20, 4.0  ;;  %vm752_vm2 = vcmp.eq.f32.partialorder %v2023_v20, 5.0  ;;  %vm764_vm3 = vcmp.eq.f32.partialorder %v2023_v20, 6.0  ;;  %vm776_vm4 = vcmp.eq.f32.partialorder %v2023_v20, 7.0 }
  0xd5   : > { %v697_v42 = vadd.f32 %v1267_v27, %v696_v37  ;;  %v709_v43 = vadd.f32 %v1268_v31, %v708_v38  ;;  %v721_v53 = vadd.f32 %v1269_v34, %v720_v28  ;;  %v733_v29 = vadd.f32 %v1270_v35, %v732_v39 }
  0xd6   : > { %v1271_v61 = vsel %vm740_vm1, 1.0, %v1540_v32  ;;  %v1272_v44 = vsel %vm752_vm2, 1.0, %v1540_v32  ;;  %v1273_v45 = vsel %vm764_vm3, 1.0, %v1540_v32  ;;  %v1274_v54 = vsel %vm776_vm4, 1.0, %v1540_v32 }
  0xd7   : > { %v698_v62 = vrot.slane %v697_v42, 2  ;;  %v710_v46 = vrot.slane %v709_v43, 2  ;;  %v722_v47 = vrot.slane %v721_v53, 2  ;;  %v734_v33 = vrot.slane %v733_v29, 2 }
  0xd8   : > { %v744_v48 = vrot.slane %v1271_v61, 4  ;;  %v756_v1 = vrot.slane %v1272_v44, 4  ;;  %v768_v5 = vrot.slane %v1273_v45, 4  ;;  %v780_v55 = vrot.slane %v1274_v54, 4 }
  0xd9   : > { %v699_v63 = vadd.f32 %v698_v62, %v697_v42  ;;  %v711_v6 = vadd.f32 %v710_v46, %v709_v43  ;;  %v723_v56 = vadd.f32 %v722_v47, %v721_v53  ;;  %v735_v60 = vadd.f32 %v734_v33, %v733_v29  ;;  %v767_v46 = vld [vmem:[#allocation2 + $0x26] sm:$0x1] }
  0xda   : > { %v745_v7 = vadd.f32 %v1271_v61, %v744_v48  ;;  %v757_v36 = vadd.f32 %v1272_v44, %v756_v1  ;;  %v769_v10 = vadd.f32 %v1273_v45, %v768_v5  ;;  %v781_v58 = vadd.f32 %v1274_v54, %v780_v55  ;;  %v743_v44 = vld [vmem:[#allocation2 + $0x24] sm:$0x1]  ;;  %v755_v45 = vld [vmem:[#allocation2 + $0x25] sm:$0x1]  ;;  %v779_v48 = vld [vmem:[#allocation2 + $0x27] sm:$0x1] }
  0xdb   : > { %v700_v8 = vrot.slane %v699_v63, 1  ;;  %v712_v11 = vrot.slane %v711_v6, 1  ;;  %v724_v51 = vrot.slane %v723_v56, 1  ;;  %v736_v16 = vrot.slane %v735_v60, 1 }
  0xdc   : > { %v746_v18 = vrot.slane %v745_v7, 2  ;;  %v758_v14 = vrot.slane %v757_v36, 2  ;;  %v770_v19 = vrot.slane %v769_v10, 2  ;;  %v782_v27 = vrot.slane %v781_v58, 2 }
  0xdd   : > { %v701_v31 = vadd.f32 %v700_v8, %v699_v63  ;;  %v713_v34 = vadd.f32 %v712_v11, %v711_v6  ;;  %v725_v35 = vadd.f32 %v724_v51, %v723_v56  ;;  %v737_v37 = vadd.f32 %v736_v16, %v735_v60  ;;  %v819_v60 = vld [vmem:[#allocation2 + $0x2a] sm:$0x1] }
  0xde   : > { %v747_v38 = vadd.f32 %v746_v18, %v745_v7  ;;  %v759_v28 = vadd.f32 %v758_v14, %v757_v36  ;;  %v771_v39 = vadd.f32 %v770_v19, %v769_v10  ;;  %v783_v42 = vadd.f32 %v782_v27, %v781_v58 }
  0xdf   : > { %v702_v43 = vadd.f32 %v701_v31, %v695_v0  ;;  %v714_v53 = vadd.f32 %v713_v34, %v707_v40  ;;  %v726_v29 = vadd.f32 %v725_v35, %v719_v13  ;;  %v738_v61 = vadd.f32 %v737_v37, %v731_v17  ;;  %v831_v0 = vld [vmem:[#allocation2 + $0x2b] sm:$0x1]  ;;  %v843_v31 = vld [vmem:[#allocation2 + $0x2c] sm:$0x1] }
  0xe0   : > { %v748_v54 = vrot.slane %v747_v38, 1  ;;  %v760_v62 = vrot.slane %v759_v28, 1  ;;  %v772_v47 = vrot.slane %v771_v39, 1  ;;  %v784_v33 = vrot.slane %v783_v42, 1 }
  0xe1   : > { %703 = vst [vmem:[#allocation2 + $0x20] sm:$0x1] %v702_v43  ;;  %715 = vst [vmem:[#allocation2 + $0x21] sm:$0x1] %v714_v53  ;;  %vm788_vm6 = vcmp.eq.f32.partialorder %v2023_v20, 8.0  ;;  %vm800_vm7 = vcmp.eq.f32.partialorder %v2023_v20, 9.0 }
  0xe2   : > { %727 = vst [vmem:[#allocation2 + $0x22] sm:$0x1] %v726_v29  ;;  %739 = vst [vmem:[#allocation2 + $0x23] sm:$0x1] %v738_v61  ;;  %v824_v1 = vrot.slane %v2029_v23, 1  ;;  %v836_v5 = vrot.slane %v2031_v24, 1  ;;  %v749_v55 = vadd.f32 %v748_v54, %v747_v38  ;;  %v761_v63 = vadd.f32 %v760_v62, %v759_v28 }
  0xe3   : > { %v773_v6 = vadd.f32 %v772_v47, %v771_v39  ;;  %v785_v56 = vadd.f32 %v784_v33, %v783_v42  ;;  %v1275_v40 = vsel %vm788_vm6, 1.0, %v1540_v32  ;;  %v1276_v7 = vsel %vm800_vm7, 1.0, %v1540_v32  ;;  %v855_v39 = vld [vmem:[#allocation2 + $0x2d] sm:$0x1]  ;;  %v867_v62 = vld [vmem:[#allocation2 + $0x2e] sm:$0x1] }
  0xe4   : > { %v825_v36 = vadd.f32 %v824_v1, %v2029_v23  ;;  %v837_v10 = vadd.f32 %v836_v5, %v2031_v24  ;;  %v750_v58 = vadd.f32 %v749_v55, %v743_v44  ;;  %v762_v20 = vadd.f32 %v761_v63, %v755_v45 }
  0xe5   : > { %v774_v8 = vadd.f32 %v773_v6, %v767_v46  ;;  %v786_v11 = vadd.f32 %v785_v56, %v779_v48  ;;  %v792_v13 = vrot.slane %v1275_v40, 4  ;;  %v804_v51 = vrot.slane %v1276_v7, 4  ;;  %v879_v46 = vld [vmem:[#allocation2 + $0x2f] sm:$0x1]  ;;  %v943_v48 = vld [vmem:[#allocation2 + $0x34] sm:$0x1] }
  0xe6   : > { %v826_v16 = vadd.f32 %v825_v36, %v819_v60  ;;  %v838_v17 = vadd.f32 %v837_v10, %v831_v0  ;;  %751 = vst [vmem:[#allocation2 + $0x24] sm:$0x1] %v750_v58  ;;  %763 = vst [vmem:[#allocation2 + $0x25] sm:$0x1] %v762_v20  ;;  %v848_v18 = vrot.slane %v2033_v25, 1  ;;  %v859_v23 = vadd.f32 %v858_v9, %v2020_v15 }
  0xe7   : > { %775 = vst [vmem:[#allocation2 + $0x26] sm:$0x1] %v774_v8  ;;  %787 = vst [vmem:[#allocation2 + $0x27] sm:$0x1] %v786_v11  ;;  %v870_v24 = vrot.slane %v2026_v21, 2  ;;  %v882_v14 = vrot.slane %v2035_v26, 2  ;;  %v793_v19 = vadd.f32 %v1275_v40, %v792_v13  ;;  %v805_v27 = vadd.f32 %v1276_v7, %v804_v51 }
  0xe8   : > { %827 = vst [vmem:[#allocation2 + $0x2a] sm:$0x1] %v826_v16  ;;  %839 = vst [vmem:[#allocation2 + $0x2b] sm:$0x1] %v838_v17  ;;  %v1283_v34 = vsel %vm888_vm5, 1.0, %v1540_v32  ;;  %vm900_vm8 = vcmp.eq.f32.partialorder %v1998_v49, 7.0  ;;  %v849_v35 = vadd.f32 %v848_v18, %v2033_v25  ;;  %v950_v51 = vadd.f32 %v2000_v50, %v943_v48 }
  0xe9   : > { %v860_v37 = vrot.slane %v859_v23, 1  ;;  %v871_v15 = vadd.f32 %v870_v24, %v2026_v21  ;;  %v883_v9 = vadd.f32 %v882_v14, %v2035_v26  ;;  %v794_v38 = vrot.slane %v793_v19, 2  ;;  %v955_v6 = vld [vmem:[#allocation2 + $0x35] sm:$0x1]  ;;  %v791_v56 = vld [vmem:[#allocation2 + $0x28] sm:$0x1] }
  0xea   : > { %v806_v28 = vrot.slane %v805_v27, 2  ;;  %v892_v42 = vrot.slane %v1283_v34, 4  ;;  %v1284_v43 = vsel %vm900_vm8, 1.0, %v1540_v32  ;;  %v850_v53 = vadd.f32 %v849_v35, %v843_v31  ;;  %v803_v60 = vld [vmem:[#allocation2 + $0x29] sm:$0x1] }
  0xeb   : > { %v861_v29 = vadd.f32 %v860_v37, %v859_v23  ;;  %v872_v61 = vrot.slane %v871_v15, 1  ;;  %v884_v44 = vrot.slane %v883_v9, 1  ;;  %v795_v45 = vadd.f32 %v794_v38, %v793_v19  ;;  %v967_v8 = vld [vmem:[#allocation2 + $0x36] sm:$0x1]  ;;  %v979_v14 = vld [vmem:[#allocation2 + $0x37] sm:$0x1] }
  0xec   : > { %v807_v54 = vadd.f32 %v806_v28, %v805_v27  ;;  %v893_v25 = vadd.f32 %v1283_v34, %v892_v42  ;;  %v904_v47 = vrot.slane %v1284_v43, 4  ;;  %vm1024_vm9 = vcmp.eq.f32.partialorder %v1931_v59, 7.0  ;;  %851 = vst [vmem:[#allocation2 + $0x2c] sm:$0x1] %v850_v53  ;;  %951 = vst [vmem:[#allocation2 + $0x34] sm:$0x1] %v950_v51 }
  0xed   : > { %v862_v21 = vadd.f32 %v861_v29, %v855_v39  ;;  %v873_v26 = vadd.f32 %v872_v61, %v871_v15  ;;  %v885_v33 = vadd.f32 %v884_v44, %v883_v9  ;;  %vm912_vm10 = vcmp.eq.f32.partialorder %v1998_v49, 8.0  ;;  %v903_v15 = vld [vmem:[#allocation2 + $0x31] sm:$0x1]  ;;  %v991_v29 = vld [vmem:[#allocation2 + $0x38] sm:$0x1] }
  0xee   : > { %v796_v1 = vrot.slane %v795_v45, 1  ;;  %v808_v5 = vrot.slane %v807_v54, 1  ;;  %v894_v55 = vrot.slane %v893_v25, 2  ;;  %v905_v63 = vadd.f32 %v1284_v43, %v904_v47  ;;  %v1003_v48 = vld [vmem:[#allocation2 + $0x39] sm:$0x1] }
  0xef   : > { %863 = vst [vmem:[#allocation2 + $0x2d] sm:$0x1] %v862_v21  ;;  %v874_v0 = vadd.f32 %v873_v26, %v867_v62  ;;  %v886_v40 = vadd.f32 %v885_v33, %v879_v46  ;;  %v1285_v7 = vsel %vm912_vm10, 1.0, %v1540_v32  ;;  %vm924_vm11 = vcmp.eq.f32.partialorder %v1998_v49, 9.0  ;;  %v891_v49 = vld [vmem:[#allocation2 + $0x30] sm:$0x1] }
  0xf0   : > { %v797_v36 = vadd.f32 %v796_v1, %v795_v45  ;;  %v809_v10 = vadd.f32 %v808_v5, %v807_v54  ;;  %v895_v58 = vadd.f32 %v894_v55, %v893_v25  ;;  %v906_v20 = vrot.slane %v905_v63, 2  ;;  %v915_v46 = vld [vmem:[#allocation2 + $0x32] sm:$0x1]  ;;  %v927_v55 = vld [vmem:[#allocation2 + $0x33] sm:$0x1] }
  0xf1   : > { %875 = vst [vmem:[#allocation2 + $0x2e] sm:$0x1] %v874_v0  ;;  %887 = vst [vmem:[#allocation2 + $0x2f] sm:$0x1] %v886_v40  ;;  %v916_v11 = vrot.slane %v1285_v7, 4  ;;  %v1286_v13 = vsel %vm924_vm11, 1.0, %v1540_v32  ;;  %v962_v16 = vadd.f32 %v2004_v2, %v955_v6  ;;  %v974_v31 = vadd.f32 %v2006_v3, %v967_v8 }
  0xf2   : > { %v798_v17 = vadd.f32 %v797_v36, %v791_v56  ;;  %v810_v18 = vadd.f32 %v809_v10, %v803_v60  ;;  %v896_v23 = vrot.slane %v895_v58, 1  ;;  %v907_v24 = vadd.f32 %v906_v20, %v905_v63  ;;  %v1015_v36 = vld [vmem:[#allocation2 + $0x3a] sm:$0x1] }
  0xf3   : > { %v917_v19 = vadd.f32 %v1285_v7, %v916_v11  ;;  %v928_v27 = vrot.slane %v1286_v13, 4  ;;  %963 = vst [vmem:[#allocation2 + $0x35] sm:$0x1] %v962_v16  ;;  %v985_v34 = vadd.f32 %v984_v4, %v1993_v41  ;;  %v995_v35 = vadd.f32 %v994_v22, %v2002_v52  ;;  %975 = vst [vmem:[#allocation2 + $0x36] sm:$0x1] %v974_v31 }
  0xf4   : > { %799 = vst [vmem:[#allocation2 + $0x28] sm:$0x1] %v798_v17  ;;  %811 = vst [vmem:[#allocation2 + $0x29] sm:$0x1] %v810_v18  ;;  %v897_v50 = vadd.f32 %v896_v23, %v895_v58  ;;  %v908_v2 = vrot.slane %v907_v24, 1  ;;  %v1005_v37 = vadd.f32 %v1958_v12, %v1004_v57  ;;  %v1016_v28 = vrot.slane %v1989_v30, 4 }
  0xf5   : > { %v918_v9 = vrot.slane %v917_v19, 2  ;;  %v929_v38 = vadd.f32 %v1286_v13, %v928_v27  ;;  %v986_v3 = vadd.f32 %v985_v34, %v979_v14  ;;  %v996_v39 = vrot.slane %v995_v35, 1  ;;  %v1027_v17 = vld [vmem:[#allocation2 + $0x3b] sm:$0x1] }
  0xf6   : > { %v898_v41 = vadd.f32 %v897_v50, %v891_v49  ;;  %v909_v4 = vadd.f32 %v908_v2, %v907_v24  ;;  %v1006_v42 = vrot.slane %v1005_v37, 2  ;;  %v1017_v52 = vadd.f32 %v1989_v30, %v1016_v28  ;;  %v1051_v50 = vld [vmem:[#allocation2 + $0x3d] sm:$0x1]  ;;  %v1063_v28 = vld [vmem:[#allocation2 + $0x8] sm:$0xff] (%p212_p11) }
  0xf7   : > { %v919_v43 = vadd.f32 %v918_v9, %v917_v19  ;;  %v930_v53 = vrot.slane %v929_v38, 2  ;;  %987 = vst [vmem:[#allocation2 + $0x37] sm:$0x1] %v986_v3  ;;  %v1294_v12 = vsel %vm1024_vm9, 1.0, %v1540_v32  ;;  %v997_v22 = vadd.f32 %v996_v39, %v995_v35  ;;  %v1039_v19 = vld [vmem:[#allocation2 + $0x3c] sm:$0x1] }
  0xf8   : > { %899 = vst [vmem:[#allocation2 + $0x30] sm:$0x1] %v898_v41  ;;  %v910_v57 = vadd.f32 %v909_v4, %v903_v15  ;;  %v1007_v61 = vadd.f32 %v1006_v42, %v1005_v37  ;;  %v1028_v44 = vrot.slane %v1294_v12, 4  ;;  %v1018_v62 = vrot.slane %v1017_v52, 2  ;;  %v1062_v37 = vld [vmem:[#allocation2] sm:$0xff] (%p212_p11)  ;;  %v1064_v9 = vld [vmem:[#allocation2 + $0x10] sm:$0xff] (%p212_p11) }
  0xf9   : > { %v920_v45 = vrot.slane %v919_v43, 1  ;;  %v931_v54 = vadd.f32 %v930_v53, %v929_v38  ;;  %vm1036_vm12 = vcmp.eq.f32.partialorder %v1931_v59, 8.0  ;;  %v998_v25 = vadd.f32 %v997_v22, %v991_v29  ;;  %v1066_v15 = vld [vmem:[#allocation2 + $0x20] sm:$0xff] (%p212_p11)  ;;  %v1065_v39 = vld [vmem:[#allocation2 + $0x18] sm:$0xff] (%p212_p11) }
  0xfa   : > { %911 = vst [vmem:[#allocation2 + $0x31] sm:$0x1] %v910_v57  ;;  %v1008_v47 = vrot.slane %v1007_v61, 1  ;;  %v1029_v21 = vadd.f32 %v1294_v12, %v1028_v44  ;;  %v1295_v30 = vsel %vm1036_vm12, 1.0, %v1540_v32  ;;  %v1019_v1 = vadd.f32 %v1018_v62, %v1017_v52 }
  0xfb   : > { %v921_v26 = vadd.f32 %v920_v45, %v919_v43  ;;  %v932_v33 = vrot.slane %v931_v54, 1  ;;  %v1040_v5 = vrot.slane %v1295_v30, 4  ;;  %999 = vst [vmem:[#allocation2 + $0x38] sm:$0x1] %v998_v25  ;;  %vm1048_vm13 = vcmp.eq.f32.partialorder %v1931_v59, 9.0  ;;  %v1067_v41 = vld [vmem:[#allocation2 + $0x28] sm:$0xff] (%p212_p11) }
  0xfc   : > { %v1009_v63 = vadd.f32 %v1008_v47, %v1007_v61  ;;  %v1030_v6 = vrot.slane %v1029_v21, 2  ;;  %v1020_v0 = vrot.slane %v1019_v1, 1  ;;  %v1296_v58 = vsel %vm1048_vm13, 1.0, %v1540_v32 }
  0xfd   : > { %v922_v56 = vadd.f32 %v921_v26, %v915_v46  ;;  %v933_v60 = vadd.f32 %v932_v33, %v931_v54  ;;  %v1041_v40 = vadd.f32 %v1295_v30, %v1040_v5  ;;  %v1052_v13 = vrot.slane %v1296_v58, 4 }
  0xfe   : > { %v1010_v7 = vadd.f32 %v1009_v63, %v1003_v48  ;;  %v1031_v10 = vadd.f32 %v1030_v6, %v1029_v21  ;;  %v1021_v8 = vadd.f32 %v1020_v0, %v1019_v1  ;;  %v1070_v38 = vsub.f32 (%p212_p11), %v1062_v37, %v1066_v15 }
  0xff   : > { %923 = vst [vmem:[#allocation2 + $0x32] sm:$0x1] %v922_v56  ;;  %v934_v20 = vadd.f32 %v933_v60, %v927_v55  ;;  %v1042_v11 = vrot.slane %v1041_v40, 2  ;;  %v1053_v18 = vadd.f32 %v1296_v58, %v1052_v13  ;;  %v1071_v43 = vsub.f32 (%p212_p11), %v1063_v28, %v1067_v41 }
 0x100   : > { %1011 = vst [vmem:[#allocation2 + $0x39] sm:$0x1] %v1010_v7  ;;  %v1032_v51 = vrot.slane %v1031_v10, 1  ;;  %v1022_v16 = vadd.f32 %v1021_v8, %v1015_v36  ;;  %1074 = vadd.xlane.f32.xlu0 (%p212_p11), %v1070_v38  ;;  %v1086_v29 = vlaneseq (%p212_p11)  ;;  %v1541_v45 = vmov (%p212_p11), 0.4  }
 0x101   : > { %935 = vst [vmem:[#allocation2 + $0x33] sm:$0x1] %v934_v20  ;;  %v1043_v59 = vadd.f32 %v1042_v11, %v1041_v40  ;;  %v1054_v14 = vrot.slane %v1053_v18, 2  ;;  %v1542_v21 = vmov (%p212_p11), 0.0   ;;  %vm1130_vm0 = vcmask (%p212_p11), 0  }
 0x102   : > { %v1033_v23 = vadd.f32 %v1032_v51, %v1031_v10  ;;  %1023 = vst [vmem:[#allocation2 + $0x3a] sm:$0x1] %v1022_v16  ;;  %v1087_v52 = vshrl.u32 (%p212_p11), %v1086_v29, 7 }
 0x103   : > { %v1044_v24 = vrot.slane %v1043_v59, 1  ;;  %v1055_v32 = vadd.f32 %v1054_v14, %v1053_v18 }
 0x104   : > { %v1034_v49 = vadd.f32 %v1033_v23, %v1027_v17  ;;  %1076 = vadd.xlane.f32.xlu0 (%p212_p11), %v1071_v43  ;;  %v1088_v12 = vadd.s32 (%p212_p11), 8, %v1087_v52  ;;  %v1090_v57 = vadd.s32 (%p212_p11), 24, %v1087_v52 }
 0x105   : > { %v1045_v27 = vadd.f32 %v1044_v24, %v1043_v59  ;;  %v1056_v34 = vrot.slane %v1055_v32, 1  ;;  %1061 = sbr.rel (!%p212_p11) target bundleno = 440 (0x1b8), region = 44 }
 0x106   : > { %1035 = vst [vmem:[#allocation2 + $0x3b] sm:$0x1] %v1034_v49  ;;  %vm1092_vm14 = vcmp.lt.s32.totalorder (%p212_p11), %v1088_v12, 10  ;;  %vm1102_vm15 = vcmp.lt.s32.totalorder (%p212_p11), %v1090_v57, 30 }
 0x107   : > { %v1046_v31 = vadd.f32 %v1045_v27, %v1039_v19  ;;  %v1057_v2 = vadd.f32 %v1056_v34, %v1055_v32  ;;  %v1112_v54 = vsel (%p212_p11), %vm1092_vm14, 0.3, %v1541_v45  ;;  %v1106_v30 = vsel (%p212_p11), %vm1102_vm15, 0.4, %v1542_v21 }
 0x108   : > { %v1068_v3 = vld [vmem:[#allocation2 + $0x30] sm:$0xff] (%p212_p11) }
 0x109   : > { %1047 = vst [vmem:[#allocation2 + $0x3c] sm:$0x1] %v1046_v31  ;;  %v1058_v35 = vadd.f32 %v1057_v2, %v1051_v50  ;;  %v1072_v4 = vsub.f32 (%p212_p11), %v1064_v9, %v1068_v3 }
 0x10b   : > { %1059 = vst [vmem:[#allocation2 + $0x3d] sm:$0x1] %v1058_v35  ;;  %1078 = vadd.xlane.f32.xlu1 (%p212_p11), %v1072_v4 }
 0x112   : > { %v1069_v42 = vld [vmem:[#allocation2 + $0x38] sm:$0xff] }
 0x113   : > { %v1073_v53 = vsub.f32 %v1065_v39, %v1069_v42 }
 0x115   : > { %1080 = vadd.xlane.f32.xlu1 %v1073_v53 }
 0x18d   : > { %v1075_v22 = vpop.xlane.xlu0 %1074 }
 0x18e   : > { %v1082_v44 = vand.u32 2147483647, %v1075_v22 }
 0x190   : > { %v1115_v33 = vmul.f32 0.3, %v1082_v44 }
 0x191   : > { %v1077_v62 = vpop.xlane.xlu0 %1076 }
 0x192   : > { %v1083_v25 = vand.u32 2147483647, %v1077_v62 }
 0x194   : > { %v1116_v48 = vmul.f32 %v1112_v54, %v1083_v25 }
 0x196   : > { %v1119_v5 = vadd.f32 %v1116_v48, %v1115_v33 }
 0x198   : > { %v1079_v61 = vpop.xlane.xlu1 %1078 }
 0x199   : > { %v1084_v46 = vand.u32 2147483647, %v1079_v61 }
 0x19b   : > { %v1117_v1 = vmul.f32 0.4, %v1084_v46 }
 0x19d   : > { %v1120_v63 = vadd.f32 %v1119_v5, %v1117_v1 }
 0x1a2   : > { %v1081_v47 = vpop.xlane.xlu1 %1080 }
 0x1a3   : > { %v1085_v26 = vand.u32 2147483647, %v1081_v47 }
 0x1a5   : > { %v1118_v55 = vmul.f32 %v1106_v30, %v1085_v26 }
 0x1a7   : > { %v1121_v6 = vadd.f32 %v1120_v63, %v1118_v55 }
 0x1a9   : > { %v1122_v56 = vrot.slane %v1121_v6, 4 }
 0x1ab   : > { %v1123_v60 = vadd.f32 %v1122_v56, %v1121_v6 }
 0x1ad   : > { %v1124_v0 = vrot.slane %v1123_v60, 2 }
 0x1af   : > { %v1125_v40 = vadd.f32 %v1124_v0, %v1123_v60 }
 0x1b1   : > { %v1126_v7 = vrot.slane %v1125_v40, 1 }
 0x1b3   : > { %v1127_v36 = vadd.f32 %v1126_v7, %v1125_v40 }
 0x1b5   : > { %v1129_v10 = vmul.f32 0.1, %v1127_v36 }
 0x1b7   : > { %1131 = vst.msk [vmem:[#allocation8] sm:$0x1] %vm1130_vm0, %v1129_v10 }
 0x1b8 PF: > { %p2106_p4 = scmp.eq.s32.totalorder %s1225_s15, 1  ;;  %s1543_s19 = smov [#allocation8]  }
 0x1b9   : > { %s1139_s25 = sshll.u32 %s1543_s19, 4  ;;  %s1140_s25 = int_to_ptr.vmem [resolvable:$true] %s1139_s25 }
 0x1ba   : > { %s1449_s28 = scalar_lea.vmem %s1140_s25, 16  ;;  %s1455_s3 = scalar_lea.vmem %s1140_s25, 32 }
 0x1bb   : > { %p1450_p8 = scmp.ne.s32.totalorder %s1140_s25, %s1449_s28  ;;  %p1456_p13 = scmp.lt.s32.totalorder %s1140_s25, %s1140_s25 }
 0x1bc   : > { %p1457_p3 = scmp.lt.s32.totalorder %s1455_s3, %s1449_s28 }
 0x1bd   : > { %p1451_p1 = pnand %p1450_p8, %p2106_p4 }
 0x1be   : > { %p1458_p5 = por %p1457_p3, %p1456_p13 }
 0x1bf   : > { %p1452_p2 = pneg %p1451_p1 }
 0x1c1   : > { %p1459_p6 = pnand %p1458_p5, %p1452_p2 }
 0x1c3   : > { %1462 = shalt.err (!%p1459_p6)
}
 0x1c4   : > { %s1463_s8 = scalar_lea.hbm %s2152_s2, 16 }
 0x1c5   : > { %p1464_p10 = scmp.ne.s32.totalorder %s2152_s2, %s1463_s8  ;;  %p1469_p7 = scmp.lt.u32.totalorder %s1463_s8, %s2152_s2 }
 0x1c7   : > { %p1465_p12 = pnand %p1464_p10, %p2106_p4 }
 0x1c9   : > { %p1466_p0 = pneg %p1465_p12 }
 0x1cb   : > { %p1471_p9 = pnand %p1469_p7, %p1466_p0 }
 0x1cd   : > { %1474 = shalt.err (!%p1471_p9)
}
 0x1ce   : > { %1313 = dma.vmem_to_hbm [thread:$0]  (%p2106_p4), %s1140_s25, 16, %s2152_s2, [#allocation5]  }
 0x1cf   : > { %1508 = dma.done.wait (%p2106_p4), [#allocation5], 16  }
 0x1d0   : > { %1510 = vsyncadd (%p2106_p4), [#allocation5], 4294967280 }
 0x1d1 PF: > { %s19_s14 = sadd.s32 1, %s1533_s14   ;;  %s2167_s9 = smov %s1517_s10 }
 0x1d2   : > { %p16_p11 = scmp.ge.s32.totalorder %s19_s14, 4   ;;  %s2168_s10 = smov %s1521_s11 }
 0x1d3   : > { %s2169_s11 = smov %s1606_s20  ;;  %s2170_s12 = smov %s1529_s13 }
 0x1d4   : > { %s2171_s13 = smov %s2173_s16  ;;  %18 = sbr.rel (!%p16_p11) target bundleno = 7 (0x7), region = 90 }
 0x1db   :  { %1152 = vsyncpa [#allocation4], 1 }
 0x1dc   :  { %1154 = vsyncpa [#allocation4 + $0x1], 1 }
 0x1dd   :  { %1155 = vsyncpa [#allocation7], 1 }
 0x1de   :  { %1157 = vsyncpa [#allocation7 + $0x1], 1 }
 0x1df   :  { %1158 = vsyncpa [#allocation5], 1 }
 0x1e0   :  { %1160 = vsyncpa [#allocation5 + $0x1], 1 }

</bundles_post_ra>
